<compile_context>
chip_gen: v7x
topology: tpu7x:2x2x1
jax: 0.10.0
libtpu: 0.0.40
codegen_flags: <defaults>
</compile_context>

<pallas_src>
import math

import jax
import jax.numpy as jnp
from jax import lax
from jax.experimental import pallas as pl
from jax.experimental.pallas import tpu as pltpu

_F32_MIN = float(jnp.finfo(jnp.float32).min)   # finite "-inf" for top-k masking
_VMEM_LIMIT = 64 * 1024 * 1024                 # > v5e 16 MiB scoped default, <= v7x physical


def _pick_batch_block(B, N):
    """Batch items per grid step: enough rows (Bt*N) to feed a 256-wide MXU
    pass and amortize per-step pipeline overhead, bounded for VMEM."""
    target = max(1, 512 // max(N, 1))
    bt = 1
    for cand in range(1, min(B, target) + 1):
        if B % cand == 0:
            bt = cand
    return bt


def _gcn_matmuls(adj, x, w, *, md, channels_first, reassoc):
    """(adj @ x) @ W  (if Cin < Cout)  else  adj @ (x @ W).

    MXU operands are cast to `md` with f32 accumulation; channels_first is
    consumed via dot_general contracting dims (no explicit x.T)."""
    am, xm, wm = adj.astype(md), x.astype(md), w.astype(md)
    if reassoc:
        if channels_first:                       # x: (Cin, N)
            ax = lax.dot_general(am, xm, (((1,), (1,)), ((), ())),
                                 preferred_element_type=jnp.float32)      # (N, Cin)
        else:                                    # x: (N, Cin)
            ax = lax.dot_general(am, xm, (((1,), (0,)), ((), ())),
                                 preferred_element_type=jnp.float32)      # (N, Cin)
        return lax.dot_general(ax.astype(md), wm, (((1,), (0,)), ((), ())),
                               preferred_element_type=jnp.float32)        # (N, Cout)
    if channels_first:                           # support = x^T @ W, no transpose
        support = lax.dot_general(xm, wm, (((0,), (0,)), ((), ())),
                                  preferred_element_type=jnp.float32)     # (N, Cout)
    else:
        support = lax.dot_general(xm, wm, (((1,), (0,)), ((), ())),
                                  preferred_element_type=jnp.float32)
    return lax.dot_general(am, support.astype(md), (((1,), (0,)), ((), ())),
                           preferred_element_type=jnp.float32)


# --------------------------------------------------------------------------
# Fused kernel: pairwise distances + top-k + adjacency + GCN, all in VMEM.
# --------------------------------------------------------------------------
def _fused_knn_gcn_call(B, N, Cin, Cout, k, out_dtype, *, channels_first,
                        matmul_dtype, batch_block):
    Bt, md = batch_block, matmul_dtype
    reassoc = Cin < Cout
    x_block = (Bt, Cin, N) if channels_first else (Bt, N, Cin)
    # Collapse the support matmul into one (Bt*N, Cin)@(Cin, Cout) MXU pass
    # when the leading-dim merge is layout-free (N multiple of 8).
    collapse = (not reassoc) and (not channels_first) and (N % 8 == 0)

    def kernel(x_ref, w_ref, b_ref, o_ref):
        w = w_ref[...]
        bias = b_ref[...].astype(jnp.float32)                                 # (1, Cout)
        col = lax.broadcasted_iota(jnp.int32, (N, N), 1).astype(jnp.float32)  # hoisted
        ones_feat = jnp.ones((1, Cin), jnp.float32)

        support_all = None
        if collapse:
            x_all = x_ref[...].reshape(Bt * N, Cin)
            support_all = lax.dot_general(
                x_all.astype(md), w.astype(md), (((1,), (0,)), ((), ())),
                preferred_element_type=jnp.float32)                           # (Bt*N, Cout)

        for bi in range(Bt):                       # static, unrolled (Bt small)
            x = x_ref[bi]                          # (N, Cin) or (Cin, N)
            xf = x.astype(jnp.float32)
            sq = xf * xf

            # ---- pairwise -||xi - xj||^2 in f32 (ranking fidelity), no x.T ----
            if channels_first:
                inner = lax.dot_general(xf, xf, (((0,), (0,)), ((), ())),
                                        preferred_element_type=jnp.float32)   # (N, N)
                xx_row = jnp.sum(sq, axis=0, keepdims=True)                   # (1, N)
                xx_col = lax.dot_general(sq, ones_feat, (((0,), (1,)), ((), ())),
                                         preferred_element_type=jnp.float32)  # (N, 1)
            else:
                inner = lax.dot_general(xf, xf, (((1,), (1,)), ((), ())),
                                        preferred_element_type=jnp.float32)   # (N, N)
                xx_col = jnp.sum(sq, axis=1, keepdims=True)                   # (N, 1)
                xx_row = lax.dot_general(ones_feat, sq, (((1,), (1,)), ((), ())),
                                         preferred_element_type=jnp.float32)  # (1, N)
            d = 2.0 * inner - xx_col - xx_row      # diag ~ 0 -> self is row max

            # ---- fused top-k -> 1/k adjacency, never leaves VMEM ----
            # k iterative row-max passes, leftmost tie-break, self-neighbor
            # included (matches torch.topk on -distance).
            adj = jnp.zeros((N, N), jnp.float32)
            work = d
            for _ in range(k):                     # k static & small
                rowmax = jnp.max(work, axis=-1, keepdims=True)                # (N, 1)
                cand = jnp.where(work == rowmax, col, jnp.float32(N))
                sel = jnp.min(cand, axis=-1, keepdims=True)                   # leftmost
                hit = col == sel                                              # 1 per row
                adj = adj + hit.astype(jnp.float32)
                work = jnp.where(hit, _F32_MIN, work)
            adj = adj * (1.0 / k)

            # ---- GCN matmuls (MXU dtype = md, f32 accumulation) ----
            if support_all is not None:
                support = support_all[bi * N:(bi + 1) * N, :]
                out = lax.dot_general(adj.astype(md), support.astype(md),
                                      (((1,), (0,)), ((), ())),
                                      preferred_element_type=jnp.float32)
            else:
                out = _gcn_matmuls(adj, x, w, md=md,
                                   channels_first=channels_first, reassoc=reassoc)
            o_ref[bi] = (out + bias).astype(o_ref.dtype)

    itemsize = jnp.dtype(out_dtype).itemsize
    nsq = N * N
    cost = pl.CostEstimate(
        flops=int(B * (2 * nsq * Cin + (4 + 6 * k) * nsq
                       + 2 * nsq * (Cin if reassoc else Cout)
                       + 2 * N * Cin * Cout + 2 * N * Cout)),
        transcendentals=0,
        bytes_accessed=int(B * N * Cin * itemsize + Cin * Cout * 4 + Cout * 4
                           + B * N * Cout * itemsize),
    )
    return pl.pallas_call(
        kernel,
        out_shape=jax.ShapeDtypeStruct((B, N, Cout), out_dtype),
        grid=(B // Bt,),
        in_specs=[pl.BlockSpec(x_block, lambda b: (b, 0, 0)),
                  pl.BlockSpec((Cin, Cout), lambda b: (0, 0)),
                  pl.BlockSpec((1, Cout), lambda b: (0, 0))],
        out_specs=pl.BlockSpec((Bt, N, Cout), lambda b: (b, 0, 0)),
        compiler_params=pltpu.CompilerParams(
            dimension_semantics=("parallel",),
            vmem_limit_bytes=_VMEM_LIMIT),
        cost_estimate=cost,
    )


# --------------------------------------------------------------------------
# Externally-provided dense adjacency path (adj cast per-tile in VMEM).
# --------------------------------------------------------------------------
def _dense_adj_gcn_call(B, N, Cin, Cout, out_dtype, adj_dtype, *, channels_first,
                        matmul_dtype, batch_block):
    Bt, md = batch_block, matmul_dtype
    reassoc = Cin < Cout
    x_block = (Bt, Cin, N) if channels_first else (Bt, N, Cin)
    collapse = (not reassoc) and (not channels_first) and (N % 8 == 0)

    def kernel(a_ref, x_ref, w_ref, b_ref, o_ref):
        w = w_ref[...]
        bias = b_ref[...].astype(jnp.float32)
        support_all = None
        if collapse:
            x_all = x_ref[...].reshape(Bt * N, Cin)
            support_all = lax.dot_general(
                x_all.astype(md), w.astype(md), (((1,), (0,)), ((), ())),
                preferred_element_type=jnp.float32)
        for bi in range(Bt):
            adj = a_ref[bi]                        # cast in VMEM (no wrapper astype)
            if support_all is not None:
                support = support_all[bi * N:(bi + 1) * N, :]
                out = lax.dot_general(adj.astype(md), support.astype(md),
                                      (((1,), (0,)), ((), ())),
                                      preferred_element_type=jnp.float32)
            else:
                out = _gcn_matmuls(adj, x_ref[bi], w, md=md,
                                   channels_first=channels_first, reassoc=reassoc)
            o_ref[bi] = (out + bias).astype(o_ref.dtype)

    x_itemsize = jnp.dtype(out_dtype).itemsize
    a_itemsize = jnp.dtype(adj_dtype).itemsize
    nsq = N * N
    cost = pl.CostEstimate(
        flops=int(B * (2 * nsq * (Cin if reassoc else Cout)
                       + 2 * N * Cin * Cout + 2 * N * Cout)),
        transcendentals=0,
        bytes_accessed=int(B * nsq * a_itemsize + B * N * Cin * x_itemsize
                           + Cin * Cout * 4 + Cout * 4 + B * N * Cout * x_itemsize),
    )
    return pl.pallas_call(
        kernel,
        out_shape=jax.ShapeDtypeStruct((B, N, Cout), out_dtype),
        grid=(B // Bt,),
        in_specs=[pl.BlockSpec((Bt, N, N), lambda b: (b, 0, 0)),
                  pl.BlockSpec(x_block, lambda b: (b, 0, 0)),
                  pl.BlockSpec((Cin, Cout), lambda b: (0, 0)),
                  pl.BlockSpec((1, Cout), lambda b: (0, 0))],
        out_specs=pl.BlockSpec((Bt, N, Cout), lambda b: (b, 0, 0)),
        compiler_params=pltpu.CompilerParams(
            dimension_semantics=("parallel",),
            vmem_limit_bytes=_VMEM_LIMIT),
        cost_estimate=cost,
    )


# --------------------------------------------------------------------------
# Module forward
# --------------------------------------------------------------------------
def dynamic_graph_convolution(x, weight, bias=None, *, k=4, adj=None,
                              channels_first=False,
                              matmul_dtype=jnp.float32, batch_block=None):
    """Forward of DynamicGraphConvolution.

    x:      (B, N, C_in), or (B, C_in, N) if channels_first=True (the
            tutorial's x.permute(0, 2, 1) is fused into the kernel layout).
    weight: (C_in, C_out); bias: (C_out,) or None.
    adj:    optional dense (B, N, N) adjacency. If None, the k-NN graph
            (weights 1/k, self-neighbor included) is built INSIDE the kernel;
            the N x N distance matrix never touches HBM.
    matmul_dtype: MXU operand dtype for the GCN matmuls (f32 accumulation);
            jnp.bfloat16 recommended on v6e/v7x.  Distance ranking stays f32.
    Returns (B, N, C_out) in x.dtype.
    """
    B = x.shape[0]
    if channels_first:
        Cin, N = x.shape[1], x.shape[2]
    else:
        N, Cin = x.shape[1], x.shape[2]
    Cout = weight.shape[1]
    assert weight.shape[0] == Cin
    if batch_block is None:
        batch_block = _pick_batch_block(B, N)
    assert B % batch_block == 0, "batch_block must divide the batch size"

    b2d = (jnp.zeros((1, Cout), jnp.float32) if bias is None
           else bias.reshape(1, Cout).astype(jnp.float32))

    if adj is None:
        call = _fused_knn_gcn_call(B, N, Cin, Cout, k, x.dtype,
                                   channels_first=channels_first,
                                   matmul_dtype=matmul_dtype,
                                   batch_block=batch_block)
        return call(x, weight, b2d)
    call = _dense_adj_gcn_call(B, N, Cin, Cout, x.dtype, adj.dtype,
                               channels_first=channels_first,
                               matmul_dtype=matmul_dtype,
                               batch_block=batch_block)
    return call(adj, x, weight, b2d)


# --------------------------------------------------------------------------
# Demo / correctness check
# --------------------------------------------------------------------------
if __name__ == "__main__":
    B, N, Cin, Cout, K = 2, 128, 16, 32, 4        # module uses num_points=128
    key = jax.random.PRNGKey(0)
    kc, ko, kw, kb, kw2, kb2 = jax.random.split(key, 6)

    # Clustered point cloud: N//K tight groups of K points, so every point's
    # k-NN set is its own group by a huge margin -> the in-kernel f32 ranking
    # provably agrees with the XLA top_k reference (no near-tie ambiguity).
    G = N // K
    centers = 3.0 * jax.random.normal(kc, (B, G, 1, Cin), jnp.float32)
    jitter = 0.05 * jax.random.normal(ko, (B, G, K, Cin), jnp.float32)
    x = (centers + jitter).reshape(B, N, Cin)

    stdv = 1.0 / math.sqrt(Cout)
    W = jax.random.uniform(kw, (Cin, Cout), jnp.float32, -stdv, stdv)
    bias = jax.random.uniform(kb, (Cout,), jnp.float32, -stdv, stdv)

    # ---- pure-JAX reference (f32, HIGHEST precision) ----
    HI = jax.lax.Precision.HIGHEST
    inner = jnp.einsum('bnc,bmc->bnm', x, x, precision=HI)
    xx = jnp.sum(x * x, axis=-1, keepdims=True)
    neg = 2.0 * inner - xx - jnp.swapaxes(xx, 1, 2)
    _, idx = jax.lax.top_k(neg, K)
    adj_ref = jnp.sum(jax.nn.one_hot(idx, N, dtype=jnp.float32), axis=2) / K
    support_ref = jnp.einsum('bnc,co->bno', x, W, precision=HI)
    ref = jnp.einsum('bnm,bmo->bno', adj_ref, support_ref, precision=HI) + bias

    def _close(a, b, tol):   # scale-aware check (covers MXU multi-pass rounding)
        s = float(jnp.max(jnp.abs(b)))
        return float(jnp.max(jnp.abs(a - b))) <= tol * s + 1e-6

    # 1) fused knn + GCN (f32 MXU); Cin < Cout exercises the (adj@x)@W path
    out = jax.block_until_ready(dynamic_graph_convolution(x, W, bias, k=K))
    assert out.shape == (B, N, Cout) and out.dtype == jnp.float32
    assert _close(out, ref, 2e-2)

    # 2) channels-first input: the tutorial's x.permute(0, 2, 1) fused in-kernel
    x_cf = jnp.transpose(x, (0, 2, 1))
    out_cf = jax.block_until_ready(
        dynamic_graph_convolution(x_cf, W, bias, k=K, channels_first=True))
    assert _close(out_cf, ref, 2e-2)

    # 3) externally-provided dense adjacency (cast per-tile in VMEM)
    out_adj = jax.block_until_ready(
        dynamic_graph_convolution(x, W, bias, adj=adj_ref))
    assert _close(out_adj, ref, 2e-2)

    # 4) bf16 MXU operands (f32 accumulation; distance ranking stays f32)
    out_bf = jax.block_until_ready(
        dynamic_graph_convolution(x, W, bias, k=K, matmul_dtype=jnp.bfloat16))
    assert _close(out_bf, ref, 3e-2)

    # 5) Cout < Cin exercises adj@(x@W) with the collapsed (Bt*N,Cin)@(Cin,Cout)
    C2 = 8
    stdv2 = 1.0 / math.sqrt(C2)
    W2 = jax.random.uniform(kw2, (Cin, C2), jnp.float32, -stdv2, stdv2)
    b2 = jax.random.uniform(kb2, (C2,), jnp.float32, -stdv2, stdv2)
    out2 = jax.block_until_ready(dynamic_graph_convolution(x, W2, b2, k=K))
    support2 = jnp.einsum('bnc,co->bno', x, W2, precision=HI)
    ref2 = jnp.einsum('bnm,bmo->bno', adj_ref, support2, precision=HI) + b2
    assert _close(out2, ref2, 2e-2)

    print("KERNEL_OK")
</pallas_src>

<mosaic_0001>
module attributes {stable_mosaic.version = 11 : i64} {
  func.func @kernel(%arg0: i32, %arg1: memref<2x128x16xf32, #tpu.memory_space<vmem>>, %arg2: memref<16x32xf32, #tpu.memory_space<vmem>>, %arg3: memref<1x32xf32, #tpu.memory_space<vmem>>, %arg4: memref<2x128x32xf32, #tpu.memory_space<vmem>>) attributes {dimension_semantics = [#tpu.dimension_semantics<parallel>], iteration_bounds = array<i64: 1>, scalar_prefetch = 0 : i64, scratch_operands = 0 : i64, tpu.core_type = #tpu.core_type<tc>, window_params = [{transform_indices = @transform_0, window_bounds = array<i64: 2, 128, 16>}, {pipeline_mode = #tpu.pipeline_mode<synchronous>, transform_indices = @transform_1, window_bounds = array<i64: 16, 32>}, {pipeline_mode = #tpu.pipeline_mode<synchronous>, transform_indices = @transform_2, window_bounds = array<i64: 1, 32>}, {transform_indices = @transform_3, window_bounds = array<i64: 2, 128, 32>}]} {
    %c0 = arith.constant 0 : index
    %c0_0 = arith.constant 0 : index
    %0 = vector.load %arg2[%c0, %c0_0] : memref<16x32xf32, #tpu.memory_space<vmem>>, vector<16x32xf32>
    %c0_1 = arith.constant 0 : index
    %c0_2 = arith.constant 0 : index
    %1 = vector.load %arg3[%c0_1, %c0_2] : memref<1x32xf32, #tpu.memory_space<vmem>>, vector<1x32xf32>
    %2 = tpu.iota {dimensions = array<i32: 1>} : vector<128x128xi32>
    %3 = arith.sitofp %2 : vector<128x128xi32> to vector<128x128xf32>
    %cst = arith.constant 1.000000e+00 : f32
    %4 = vector.broadcast %cst : f32 to vector<1x16xf32>
    %c0_3 = arith.constant 0 : index
    %c0_4 = arith.constant 0 : index
    %c0_5 = arith.constant 0 : index
    %5 = vector.load %arg1[%c0_3, %c0_4, %c0_5] : memref<2x128x16xf32, #tpu.memory_space<vmem>>, vector<1x128x16xf32>
    %6 = vector.shape_cast %5 : vector<1x128x16xf32> to vector<128x16xf32>
    %7 = arith.mulf %6, %6 : vector<128x16xf32>
    %cst_6 = arith.constant dense<0.000000e+00> : vector<128x128xf32>
    %8 = tpu.matmul %6, %6, %cst_6 {dimension_numbers = #tpu.dot_dimension_numbers<[1], [1], [0], [0], [0, 0, 1, 0], [], []>} : vector<128x16xf32>, vector<128x16xf32>, vector<128x128xf32> -> vector<128x128xf32>
    %cst_7 = arith.constant dense<0.000000e+00> : vector<128xf32>
    %9 = vector.multi_reduction <add>, %7, %cst_7 [1] : vector<128x16xf32> to vector<128xf32>
    %10 = vector.shape_cast %9 : vector<128xf32> to vector<128x1xf32>
    %cst_8 = arith.constant dense<0.000000e+00> : vector<1x128xf32>
    %11 = tpu.matmul %4, %7, %cst_8 {dimension_numbers = #tpu.dot_dimension_numbers<[1], [1], [0], [0], [0, 0, 1, 0], [], []>} : vector<1x16xf32>, vector<128x16xf32>, vector<1x128xf32> -> vector<1x128xf32>
    %cst_9 = arith.constant 2.000000e+00 : f32
    %12 = vector.broadcast %cst_9 : f32 to vector<128x128xf32>
    %13 = arith.mulf %12, %8 : vector<128x128xf32>
    %14 = vector.broadcast %10 : vector<128x1xf32> to vector<128x128xf32>
    %15 = arith.subf %13, %14 : vector<128x128xf32>
    %16 = vector.broadcast %11 : vector<1x128xf32> to vector<128x128xf32>
    %17 = arith.subf %15, %16 : vector<128x128xf32>
    %cst_10 = arith.constant 0.000000e+00 : f32
    %18 = vector.broadcast %cst_10 : f32 to vector<128x128xf32>
    %cst_11 = arith.constant dense<0xFF800000> : vector<128xf32>
    %19 = vector.multi_reduction <maximumf>, %17, %cst_11 [1] : vector<128x128xf32> to vector<128xf32>
    %20 = vector.shape_cast %19 : vector<128xf32> to vector<128x1xf32>
    %21 = vector.broadcast %20 : vector<128x1xf32> to vector<128x128xf32>
    %22 = arith.cmpf oeq, %17, %21 : vector<128x128xf32>
    %cst_12 = arith.constant 1.280000e+02 : f32
    %23 = vector.broadcast %cst_12 : f32 to vector<128x128xf32>
    %24 = arith.select %22, %3, %23 : vector<128x128xi1>, vector<128x128xf32>
    %cst_13 = arith.constant dense<0x7F800000> : vector<128xf32>
    %25 = vector.multi_reduction <minimumf>, %24, %cst_13 [1] : vector<128x128xf32> to vector<128xf32>
    %26 = vector.shape_cast %25 : vector<128xf32> to vector<128x1xf32>
    %27 = vector.broadcast %26 : vector<128x1xf32> to vector<128x128xf32>
    %28 = arith.cmpf oeq, %3, %27 : vector<128x128xf32>
    %29 = arith.extui %28 : vector<128x128xi1> to vector<128x128xi32>
    %30 = arith.sitofp %29 : vector<128x128xi32> to vector<128x128xf32>
    %31 = arith.addf %18, %30 : vector<128x128xf32>
    %cst_14 = arith.constant -3.40282347E+38 : f32
    %32 = vector.broadcast %cst_14 : f32 to vector<128x128xf32>
    %33 = arith.select %28, %32, %17 : vector<128x128xi1>, vector<128x128xf32>
    %cst_15 = arith.constant dense<0xFF800000> : vector<128xf32>
    %34 = vector.multi_reduction <maximumf>, %33, %cst_15 [1] : vector<128x128xf32> to vector<128xf32>
    %35 = vector.shape_cast %34 : vector<128xf32> to vector<128x1xf32>
    %36 = vector.broadcast %35 : vector<128x1xf32> to vector<128x128xf32>
    %37 = arith.cmpf oeq, %33, %36 : vector<128x128xf32>
    %cst_16 = arith.constant 1.280000e+02 : f32
    %38 = vector.broadcast %cst_16 : f32 to vector<128x128xf32>
    %39 = arith.select %37, %3, %38 : vector<128x128xi1>, vector<128x128xf32>
    %cst_17 = arith.constant dense<0x7F800000> : vector<128xf32>
    %40 = vector.multi_reduction <minimumf>, %39, %cst_17 [1] : vector<128x128xf32> to vector<128xf32>
    %41 = vector.shape_cast %40 : vector<128xf32> to vector<128x1xf32>
    %42 = vector.broadcast %41 : vector<128x1xf32> to vector<128x128xf32>
    %43 = arith.cmpf oeq, %3, %42 : vector<128x128xf32>
    %44 = arith.extui %43 : vector<128x128xi1> to vector<128x128xi32>
    %45 = arith.sitofp %44 : vector<128x128xi32> to vector<128x128xf32>
    %46 = arith.addf %31, %45 : vector<128x128xf32>
    %cst_18 = arith.constant -3.40282347E+38 : f32
    %47 = vector.broadcast %cst_18 : f32 to vector<128x128xf32>
    %48 = arith.select %43, %47, %33 : vector<128x128xi1>, vector<128x128xf32>
    %cst_19 = arith.constant dense<0xFF800000> : vector<128xf32>
    %49 = vector.multi_reduction <maximumf>, %48, %cst_19 [1] : vector<128x128xf32> to vector<128xf32>
    %50 = vector.shape_cast %49 : vector<128xf32> to vector<128x1xf32>
    %51 = vector.broadcast %50 : vector<128x1xf32> to vector<128x128xf32>
    %52 = arith.cmpf oeq, %48, %51 : vector<128x128xf32>
    %cst_20 = arith.constant 1.280000e+02 : f32
    %53 = vector.broadcast %cst_20 : f32 to vector<128x128xf32>
    %54 = arith.select %52, %3, %53 : vector<128x128xi1>, vector<128x128xf32>
    %cst_21 = arith.constant dense<0x7F800000> : vector<128xf32>
    %55 = vector.multi_reduction <minimumf>, %54, %cst_21 [1] : vector<128x128xf32> to vector<128xf32>
    %56 = vector.shape_cast %55 : vector<128xf32> to vector<128x1xf32>
    %57 = vector.broadcast %56 : vector<128x1xf32> to vector<128x128xf32>
    %58 = arith.cmpf oeq, %3, %57 : vector<128x128xf32>
    %59 = arith.extui %58 : vector<128x128xi1> to vector<128x128xi32>
    %60 = arith.sitofp %59 : vector<128x128xi32> to vector<128x128xf32>
    %61 = arith.addf %46, %60 : vector<128x128xf32>
    %cst_22 = arith.constant -3.40282347E+38 : f32
    %62 = vector.broadcast %cst_22 : f32 to vector<128x128xf32>
    %63 = arith.select %58, %62, %48 : vector<128x128xi1>, vector<128x128xf32>
    %cst_23 = arith.constant dense<0xFF800000> : vector<128xf32>
    %64 = vector.multi_reduction <maximumf>, %63, %cst_23 [1] : vector<128x128xf32> to vector<128xf32>
    %65 = vector.shape_cast %64 : vector<128xf32> to vector<128x1xf32>
    %66 = vector.broadcast %65 : vector<128x1xf32> to vector<128x128xf32>
    %67 = arith.cmpf oeq, %63, %66 : vector<128x128xf32>
    %cst_24 = arith.constant 1.280000e+02 : f32
    %68 = vector.broadcast %cst_24 : f32 to vector<128x128xf32>
    %69 = arith.select %67, %3, %68 : vector<128x128xi1>, vector<128x128xf32>
    %cst_25 = arith.constant dense<0x7F800000> : vector<128xf32>
    %70 = vector.multi_reduction <minimumf>, %69, %cst_25 [1] : vector<128x128xf32> to vector<128xf32>
    %71 = vector.shape_cast %70 : vector<128xf32> to vector<128x1xf32>
    %72 = vector.broadcast %71 : vector<128x1xf32> to vector<128x128xf32>
    %73 = arith.cmpf oeq, %3, %72 : vector<128x128xf32>
    %74 = arith.extui %73 : vector<128x128xi1> to vector<128x128xi32>
    %75 = arith.sitofp %74 : vector<128x128xi32> to vector<128x128xf32>
    %76 = arith.addf %61, %75 : vector<128x128xf32>
    %cst_26 = arith.constant 2.500000e-01 : f32
    %77 = vector.broadcast %cst_26 : f32 to vector<128x128xf32>
    %78 = arith.mulf %76, %77 : vector<128x128xf32>
    %cst_27 = arith.constant dense<0.000000e+00> : vector<128x16xf32>
    %79 = tpu.matmul %78, %6, %cst_27 {dimension_numbers = #tpu.dot_dimension_numbers<[1], [0], [0], [1], [0, 0, 1, 1], [], []>} : vector<128x128xf32>, vector<128x16xf32>, vector<128x16xf32> -> vector<128x16xf32>
    %cst_28 = arith.constant dense<0.000000e+00> : vector<128x32xf32>
    %80 = tpu.matmul %79, %0, %cst_28 {dimension_numbers = #tpu.dot_dimension_numbers<[1], [0], [0], [1], [0, 0, 1, 1], [], []>} : vector<128x16xf32>, vector<16x32xf32>, vector<128x32xf32> -> vector<128x32xf32>
    %81 = vector.broadcast %1 : vector<1x32xf32> to vector<128x32xf32>
    %82 = arith.addf %80, %81 : vector<128x32xf32>
    %c0_29 = arith.constant 0 : index
    %c0_30 = arith.constant 0 : index
    %c0_31 = arith.constant 0 : index
    %83 = vector.load %arg4[%c0_29, %c0_30, %c0_31] : memref<2x128x32xf32, #tpu.memory_space<vmem>>, vector<1x128x32xf32>
    %84 = vector.shape_cast %83 : vector<1x128x32xf32> to vector<128x32xf32>
    %85 = vector.shape_cast %82 : vector<128x32xf32> to vector<1x128x32xf32>
    tpu.vector_store %arg4[%c0_29, %c0_30, %c0_31], %85 {strides = array<i32>} : memref<2x128x32xf32, #tpu.memory_space<vmem>>, vector<1x128x32xf32>,
    %c1 = arith.constant 1 : index
    %c0_32 = arith.constant 0 : index
    %c0_33 = arith.constant 0 : index
    %86 = vector.load %arg1[%c1, %c0_32, %c0_33] : memref<2x128x16xf32, #tpu.memory_space<vmem>>, vector<1x128x16xf32>
    %87 = vector.shape_cast %86 : vector<1x128x16xf32> to vector<128x16xf32>
    %88 = arith.mulf %87, %87 : vector<128x16xf32>
    %cst_34 = arith.constant dense<0.000000e+00> : vector<128x128xf32>
    %89 = tpu.matmul %87, %87, %cst_34 {dimension_numbers = #tpu.dot_dimension_numbers<[1], [1], [0], [0], [0, 0, 1, 0], [], []>} : vector<128x16xf32>, vector<128x16xf32>, vector<128x128xf32> -> vector<128x128xf32>
    %cst_35 = arith.constant dense<0.000000e+00> : vector<128xf32>
    %90 = vector.multi_reduction <add>, %88, %cst_35 [1] : vector<128x16xf32> to vector<128xf32>
    %91 = vector.shape_cast %90 : vector<128xf32> to vector<128x1xf32>
    %cst_36 = arith.constant dense<0.000000e+00> : vector<1x128xf32>
    %92 = tpu.matmul %4, %88, %cst_36 {dimension_numbers = #tpu.dot_dimension_numbers<[1], [1], [0], [0], [0, 0, 1, 0], [], []>} : vector<1x16xf32>, vector<128x16xf32>, vector<1x128xf32> -> vector<1x128xf32>
    %cst_37 = arith.constant 2.000000e+00 : f32
    %93 = vector.broadcast %cst_37 : f32 to vector<128x128xf32>
    %94 = arith.mulf %93, %89 : vector<128x128xf32>
    %95 = vector.broadcast %91 : vector<128x1xf32> to vector<128x128xf32>
    %96 = arith.subf %94, %95 : vector<128x128xf32>
    %97 = vector.broadcast %92 : vector<1x128xf32> to vector<128x128xf32>
    %98 = arith.subf %96, %97 : vector<128x128xf32>
    %cst_38 = arith.constant 0.000000e+00 : f32
    %99 = vector.broadcast %cst_38 : f32 to vector<128x128xf32>
    %cst_39 = arith.constant dense<0xFF800000> : vector<128xf32>
    %100 = vector.multi_reduction <maximumf>, %98, %cst_39 [1] : vector<128x128xf32> to vector<128xf32>
    %101 = vector.shape_cast %100 : vector<128xf32> to vector<128x1xf32>
    %102 = vector.broadcast %101 : vector<128x1xf32> to vector<128x128xf32>
    %103 = arith.cmpf oeq, %98, %102 : vector<128x128xf32>
    %cst_40 = arith.constant 1.280000e+02 : f32
    %104 = vector.broadcast %cst_40 : f32 to vector<128x128xf32>
    %105 = arith.select %103, %3, %104 : vector<128x128xi1>, vector<128x128xf32>
    %cst_41 = arith.constant dense<0x7F800000> : vector<128xf32>
    %106 = vector.multi_reduction <minimumf>, %105, %cst_41 [1] : vector<128x128xf32> to vector<128xf32>
    %107 = vector.shape_cast %106 : vector<128xf32> to vector<128x1xf32>
    %108 = vector.broadcast %107 : vector<128x1xf32> to vector<128x128xf32>
    %109 = arith.cmpf oeq, %3, %108 : vector<128x128xf32>
    %110 = arith.extui %109 : vector<128x128xi1> to vector<128x128xi32>
    %111 = arith.sitofp %110 : vector<128x128xi32> to vector<128x128xf32>
    %112 = arith.addf %99, %111 : vector<128x128xf32>
    %cst_42 = arith.constant -3.40282347E+38 : f32
    %113 = vector.broadcast %cst_42 : f32 to vector<128x128xf32>
    %114 = arith.select %109, %113, %98 : vector<128x128xi1>, vector<128x128xf32>
    %cst_43 = arith.constant dense<0xFF800000> : vector<128xf32>
    %115 = vector.multi_reduction <maximumf>, %114, %cst_43 [1] : vector<128x128xf32> to vector<128xf32>
    %116 = vector.shape_cast %115 : vector<128xf32> to vector<128x1xf32>
    %117 = vector.broadcast %116 : vector<128x1xf32> to vector<128x128xf32>
    %118 = arith.cmpf oeq, %114, %117 : vector<128x128xf32>
    %cst_44 = arith.constant 1.280000e+02 : f32
    %119 = vector.broadcast %cst_44 : f32 to vector<128x128xf32>
    %120 = arith.select %118, %3, %119 : vector<128x128xi1>, vector<128x128xf32>
    %cst_45 = arith.constant dense<0x7F800000> : vector<128xf32>
    %121 = vector.multi_reduction <minimumf>, %120, %cst_45 [1] : vector<128x128xf32> to vector<128xf32>
    %122 = vector.shape_cast %121 : vector<128xf32> to vector<128x1xf32>
    %123 = vector.broadcast %122 : vector<128x1xf32> to vector<128x128xf32>
    %124 = arith.cmpf oeq, %3, %123 : vector<128x128xf32>
    %125 = arith.extui %124 : vector<128x128xi1> to vector<128x128xi32>
    %126 = arith.sitofp %125 : vector<128x128xi32> to vector<128x128xf32>
    %127 = arith.addf %112, %126 : vector<128x128xf32>
    %cst_46 = arith.constant -3.40282347E+38 : f32
    %128 = vector.broadcast %cst_46 : f32 to vector<128x128xf32>
    %129 = arith.select %124, %128, %114 : vector<128x128xi1>, vector<128x128xf32>
    %cst_47 = arith.constant dense<0xFF800000> : vector<128xf32>
    %130 = vector.multi_reduction <maximumf>, %129, %cst_47 [1] : vector<128x128xf32> to vector<128xf32>
    %131 = vector.shape_cast %130 : vector<128xf32> to vector<128x1xf32>
    %132 = vector.broadcast %131 : vector<128x1xf32> to vector<128x128xf32>
    %133 = arith.cmpf oeq, %129, %132 : vector<128x128xf32>
    %cst_48 = arith.constant 1.280000e+02 : f32
    %134 = vector.broadcast %cst_48 : f32 to vector<128x128xf32>
    %135 = arith.select %133, %3, %134 : vector<128x128xi1>, vector<128x128xf32>
    %cst_49 = arith.constant dense<0x7F800000> : vector<128xf32>
    %136 = vector.multi_reduction <minimumf>, %135, %cst_49 [1] : vector<128x128xf32> to vector<128xf32>
    %137 = vector.shape_cast %136 : vector<128xf32> to vector<128x1xf32>
    %138 = vector.broadcast %137 : vector<128x1xf32> to vector<128x128xf32>
    %139 = arith.cmpf oeq, %3, %138 : vector<128x128xf32>
    %140 = arith.extui %139 : vector<128x128xi1> to vector<128x128xi32>
    %141 = arith.sitofp %140 : vector<128x128xi32> to vector<128x128xf32>
    %142 = arith.addf %127, %141 : vector<128x128xf32>
    %cst_50 = arith.constant -3.40282347E+38 : f32
    %143 = vector.broadcast %cst_50 : f32 to vector<128x128xf32>
    %144 = arith.select %139, %143, %129 : vector<128x128xi1>, vector<128x128xf32>
    %cst_51 = arith.constant dense<0xFF800000> : vector<128xf32>
    %145 = vector.multi_reduction <maximumf>, %144, %cst_51 [1] : vector<128x128xf32> to vector<128xf32>
    %146 = vector.shape_cast %145 : vector<128xf32> to vector<128x1xf32>
    %147 = vector.broadcast %146 : vector<128x1xf32> to vector<128x128xf32>
    %148 = arith.cmpf oeq, %144, %147 : vector<128x128xf32>
    %cst_52 = arith.constant 1.280000e+02 : f32
    %149 = vector.broadcast %cst_52 : f32 to vector<128x128xf32>
    %150 = arith.select %148, %3, %149 : vector<128x128xi1>, vector<128x128xf32>
    %cst_53 = arith.constant dense<0x7F800000> : vector<128xf32>
    %151 = vector.multi_reduction <minimumf>, %150, %cst_53 [1] : vector<128x128xf32> to vector<128xf32>
    %152 = vector.shape_cast %151 : vector<128xf32> to vector<128x1xf32>
    %153 = vector.broadcast %152 : vector<128x1xf32> to vector<128x128xf32>
    %154 = arith.cmpf oeq, %3, %153 : vector<128x128xf32>
    %155 = arith.extui %154 : vector<128x128xi1> to vector<128x128xi32>
    %156 = arith.sitofp %155 : vector<128x128xi32> to vector<128x128xf32>
    %157 = arith.addf %142, %156 : vector<128x128xf32>
    %cst_54 = arith.constant 2.500000e-01 : f32
    %158 = vector.broadcast %cst_54 : f32 to vector<128x128xf32>
    %159 = arith.mulf %157, %158 : vector<128x128xf32>
    %cst_55 = arith.constant dense<0.000000e+00> : vector<128x16xf32>
    %160 = tpu.matmul %159, %87, %cst_55 {dimension_numbers = #tpu.dot_dimension_numbers<[1], [0], [0], [1], [0, 0, 1, 1], [], []>} : vector<128x128xf32>, vector<128x16xf32>, vector<128x16xf32> -> vector<128x16xf32>
    %cst_56 = arith.constant dense<0.000000e+00> : vector<128x32xf32>
    %161 = tpu.matmul %160, %0, %cst_56 {dimension_numbers = #tpu.dot_dimension_numbers<[1], [0], [0], [1], [0, 0, 1, 1], [], []>} : vector<128x16xf32>, vector<16x32xf32>, vector<128x32xf32> -> vector<128x32xf32>
    %162 = vector.broadcast %1 : vector<1x32xf32> to vector<128x32xf32>
    %163 = arith.addf %161, %162 : vector<128x32xf32>
    %c1_57 = arith.constant 1 : index
    %c0_58 = arith.constant 0 : index
    %c0_59 = arith.constant 0 : index
    %164 = vector.load %arg4[%c1_57, %c0_58, %c0_59] : memref<2x128x32xf32, #tpu.memory_space<vmem>>, vector<1x128x32xf32>
    %165 = vector.shape_cast %164 : vector<1x128x32xf32> to vector<128x32xf32>
    %166 = vector.shape_cast %163 : vector<128x32xf32> to vector<1x128x32xf32>
    tpu.vector_store %arg4[%c1_57, %c0_58, %c0_59], %166 {strides = array<i32>} : memref<2x128x32xf32, #tpu.memory_space<vmem>>, vector<1x128x32xf32>,
    return
  }
  func.func @transform_0(%arg0: i32) -> (i32, i32, i32) {
    %c0_i32 = arith.constant 0 : i32
    %c0_i32_0 = arith.constant 0 : i32
    %c0_i32_1 = arith.constant 0 : i32
    return %arg0, %c0_i32, %c0_i32_0 : i32, i32, i32
  }
  func.func @transform_1(%arg0: i32) -> (i32, i32) {
    %c0_i32 = arith.constant 0 : i32
    %c0_i32_0 = arith.constant 0 : i32
    %c0_i32_1 = arith.constant 0 : i32
    return %c0_i32, %c0_i32_0 : i32, i32
  }
  func.func @transform_2(%arg0: i32) -> (i32, i32) {
    %c0_i32 = arith.constant 0 : i32
    %c0_i32_0 = arith.constant 0 : i32
    %c0_i32_1 = arith.constant 0 : i32
    return %c0_i32, %c0_i32_0 : i32, i32
  }
  func.func @transform_3(%arg0: i32) -> (i32, i32, i32) {
    %c0_i32 = arith.constant 0 : i32
    %c0_i32_0 = arith.constant 0 : i32
    %c0_i32_1 = arith.constant 0 : i32
    return %arg0, %c0_i32, %c0_i32_0 : i32, i32, i32
  }
}

</mosaic_0001>

<bundles_post_ra>
// kernel: tpu_custom_call.1
= control target key start
LH: loop header
LB: loop body
LE: loop exit
PB: predicated region body
PF: predicated region fallthrough
CT: control target
= control target key end

     0   :  { %8 = vsyncpa [#allocation3], 0  ;;  %s6332_s0 = inlined_call_operand.hbm [shape: f32[2,128,16], index: 0, kind: input, shape index: {}]   ;;  %s6333_s1 = inlined_call_operand.hbm [shape: f32[16,32], index: 1, kind: input, shape index: {}]   ;;  %s6334_s2 = inlined_call_operand.hbm [shape: f32[1,32], index: 2, kind: input, shape index: {}]   ;;  %s6335_s3 = inlined_call_operand.hbm [shape: f32[2,128,32], index: 3, kind: output, shape index: {}]  }
   0x1   :  { %9 = vsyncpa [#allocation6], 0 }
   0x2   :  { %10 = vsyncpa [#allocation4], 0  ;;  %s4237_s12 = smov [#allocation5]   ;;  %s4238_s14 = smov [#allocation2]  }
   0x3   :  { %s28_s13 = sshll.u32 %s4237_s12, 4  ;;  %s16_s15 = sshll.u32 %s4238_s14, 4  ;;  %s29_s13 = int_to_ptr.vmem [resolvable:$true] %s28_s13  ;;  %s4267_s15 = int_to_ptr.vmem [resolvable:$true] %s16_s15 }
   0x4   :  { %s4143_s18 = scalar_lea.hbm %s6333_s1, 256 }
   0x5   :  { %p4144_p0 = scmp.ne.s32.totalorder %s6333_s1, %s4143_s18  ;;  %p4147_p1 = scmp.lt.u32.totalorder %s4143_s18, %s6333_s1 }
   0x7   :  { %p4149_p2 = pnand %p4147_p1, %p4144_p0 }
   0x9   :  { %4152 = shalt.err (!%p4149_p2)
}
   0xa   :  { %s4153_s23 = scalar_lea.vmem %s29_s13, 256  ;;  %p4158_p4 = scmp.lt.s32.totalorder %s29_s13, %s29_s13 }
   0xb   :  { %p4154_p3 = scmp.ne.s32.totalorder %s29_s13, %s4153_s23  ;;  %p4159_p5 = scmp.lt.s32.totalorder %s4153_s23, %s4153_s23 }
   0xd   :  { %p4160_p6 = por %p4159_p5, %p4158_p4 }
   0xf   :  { %p4161_p7 = pnand %p4160_p6, %p4154_p3 }
  0x11   :  { %4164 = shalt.err (!%p4161_p7)
}
  0x12   :  { %s4239_s24 = smov 128   ;;  %s4240_s25 = smov 8  }
  0x13   :  { %34 = dma.hbm_to_vmem [thread:$0]  %s6333_s1, 256, %s29_s13, [#allocation6], %s4239_s24, %s4239_s24, %s4240_s25  }
  0x14   :  { %s4165_s30 = scalar_lea.hbm %s6332_s0, 4096 }
  0x15   :  { %p4166_p8 = scmp.ne.s32.totalorder %s6332_s0, %s4165_s30  ;;  %p4169_p9 = scmp.lt.u32.totalorder %s4165_s30, %s6332_s0 }
  0x17   :  { %p4171_p10 = pnand %p4169_p9, %p4166_p8 }
  0x19   :  { %4174 = shalt.err (!%p4171_p10)
}
  0x1a   :  { %s4175_s8 = scalar_lea.vmem %s4267_s15, 4096  ;;  %p4180_p12 = scmp.lt.s32.totalorder %s4267_s15, %s4267_s15 }
  0x1b   :  { %p4176_p11 = scmp.ne.s32.totalorder %s4267_s15, %s4175_s8  ;;  %p4181_p13 = scmp.lt.s32.totalorder %s4175_s8, %s4175_s8 }
  0x1d   :  { %p4182_p0 = por %p4181_p13, %p4180_p12 }
  0x1f   :  { %p4183_p1 = pnand %p4182_p0, %p4176_p11 }
  0x21   :  { %4186 = shalt.err (!%p4183_p1)
}
  0x22   :  { %22 = dma.hbm_to_vmem [thread:$0]  %s6332_s0, 4096, %s4267_s15, [#allocation3], %s4239_s24, %s4239_s24, %s4240_s25  }
  0x23   :  { %s4241_s10 = smov [#allocation7]   ;;  %s4187_s14 = scalar_lea.hbm %s6334_s2, 16 }
  0x24   :  { %s41_s11 = sshll.u32 %s4241_s10, 4  ;;  %p4188_p2 = scmp.ne.s32.totalorder %s6334_s2, %s4187_s14  ;;  %s42_s11 = int_to_ptr.vmem [resolvable:$true] %s41_s11 }
  0x25   :  { %p4191_p3 = scmp.lt.u32.totalorder %s4187_s14, %s6334_s2 }
  0x27   :  { %p4193_p4 = pnand %p4191_p3, %p4188_p2 }
  0x29   :  { %4196 = shalt.err (!%p4193_p4)
}
  0x2a   :  { %s4197_s20 = scalar_lea.vmem %s42_s11, 16  ;;  %s4201_s0 = scalar_lea.vmem %s42_s11, 32 }
  0x2b   :  { %p4198_p5 = scmp.ne.s32.totalorder %s42_s11, %s4197_s20  ;;  %p4202_p6 = scmp.lt.s32.totalorder %s42_s11, %s42_s11 }
  0x2c   :  { %p4203_p7 = scmp.lt.s32.totalorder %s4201_s0, %s4197_s20 }
  0x2e   :  { %p4204_p8 = por %p4203_p7, %p4202_p6 }
  0x30   :  { %p4205_p9 = pnand %p4204_p8, %p4198_p5 }
  0x32   :  { %4208 = shalt.err (!%p4205_p9)
}
  0x33   :  { %44 = dma.hbm_to_vmem [thread:$0]  %s6334_s2, 16, %s42_s11, [#allocation6]  }
  0x34   :  { %4231 = dma.done.wait [#allocation3], 4096  }
  0x35   :  { %4232 = vsyncadd [#allocation3], 4294963200 }
  0x36   :  { %4233 = dma.done.wait [#allocation6], 272  }
  0x37   :  { %4234 = vsyncadd [#allocation6], 4294967024  ;;  %v4242_v0 = vmov 0.0|0.0   ;;  %vm6337_vm0 = vmmov 0   ;;  %v4244_v1 = vmov 0.0   ;;  %vm6336_vm1 = vcmask 130048  }
  0x38   :  { %3948 = vmatprep.subr.bf16.mxu1 %v4242_v0  ;;  %3638 = vmatprep.mubr.msk.f32.mxu1 %vm6337_vm0, %v4244_v1  ;;  %vm4321_vm2 = vmpackc.low %vm6336_vm1, %vm6336_vm1  ;;  %v60_v3 = vld [vmem:[#allocation2] sm:$0xff]  ;;  %v4325_v4 = vld [vmem:[#allocation2 + $0x8] sm:$0xff]  ;;  %s4246_s2 = smov [#allocation8]  }
  0x39   :  { %v4327_v5 = vld [vmem:[#allocation2 + $0x10] sm:$0xff]  ;;  %v4330_v6 = vpack.c.bf16 %v4325_v4, %v60_v3  ;;  %v76_v7 = vmul.f32 %v60_v3, %v60_v3  ;;  %v77_v8 = vmul.f32 %v4325_v4, %v4325_v4  ;;  %v4334_v9 = vld [vmem:[#allocation2 + $0x18] sm:$0xff]  ;;  %3582 = vmatprep.mubr.msk.f32.mxu0 %vm6336_vm1, %v60_v3  ;;  %v4358_v15 = vld [vmem:[#allocation2 + $0x20] sm:$0xff]  ;;  %s3080_s22 = sshll.u32 %s4246_s2, 4  ;;  %s3081_s22 = int_to_ptr.vmem [resolvable:$true] %s3080_s22 }
  0x3a   :  { %v4339_v10 = vpack.c.bf16 %v4334_v9, %v4327_v5  ;;  %v78_v12 = vmul.f32 %v4327_v5, %v4327_v5  ;;  %v79_v13 = vmul.f32 %v4334_v9, %v4334_v9  ;;  %v4360_v16 = vld [vmem:[#allocation2 + $0x28] sm:$0xff]  ;;  %v80_v21 = vmul.f32 %v4358_v15, %v4358_v15  ;;  %v4370_v22 = vld [vmem:[#allocation2 + $0x30] sm:$0xff]  ;;  %v4385_v26 = vld [vmem:[#allocation2 + $0x38] sm:$0xff]  ;;  %s4209_s23 = scalar_lea.vmem %s3081_s22, 4096  ;;  %p4214_p11 = scmp.lt.s32.totalorder %s3081_s22, %s3081_s22 }
  0x3b   :  { %3902 = vmatprep.subr.msk.bf16.mxu0 %vm4321_vm2, %v4330_v6  ;;  %v3949_v11 = vpack.c.bf16 %v77_v8, %v76_v7  ;;  %v286_v14 = vsel %vm6336_vm1, %v76_v7, 0.0  ;;  %v4365_v19 = vpack.c.bf16 %v4360_v16, %v4358_v15  ;;  %v289_v20 = vsel %vm6336_vm1, %v77_v8, 0.0  ;;  %v4389_v28 = vld [vmem:[#allocation2 + $0x40] sm:$0xff]  ;;  %v4399_v34 = vld [vmem:[#allocation2 + $0x48] sm:$0xff]  ;;  %v4403_v36 = vld [vmem:[#allocation2 + $0x50] sm:$0xff]  ;;  %p4210_p10 = scmp.ne.s32.totalorder %s3081_s22, %s4209_s23  ;;  %p4215_p12 = scmp.lt.s32.totalorder %s4209_s23, %s4209_s23 }
  0x3c   :  { %3905 = vmatpush3.bf16.xpose.msk.msra.mxu0 %vm4321_vm2, %v4330_v6  ;;  %287 = vadd.xlane.f32.xlu0 %v286_v14  ;;  %v292_v17 = vsel %vm6336_vm1, %v78_v12, 0.0  ;;  %v3953_v18 = vpack.c.bf16 %v79_v13, %v78_v12  ;;  %v295_v23 = vsel %vm6336_vm1, %v79_v13, 0.0  ;;  %v298_v24 = vsel %vm6336_vm1, %v80_v21, 0.0  ;;  %v4418_v40 = vld [vmem:[#allocation2 + $0x58] sm:$0xff]  ;;  %v4422_v42 = vld [vmem:[#allocation2 + $0x60] sm:$0xff]  ;;  %v4432_v48 = vld [vmem:[#allocation2 + $0x68] sm:$0xff] }
  0x3d   :  { %3951 = vmatpush3.bf16.xpose.msk.msra.mxu1 %vm4321_vm2, %v3949_v11  ;;  %3908 = vmatprep.subr.msk.bf16.mxu0 %vm4321_vm2, %v4339_v10  ;;  %v81_v25 = vmul.f32 %v4360_v16, %v4360_v16  ;;  %v82_v27 = vmul.f32 %v4370_v22, %v4370_v22  ;;  %v4395_v32 = vpack.c.bf16 %v4385_v26, %v4370_v22  ;;  %v4436_v50 = vld [vmem:[#allocation2 + $0x70] sm:$0xff]  ;;  %v4451_v54 = vld [vmem:[#allocation2 + $0x78] sm:$0xff]  ;;  %v4245_v11 = vmov 1.0   ;;  %p4216_p13 = por %p4215_p12, %p4214_p11 }
  0x3e   :  { %3952 = vmatprep.subr.bf16.mxu1 %v4242_v0  ;;  %293 = vadd.xlane.f32.xlu1 %v292_v17  ;;  %v83_v33 = vmul.f32 %v4385_v26, %v4385_v26  ;;  %v84_v35 = vmul.f32 %v4389_v28, %v4389_v28  ;;  %v85_v39 = vmul.f32 %v4399_v34, %v4399_v34 }
  0x3f   :  { %v301_v29 = vsel %vm6336_vm1, %v81_v25, 0.0  ;;  %v304_v30 = vsel %vm6336_vm1, %v82_v27, 0.0  ;;  %v3957_v31 = vpack.c.bf16 %v81_v25, %v80_v21  ;;  %v86_v41 = vmul.f32 %v4403_v36, %v4403_v36  ;;  %p4217_p0 = pnand %p4216_p13, %p4210_p10 }
  0x40   :  { %290 = vadd.xlane.f32.xlu0 %v289_v20  ;;  %v307_v37 = vsel %vm6336_vm1, %v83_v33, 0.0  ;;  %v310_v38 = vsel %vm6336_vm1, %v84_v35, 0.0  ;;  %v313_v43 = vsel %vm6336_vm1, %v85_v39, 0.0  ;;  %v3961_v45 = vpack.c.bf16 %v83_v33, %v82_v27 }
  0x41   :  { %v316_v44 = vsel %vm6336_vm1, %v86_v41, 0.0  ;;  %v4428_v46 = vpack.c.bf16 %v4399_v34, %v4389_v28  ;;  %v87_v47 = vmul.f32 %v4418_v40, %v4418_v40  ;;  %v88_v49 = vmul.f32 %v4422_v42, %v4422_v42 }
  0x42   :  { %296 = vadd.xlane.f32.xlu1 %v295_v23  ;;  %v89_v53 = vmul.f32 %v4432_v48, %v4432_v48  ;;  %v90_v55 = vmul.f32 %v4436_v50, %v4436_v50  ;;  %v3965_v58 = vpack.c.bf16 %v85_v39, %v84_v35  ;;  %v3930_v59 = vpack.c.bf16 %v4418_v40, %v4403_v36 }
  0x43   :  { %v319_v51 = vsel %vm6336_vm1, %v87_v47, 0.0  ;;  %v322_v52 = vsel %vm6336_vm1, %v88_v49, 0.0  ;;  %v91_v60 = vmul.f32 %v4451_v54, %v4451_v54  ;;  %v3969_v62 = vpack.c.bf16 %v87_v47, %v86_v41 }
  0x44   :  { %3911 = vmatpush3.bf16.xpose.msk.msra.mxu0 %vm4321_vm2, %v4339_v10  ;;  %299 = vadd.xlane.f32.xlu0 %v298_v24  ;;  %v325_v56 = vsel %vm6336_vm1, %v89_v53, 0.0  ;;  %v328_v57 = vsel %vm6336_vm1, %v90_v55, 0.0  ;;  %v3936_v63 = vpack.c.bf16 %v4432_v48, %v4422_v42  ;;  %v3973_v3 = vpack.c.bf16 %v89_v53, %v88_v49 }
  0x45   :  { %3955 = vmatpush3.bf16.xpose.msk.msra.mxu1 %vm4321_vm2, %v3953_v18  ;;  %3914 = vmatprep.subr.msk.bf16.mxu0 %vm4321_vm2, %v4365_v19  ;;  %v331_v61 = vsel %vm6336_vm1, %v91_v60, 0.0  ;;  %v3942_v7 = vpack.c.bf16 %v4451_v54, %v4436_v50  ;;  %v3977_v8 = vpack.c.bf16 %v91_v60, %v90_v55 }
  0x46   :  { %3956 = vmatprep.subr.bf16.mxu1 %v4242_v0  ;;  %302 = vadd.xlane.f32.xlu1 %v301_v29 }
  0x48   :  { %305 = vadd.xlane.f32.xlu0 %v304_v30 }
  0x4a   :  { %308 = vadd.xlane.f32.xlu1 %v307_v37 }
  0x4c   :  { %3917 = vmatpush3.bf16.xpose.msk.msra.mxu0 %vm4321_vm2, %v4365_v19  ;;  %311 = vadd.xlane.f32.xlu0 %v310_v38 }
  0x4d   :  { %3959 = vmatpush3.bf16.xpose.msk.msra.mxu1 %vm4321_vm2, %v3957_v31  ;;  %3920 = vmatprep.subr.msk.bf16.mxu0 %vm4321_vm2, %v4395_v32 }
  0x4e   :  { %3960 = vmatprep.subr.bf16.mxu1 %v4242_v0  ;;  %314 = vadd.xlane.f32.xlu1 %v313_v43 }
  0x50   :  { %317 = vadd.xlane.f32.xlu0 %v316_v44 }
  0x52   :  { %320 = vadd.xlane.f32.xlu1 %v319_v51 }
  0x54   :  { %3923 = vmatpush3.bf16.xpose.msk.msra.mxu0 %vm4321_vm2, %v4395_v32  ;;  %323 = vadd.xlane.f32.xlu0 %v322_v52 }
  0x55   :  { %3963 = vmatpush3.bf16.xpose.msk.msra.mxu1 %vm4321_vm2, %v3961_v45  ;;  %3926 = vmatprep.subr.msk.bf16.mxu0 %vm4321_vm2, %v4428_v46 }
  0x56   :  { %3964 = vmatprep.subr.bf16.mxu1 %v4242_v0  ;;  %326 = vadd.xlane.f32.xlu1 %v325_v56 }
  0x58   :  { %329 = vadd.xlane.f32.xlu0 %v328_v57 }
  0x5a   :  { %332 = vadd.xlane.f32.xlu1 %v331_v61 }
  0x5c   :  { %3929 = vmatpush3.bf16.xpose.msk.msra.mxu0 %vm4321_vm2, %v4428_v46 }
  0x5d   :  { %3967 = vmatpush3.bf16.xpose.msk.msra.mxu1 %vm4321_vm2, %v3965_v58  ;;  %3932 = vmatprep.subr.msk.bf16.mxu0 %vm4321_vm2, %v3930_v59 }
  0x5e   :  { %3968 = vmatprep.subr.bf16.mxu1 %v4242_v0 }
  0x64   :  { %3935 = vmatpush3.bf16.xpose.msk.msra.mxu0 %vm4321_vm2, %v3930_v59 }
  0x65   :  { %3971 = vmatpush3.bf16.xpose.msk.msra.mxu1 %vm4321_vm2, %v3969_v62  ;;  %3938 = vmatprep.subr.msk.bf16.mxu0 %vm4321_vm2, %v3936_v63 }
  0x66   :  { %3972 = vmatprep.subr.bf16.mxu1 %v4242_v0 }
  0x6c   :  { %3941 = vmatpush3.bf16.xpose.msk.msra.mxu0 %vm4321_vm2, %v3936_v63 }
  0x6d   :  { %3975 = vmatpush3.bf16.xpose.msk.msra.mxu1 %vm4321_vm2, %v3973_v3  ;;  %3944 = vmatprep.subr.msk.bf16.mxu0 %vm4321_vm2, %v3942_v7 }
  0x6e   :  { %3976 = vmatprep.subr.bf16.mxu1 %v4242_v0 }
  0x74   :  { %3947 = vmatpush3.bf16.xpose.msk.msra.mxu0 %vm4321_vm2, %v3942_v7 }
  0x75   :  { %3979 = vmatpush3.bf16.xpose.msk.msra.mxu1 %vm4321_vm2, %v3977_v8  ;;  %3981 = vmatprep.subr.bf16.mxu0 %v4330_v6 }
  0x7b   :  { %3583 = vmatmul.mubr.msk.f32.vlgmr.msra.gmra.mrb[0].mxu0 %vm6336_vm1, %v4325_v4 }
  0x7c   :  { %3639 = vmatmul.mubr.msk.f32.vlgmr.msra.gmra.mrb[0].mxu1 %vm6336_vm1, %v4245_v11  ;;  %3585 = vmatprep.mubr.msk.f32.mxu0 %vm6336_vm1, %v4327_v5 }
  0x7d   :  { %3983 = vmatpush3.bf16.msra.mxu0 %v4330_v6  ;;  %v57_v6 = vlaneseq }
  0x7e   :  { %3985 = vmatprep.subr.bf16.mxu0 %v4339_v10 }
  0x7f   :  { %3586 = vmatmul.mubr.msk.f32.gmra.mrb[2].mxu0 %vm6336_vm1, %v4334_v9 }
  0x80   :  { %3588 = vmatprep.mubr.msk.f32.mxu0 %vm6336_vm1, %v4358_v15 }
  0x81   :  { %3987 = vmatpush3.bf16.msra.mxu0 %v4339_v10  ;;  %v4536_v10 = vshrl.u32 %v57_v6, 7 }
  0x82   :  { %3989 = vmatprep.subr.bf16.mxu0 %v4365_v19 }
  0x83   :  { %3589 = vmatmul.mubr.msk.f32.gmra.mrb[4].mxu0 %vm6336_vm1, %v4360_v16  ;;  %v489_v13 = vsub.s32 0, %v4536_v10 }
  0x84   :  { %3591 = vmatprep.mubr.msk.f32.mxu0 %vm6336_vm1, %v4370_v22 }
  0x85   :  { %3991 = vmatpush3.bf16.msra.mxu0 %v4365_v19 }
  0x86   :  { %3993 = vmatprep.subr.bf16.mxu0 %v4395_v32 }
  0x87   :  { %3592 = vmatmul.mubr.msk.f32.gmra.mrb[6].mxu0 %vm6336_vm1, %v4385_v26 }
  0x88   :  { %3594 = vmatprep.mubr.msk.f32.mxu0 %vm6336_vm1, %v4389_v28 }
  0x89   :  { %3995 = vmatpush3.bf16.msra.mxu0 %v4395_v32 }
  0x8a   :  { %3997 = vmatprep.subr.bf16.mxu0 %v4428_v46 }
  0x8b   :  { %3595 = vmatmul.mubr.msk.f32.gmra.mrb[8].mxu0 %vm6336_vm1, %v4399_v34 }
  0x8c   :  { %3597 = vmatprep.mubr.msk.f32.mxu0 %vm6336_vm1, %v4403_v36 }
  0x8d   :  { %3999 = vmatpush3.bf16.msra.mxu0 %v4428_v46 }
  0x8e   :  { %4001 = vmatprep.subr.bf16.mxu0 %v3930_v59 }
  0x8f   :  { %3598 = vmatmul.mubr.msk.f32.gmra.mrb[10].mxu0 %vm6336_vm1, %v4418_v40 }
  0x90   :  { %3600 = vmatprep.mubr.msk.f32.mxu0 %vm6336_vm1, %v4422_v42 }
  0x91   :  { %4003 = vmatpush3.bf16.msra.mxu0 %v3930_v59 }
  0x92   :  { %4005 = vmatprep.subr.bf16.mxu0 %v3936_v63 }
  0x93   :  { %3601 = vmatmul.mubr.msk.f32.gmra.mrb[12].mxu0 %vm6336_vm1, %v4432_v48 }
  0x94   :  { %3603 = vmatprep.mubr.msk.f32.mxu0 %vm6336_vm1, %v4436_v50 }
  0x95   :  { %4007 = vmatpush3.bf16.msra.mxu0 %v3936_v63 }
  0x96   :  { %4009 = vmatprep.subr.bf16.mxu0 %v3942_v7 }
  0x97   :  { %3604 = vmatmul.mubr.msk.f32.gmra.mrb[14].mxu0 %vm6336_vm1, %v4451_v54 }
  0x99   :  { %4011 = vmatpush3.bf16.msra.mxu0 %v3942_v7 }
  0x9a   :  { %4064 = vmatprep.subr.bf16.mxu0 %v4242_v0 }
  0xc9   :  { %v288_v5 = vpop.xlane.xlu0 %287 }
  0xcb   :  { %v294_v4 = vpop.xlane.xlu1 %293 }
  0xcd   :  { %v291_v12 = vpop.xlane.xlu0 %290 }
  0xcf   :  { %v297_v9 = vpop.xlane.xlu1 %296 }
  0xd1   :  { %v300_v15 = vpop.xlane.xlu0 %299 }
  0xd3   :  { %v303_v14 = vpop.xlane.xlu1 %302 }
  0xd5   :  { %v306_v30 = vpop.xlane.xlu0 %305 }
  0xd7   :  { %v309_v26 = vpop.xlane.xlu1 %308 }
  0xd9   :  { %v312_v43 = vpop.xlane.xlu0 %311 }
  0xdb   :  { %v315_v41 = vpop.xlane.xlu1 %314 }
  0xdd   :  { %v318_v58 = vpop.xlane.xlu0 %317 }
  0xdf   :  { %v321_v54 = vpop.xlane.xlu1 %320 }
 0x14e   :  { %v3584_v16 = vpop.f32.mrb[0].mxu0 }
 0x14f   :  { %v456_v17 = vmul.f32 2.0, %v3584_v16  ;;  %v207_v18 = vpop.f32.mrb[1].mxu0  ;;  %v451_v19 = vpop.f32.mrb[0].mxu1 }
 0x150   :  { %v455_v20 = vmul.f32 2.0, %v207_v18  ;;  %v4541_v21 = vrot.slane %v451_v19, %v489_v13  ;;  %v3640_v22 = vpop.f32.mrb[1].mxu1 }
 0x151   :  { %v472_v23 = vsub.f32 %v456_v17, %v291_v12 }
 0x152   :  { %v471_v24 = vsub.f32 %v455_v20, %v288_v5  ;;  %v3587_v25 = vpop.f32.mrb[2].mxu0 }
 0x153   :  { %v4544_v27 = vsub.f32 %v472_v23, %v4541_v21  ;;  %v458_v28 = vmul.f32 2.0, %v3587_v25  ;;  %v217_v29 = vpop.f32.mrb[3].mxu0 }
 0x154   :  { %v457_v31 = vmul.f32 2.0, %v217_v29  ;;  %v4547_v32 = vsub.f32 %v471_v24, %v4541_v21 }
 0x155   :  { %v474_v33 = vsub.f32 %v458_v28, %v297_v9  ;;  %509 = vmax.xlane.f32.xlu1 %v4544_v27  ;;  %v327_v9 = vpop.xlane.xlu1 %326 }
 0x156   :  { %v473_v34 = vsub.f32 %v457_v31, %v294_v4  ;;  %v3590_v35 = vpop.f32.mrb[4].mxu0  ;;  %507 = vmax.xlane.f32.xlu0 %v4547_v32 }
 0x157   :  { %v4552_v36 = vsub.f32 %v474_v33, %v4541_v21  ;;  %v460_v37 = vmul.f32 2.0, %v3590_v35  ;;  %v227_v38 = vpop.f32.mrb[5].mxu0 }
 0x158   :  { %v459_v39 = vmul.f32 2.0, %v227_v38  ;;  %v4555_v40 = vsub.f32 %v473_v34, %v4541_v21 }
 0x159   :  { %v476_v42 = vsub.f32 %v460_v37, %v303_v14  ;;  %513 = vmax.xlane.f32.xlu1 %v4552_v36  ;;  %v324_v14 = vpop.xlane.xlu0 %323 }
 0x15a   :  { %v475_v44 = vsub.f32 %v459_v39, %v300_v15  ;;  %v3593_v45 = vpop.f32.mrb[6].mxu0  ;;  %511 = vmax.xlane.f32.xlu0 %v4555_v40 }
 0x15b   :  { %v4560_v46 = vsub.f32 %v476_v42, %v4541_v21  ;;  %v462_v47 = vmul.f32 2.0, %v3593_v45  ;;  %v237_v48 = vpop.f32.mrb[7].mxu0 }
 0x15c   :  { %v4563_v49 = vsub.f32 %v475_v44, %v4541_v21  ;;  %v461_v50 = vmul.f32 2.0, %v237_v48 }
 0x15d   :  { %v478_v51 = vsub.f32 %v462_v47, %v309_v26  ;;  %517 = vmax.xlane.f32.xlu1 %v4560_v46  ;;  %v333_v26 = vpop.xlane.xlu1 %332  ;;  %v330_v31 = vpop.xlane.xlu0 %329 }
 0x15e   :  { %v477_v52 = vsub.f32 %v461_v50, %v306_v30  ;;  %v3596_v53 = vpop.f32.mrb[8].mxu0  ;;  %515 = vmax.xlane.f32.xlu0 %v4563_v49 }
 0x15f   :  { %v4568_v55 = vsub.f32 %v478_v51, %v4541_v21  ;;  %v464_v56 = vmul.f32 2.0, %v3596_v53  ;;  %v247_v57 = vpop.f32.mrb[9].mxu0 }
 0x160   :  { %v4571_v59 = vsub.f32 %v477_v52, %v4541_v21  ;;  %v463_v60 = vmul.f32 2.0, %v247_v57 }
 0x161   :  { %v480_v61 = vsub.f32 %v464_v56, %v315_v41  ;;  %521 = vmax.xlane.f32.xlu1 %v4568_v55  ;;  %v58_v41 = vand.u32 127, %v57_v6 }
 0x162   :  { %v479_v62 = vsub.f32 %v463_v60, %v312_v43  ;;  %v3599_v63 = vpop.f32.mrb[10].mxu0  ;;  %519 = vmax.xlane.f32.xlu0 %v4571_v59 }
 0x163   :  { %v4576_v3 = vsub.f32 %v480_v61, %v4541_v21  ;;  %v466_v7 = vmul.f32 2.0, %v3599_v63  ;;  %v257_v8 = vpop.f32.mrb[11].mxu0  ;;  %v4608_v42 = vcvt.s32.f32 %v58_v41 }
 0x164   :  { %v4579_v4 = vsub.f32 %v479_v62, %v4541_v21  ;;  %v465_v5 = vmul.f32 2.0, %v257_v8 }
 0x165   :  { %v482_v12 = vsub.f32 %v466_v7, %v321_v54  ;;  %525 = vmax.xlane.f32.xlu1 %v4576_v3 }
 0x166   :  { %v481_v15 = vsub.f32 %v465_v5, %v318_v58  ;;  %v3602_v16 = vpop.f32.mrb[12].mxu0  ;;  %523 = vmax.xlane.f32.xlu0 %v4579_v4 }
 0x167   :  { %v4584_v17 = vsub.f32 %v482_v12, %v4541_v21  ;;  %v468_v18 = vmul.f32 2.0, %v3602_v16  ;;  %v267_v19 = vpop.f32.mrb[13].mxu0 }
 0x168   :  { %v4587_v20 = vsub.f32 %v481_v15, %v4541_v21  ;;  %v467_v22 = vmul.f32 2.0, %v267_v19 }
 0x169   :  { %v484_v23 = vsub.f32 %v468_v18, %v327_v9  ;;  %529 = vmax.xlane.f32.xlu1 %v4584_v17 }
 0x16a   :  { %v483_v24 = vsub.f32 %v467_v22, %v324_v14  ;;  %v3605_v25 = vpop.f32.mrb[14].mxu0  ;;  %527 = vmax.xlane.f32.xlu0 %v4587_v20 }
 0x16b   :  { %v4592_v28 = vsub.f32 %v484_v23, %v4541_v21  ;;  %v470_v29 = vmul.f32 2.0, %v3605_v25  ;;  %v277_v30 = vpop.f32.mrb[15].mxu0 }
 0x16c   :  { %v4595_v33 = vsub.f32 %v483_v24, %v4541_v21  ;;  %v469_v34 = vmul.f32 2.0, %v277_v30 }
 0x16d   :  { %v486_v35 = vsub.f32 %v470_v29, %v333_v26  ;;  %533 = vmax.xlane.f32.xlu1 %v4592_v28 }
 0x16e   :  { %v485_v37 = vsub.f32 %v469_v34, %v330_v31  ;;  %531 = vmax.xlane.f32.xlu0 %v4595_v33 }
 0x16f   :  { %v4600_v38 = vsub.f32 %v486_v35, %v4541_v21 }
 0x170   :  { %v4603_v39 = vsub.f32 %v485_v37, %v4541_v21 }
 0x171   :  { %537 = vmax.xlane.f32.xlu1 %v4600_v38 }
 0x172   :  { %535 = vmax.xlane.f32.xlu0 %v4603_v39 }
 0x1e2   :  { %v510_v43 = vpop.xlane.xlu1 %509 }
 0x1e3   :  { %v508_v44 = vpop.xlane.xlu0 %507  ;;  %vm540_vm3 = vcmp.eq.f32.partialorder %v4544_v27, %v510_v43 }
 0x1e4   :  { %v556_v45 = vsel %vm540_vm3, %v4608_v42, 128.0  ;;  %vm539_vm4 = vcmp.eq.f32.partialorder %v4547_v32, %v508_v44 }
 0x1e5   :  { %573 = vmin.xlane.f32.xlu1 %v556_v45  ;;  %v555_v21 = vsel %vm539_vm4, %v4608_v42, 128.0 }
 0x1e6   :  { %v514_v47 = vpop.xlane.xlu1 %513  ;;  %571 = vmin.xlane.f32.xlu0 %v555_v21 }
 0x1e7   :  { %v512_v48 = vpop.xlane.xlu0 %511  ;;  %vm542_vm5 = vcmp.eq.f32.partialorder %v4552_v36, %v514_v47 }
 0x1e8   :  { %v558_v6 = vsel %vm542_vm5, %v4608_v42, 128.0  ;;  %vm541_vm6 = vcmp.eq.f32.partialorder %v4555_v40, %v512_v48 }
 0x1e9   :  { %577 = vmin.xlane.f32.xlu1 %v558_v6  ;;  %v557_v50 = vsel %vm541_vm6, %v4608_v42, 128.0 }
 0x1ea   :  { %v518_v51 = vpop.xlane.xlu1 %517  ;;  %575 = vmin.xlane.f32.xlu0 %v557_v50 }
 0x1eb   :  { %v516_v52 = vpop.xlane.xlu0 %515  ;;  %vm544_vm7 = vcmp.eq.f32.partialorder %v4560_v46, %v518_v51 }
 0x1ec   :  { %v560_v53 = vsel %vm544_vm7, %v4608_v42, 128.0  ;;  %vm543_vm8 = vcmp.eq.f32.partialorder %v4563_v49, %v516_v52 }
 0x1ed   :  { %581 = vmin.xlane.f32.xlu1 %v560_v53  ;;  %v559_v54 = vsel %vm543_vm8, %v4608_v42, 128.0 }
 0x1ee   :  { %v522_v56 = vpop.xlane.xlu1 %521  ;;  %579 = vmin.xlane.f32.xlu0 %v559_v54 }
 0x1ef   :  { %v520_v57 = vpop.xlane.xlu0 %519  ;;  %vm546_vm9 = vcmp.eq.f32.partialorder %v4568_v55, %v522_v56 }
 0x1f0   :  { %v562_v58 = vsel %vm546_vm9, %v4608_v42, 128.0  ;;  %vm545_vm10 = vcmp.eq.f32.partialorder %v4571_v59, %v520_v57 }
 0x1f1   :  { %585 = vmin.xlane.f32.xlu1 %v562_v58  ;;  %v561_v60 = vsel %vm545_vm10, %v4608_v42, 128.0 }
 0x1f2   :  { %v526_v61 = vpop.xlane.xlu1 %525  ;;  %583 = vmin.xlane.f32.xlu0 %v561_v60 }
 0x1f3   :  { %v524_v62 = vpop.xlane.xlu0 %523  ;;  %vm548_vm11 = vcmp.eq.f32.partialorder %v4576_v3, %v526_v61 }
 0x1f4   :  { %v564_v63 = vsel %vm548_vm11, %v4608_v42, 128.0  ;;  %vm547_vm12 = vcmp.eq.f32.partialorder %v4579_v4, %v524_v62 }
 0x1f5   :  { %589 = vmin.xlane.f32.xlu1 %v564_v63  ;;  %v563_v7 = vsel %vm547_vm12, %v4608_v42, 128.0 }
 0x1f6   :  { %v530_v8 = vpop.xlane.xlu1 %529  ;;  %587 = vmin.xlane.f32.xlu0 %v563_v7 }
 0x1f7   :  { %v528_v5 = vpop.xlane.xlu0 %527  ;;  %vm550_vm13 = vcmp.eq.f32.partialorder %v4584_v17, %v530_v8 }
 0x1f8   :  { %v566_v9 = vsel %vm550_vm13, %v4608_v42, 128.0  ;;  %vm549_vm14 = vcmp.eq.f32.partialorder %v4587_v20, %v528_v5 }
 0x1f9   :  { %593 = vmin.xlane.f32.xlu1 %v566_v9  ;;  %v565_v12 = vsel %vm549_vm14, %v4608_v42, 128.0 }
 0x1fa   :  { %v534_v14 = vpop.xlane.xlu1 %533  ;;  %591 = vmin.xlane.f32.xlu0 %v565_v12 }
 0x1fb   :  { %v532_v15 = vpop.xlane.xlu0 %531  ;;  %vm552_vm15 = vcmp.eq.f32.partialorder %v4592_v28, %v534_v14 }
 0x1fc   :  { %v568_v16 = vsel %vm552_vm15, %v4608_v42, 128.0  ;;  %vm551_vm3 = vcmp.eq.f32.partialorder %v4595_v33, %v532_v15 }
 0x1fd   :  { %597 = vmin.xlane.f32.xlu1 %v568_v16  ;;  %v567_v18 = vsel %vm551_vm3, %v4608_v42, 128.0 }
 0x1fe   :  { %v538_v19 = vpop.xlane.xlu1 %537  ;;  %595 = vmin.xlane.f32.xlu0 %v567_v18 }
 0x1ff   :  { %v536_v22 = vpop.xlane.xlu0 %535  ;;  %vm554_vm4 = vcmp.eq.f32.partialorder %v4600_v38, %v538_v19 }
 0x200   :  { %v570_v23 = vsel %vm554_vm4, %v4608_v42, 128.0  ;;  %vm553_vm5 = vcmp.eq.f32.partialorder %v4603_v39, %v536_v22 }
 0x201   :  { %601 = vmin.xlane.f32.xlu1 %v570_v23  ;;  %v569_v24 = vsel %vm553_vm5, %v4608_v42, 128.0 }
 0x202   :  { %599 = vmin.xlane.f32.xlu0 %v569_v24 }
 0x272   :  { %v4642_v25 = vpop.xlane.xlu1 %573 }
 0x273   :  { %vm604_vm6 = vcmp.eq.f32.partialorder %v4608_v42, %v4642_v25  ;;  %v4646_v26 = vpop.xlane.xlu0 %571 }
 0x274   :  { %vm603_vm7 = vcmp.eq.f32.partialorder %v4608_v42, %v4646_v26  ;;  %v4654_v29 = vsel %vm604_vm6, -3.4028235e+38, %v4544_v27 }
 0x275   :  { %685 = vmax.xlane.f32.xlu1 %v4654_v29  ;;  %v4661_v30 = vsel %vm603_vm7, -3.4028235e+38, %v4547_v32 }
 0x276   :  { %v4663_v31 = vpop.xlane.xlu1 %577  ;;  %683 = vmax.xlane.f32.xlu0 %v4661_v30 }
 0x277   :  { %vm606_vm8 = vcmp.eq.f32.partialorder %v4608_v42, %v4663_v31  ;;  %v4668_v34 = vpop.xlane.xlu0 %575 }
 0x278   :  { %vm605_vm9 = vcmp.eq.f32.partialorder %v4608_v42, %v4668_v34  ;;  %v4676_v27 = vsel %vm606_vm8, -3.4028235e+38, %v4552_v36  ;;  %v3145_v26 = vsel %vm606_vm8, 1.0, %v4244_v1 }
 0x279   :  { %689 = vmax.xlane.f32.xlu1 %v4676_v27  ;;  %v4683_v32 = vsel %vm605_vm9, -3.4028235e+38, %v4555_v40 }
 0x27a   :  { %v4685_v35 = vpop.xlane.xlu1 %581  ;;  %687 = vmax.xlane.f32.xlu0 %v4683_v32 }
 0x27b   :  { %vm608_vm10 = vcmp.eq.f32.partialorder %v4608_v42, %v4685_v35  ;;  %v4690_v37 = vpop.xlane.xlu0 %579 }
 0x27c   :  { %vm607_vm11 = vcmp.eq.f32.partialorder %v4608_v42, %v4690_v37  ;;  %v4698_v36 = vsel %vm608_vm10, -3.4028235e+38, %v4560_v46  ;;  %v3147_v34 = vsel %vm608_vm10, 1.0, %v4244_v1 }
 0x27d   :  { %693 = vmax.xlane.f32.xlu1 %v4698_v36  ;;  %v4705_v40 = vsel %vm607_vm11, -3.4028235e+38, %v4563_v49 }
 0x27e   :  { %v4707_v41 = vpop.xlane.xlu1 %585  ;;  %691 = vmax.xlane.f32.xlu0 %v4705_v40 }
 0x27f   :  { %vm610_vm12 = vcmp.eq.f32.partialorder %v4608_v42, %v4707_v41  ;;  %v4712_v43 = vpop.xlane.xlu0 %583 }
 0x280   :  { %vm609_vm13 = vcmp.eq.f32.partialorder %v4608_v42, %v4712_v43  ;;  %v4720_v46 = vsel %vm610_vm12, -3.4028235e+38, %v4568_v55  ;;  %v3149_v37 = vsel %vm610_vm12, 1.0, %v4244_v1 }
 0x281   :  { %697 = vmax.xlane.f32.xlu1 %v4720_v46  ;;  %v4727_v49 = vsel %vm609_vm13, -3.4028235e+38, %v4571_v59 }
 0x282   :  { %v4729_v44 = vpop.xlane.xlu1 %589  ;;  %695 = vmax.xlane.f32.xlu0 %v4727_v49 }
 0x283   :  { %vm612_vm14 = vcmp.eq.f32.partialorder %v4608_v42, %v4729_v44  ;;  %v4734_v45 = vpop.xlane.xlu0 %587 }
 0x284   :  { %vm611_vm15 = vcmp.eq.f32.partialorder %v4608_v42, %v4734_v45  ;;  %v4742_v55 = vsel %vm612_vm14, -3.4028235e+38, %v4576_v3  ;;  %v3151_v43 = vsel %vm612_vm14, 1.0, %v4244_v1 }
 0x285   :  { %701 = vmax.xlane.f32.xlu1 %v4742_v55  ;;  %v4749_v59 = vsel %vm611_vm15, -3.4028235e+38, %v4579_v4 }
 0x286   :  { %v4751_v21 = vpop.xlane.xlu1 %593  ;;  %699 = vmax.xlane.f32.xlu0 %v4749_v59 }
 0x287   :  { %vm614_vm3 = vcmp.eq.f32.partialorder %v4608_v42, %v4751_v21  ;;  %v4756_v47 = vpop.xlane.xlu0 %591 }
 0x288   :  { %vm6340_vm4 = vcmp.eq.f32.partialorder %v4608_v42, %v4756_v47  ;;  %v4764_v3 = vsel %vm614_vm3, -3.4028235e+38, %v4584_v17  ;;  %v3153_v45 = vsel %vm614_vm3, 1.0, %v4244_v1 }
 0x289   :  { %705 = vmax.xlane.f32.xlu1 %v4764_v3  ;;  %v4771_v4 = vsel %vm6340_vm4, -3.4028235e+38, %v4587_v20 }
 0x28a   :  { %v4773_v48 = vpop.xlane.xlu1 %597  ;;  %703 = vmax.xlane.f32.xlu0 %v4771_v4 }
 0x28b   :  { %vm6338_vm5 = vcmp.eq.f32.partialorder %v4608_v42, %v4773_v48  ;;  %v4778_v6 = vpop.xlane.xlu0 %595 }
 0x28c   :  { %vm6339_vm1 = vcmp.eq.f32.partialorder %v4608_v42, %v4778_v6  ;;  %v4786_v17 = vsel %vm6338_vm5, -3.4028235e+38, %v4592_v28 }
 0x28d   :  { %709 = vmax.xlane.f32.xlu1 %v4786_v17  ;;  %v4793_v20 = vsel %vm6339_vm1, -3.4028235e+38, %v4595_v33 }
 0x28e   :  { %v4795_v50 = vpop.xlane.xlu1 %601  ;;  %707 = vmax.xlane.f32.xlu0 %v4793_v20 }
 0x28f   :  { %vm6341_vm0 = vcmp.eq.f32.partialorder %v4608_v42, %v4795_v50  ;;  %v4800_v51 = vpop.xlane.xlu0 %599 }
 0x290   :  { %vm6342_vm5 = vcmp.eq.f32.partialorder %v4608_v42, %v4800_v51  ;;  %v4808_v28 = vsel %vm6341_vm0, -3.4028235e+38, %v4600_v38 }
 0x291   :  { %713 = vmax.xlane.f32.xlu1 %v4808_v28  ;;  %v4815_v33 = vsel %vm6342_vm5, -3.4028235e+38, %v4603_v39 }
 0x292   :  { %711 = vmax.xlane.f32.xlu0 %v4815_v33 }
 0x302   :  { %v686_v52 = vpop.xlane.xlu1 %685 }
 0x303   :  { %v684_v53 = vpop.xlane.xlu0 %683  ;;  %vm716_vm1 = vcmp.eq.f32.partialorder %v4654_v29, %v686_v52 }
 0x304   :  { %v732_v54 = vsel %vm716_vm1, %v4608_v42, 128.0  ;;  %vm715_vm4 = vcmp.eq.f32.partialorder %v4661_v30, %v684_v53 }
 0x305   :  { %749 = vmin.xlane.f32.xlu1 %v732_v54  ;;  %v731_v38 = vsel %vm715_vm4, %v4608_v42, 128.0 }
 0x306   :  { %v690_v56 = vpop.xlane.xlu1 %689  ;;  %747 = vmin.xlane.f32.xlu0 %v731_v38 }
 0x307   :  { %v688_v57 = vpop.xlane.xlu0 %687  ;;  %vm718_vm0 = vcmp.eq.f32.partialorder %v4676_v27, %v690_v56 }
 0x308   :  { %v734_v39 = vsel %vm718_vm0, %v4608_v42, 128.0  ;;  %vm717_vm5 = vcmp.eq.f32.partialorder %v4683_v32, %v688_v57 }
 0x309   :  { %753 = vmin.xlane.f32.xlu1 %v734_v39  ;;  %v733_v58 = vsel %vm717_vm5, %v4608_v42, 128.0 }
 0x30a   :  { %v694_v60 = vpop.xlane.xlu1 %693  ;;  %751 = vmin.xlane.f32.xlu0 %v733_v58 }
 0x30b   :  { %v692_v61 = vpop.xlane.xlu0 %691  ;;  %vm720_vm1 = vcmp.eq.f32.partialorder %v4698_v36, %v694_v60 }
 0x30c   :  { %v736_v62 = vsel %vm720_vm1, %v4608_v42, 128.0  ;;  %vm719_vm4 = vcmp.eq.f32.partialorder %v4705_v40, %v692_v61  ;;  %v3143_v61 = vsel %vm604_vm6, 1.0, %v4244_v1 }
 0x30d   :  { %757 = vmin.xlane.f32.xlu1 %v736_v62  ;;  %v735_v63 = vsel %vm719_vm4, %v4608_v42, 128.0 }
 0x30e   :  { %v698_v7 = vpop.xlane.xlu1 %697  ;;  %755 = vmin.xlane.f32.xlu0 %v735_v63 }
 0x30f   :  { %v696_v8 = vpop.xlane.xlu0 %695  ;;  %vm722_vm0 = vcmp.eq.f32.partialorder %v4720_v46, %v698_v7  ;;  %v3142_v7 = vsel %vm603_vm7, 1.0, %v4244_v1 }
 0x310   :  { %v738_v5 = vsel %vm722_vm0, %v4608_v42, 128.0  ;;  %vm721_vm5 = vcmp.eq.f32.partialorder %v4727_v49, %v696_v8 }
 0x311   :  { %761 = vmin.xlane.f32.xlu1 %v738_v5  ;;  %v737_v9 = vsel %vm721_vm5, %v4608_v42, 128.0 }
 0x312   :  { %v702_v12 = vpop.xlane.xlu1 %701  ;;  %759 = vmin.xlane.f32.xlu0 %v737_v9 }
 0x313   :  { %v700_v14 = vpop.xlane.xlu0 %699  ;;  %vm724_vm1 = vcmp.eq.f32.partialorder %v4742_v55, %v702_v12 }
 0x314   :  { %v740_v15 = vsel %vm724_vm1, %v4608_v42, 128.0  ;;  %vm723_vm4 = vcmp.eq.f32.partialorder %v4749_v59, %v700_v14 }
 0x315   :  { %765 = vmin.xlane.f32.xlu1 %v740_v15  ;;  %v739_v16 = vsel %vm723_vm4, %v4608_v42, 128.0  ;;  %v3144_v15 = vsel %vm605_vm9, 1.0, %v4244_v1 }
 0x316   :  { %v706_v18 = vpop.xlane.xlu1 %705  ;;  %763 = vmin.xlane.f32.xlu0 %v739_v16 }
 0x317   :  { %v704_v19 = vpop.xlane.xlu0 %703  ;;  %vm726_vm0 = vcmp.eq.f32.partialorder %v4764_v3, %v706_v18 }
 0x318   :  { %v742_v22 = vsel %vm726_vm0, %v4608_v42, 128.0  ;;  %vm725_vm5 = vcmp.eq.f32.partialorder %v4771_v4, %v704_v19 }
 0x319   :  { %769 = vmin.xlane.f32.xlu1 %v742_v22  ;;  %v741_v23 = vsel %vm725_vm5, %v4608_v42, 128.0 }
 0x31a   :  { %v710_v24 = vpop.xlane.xlu1 %709  ;;  %767 = vmin.xlane.f32.xlu0 %v741_v23 }
 0x31b   :  { %v708_v52 = vpop.xlane.xlu0 %707  ;;  %vm728_vm1 = vcmp.eq.f32.partialorder %v4786_v17, %v710_v24  ;;  %v3146_v24 = vsel %vm607_vm11, 1.0, %v4244_v1 }
 0x31c   :  { %v744_v53 = vsel %vm728_vm1, %v4608_v42, 128.0  ;;  %vm727_vm4 = vcmp.eq.f32.partialorder %v4793_v20, %v708_v52 }
 0x31d   :  { %773 = vmin.xlane.f32.xlu1 %v744_v53  ;;  %v743_v54 = vsel %vm727_vm4, %v4608_v42, 128.0 }
 0x31e   :  { %v714_v38 = vpop.xlane.xlu1 %713  ;;  %771 = vmin.xlane.f32.xlu0 %v743_v54 }
 0x31f   :  { %v712_v56 = vpop.xlane.xlu0 %711  ;;  %vm730_vm0 = vcmp.eq.f32.partialorder %v4808_v28, %v714_v38 }
 0x320   :  { %v746_v57 = vsel %vm730_vm0, %v4608_v42, 128.0  ;;  %vm729_vm5 = vcmp.eq.f32.partialorder %v4815_v33, %v712_v56  ;;  %vm6350_vm0 = vcmp.eq.f32.partialorder %v4608_v42, %v4756_v47 }
 0x321   :  { %777 = vmin.xlane.f32.xlu1 %v746_v57  ;;  %v745_v39 = vsel %vm729_vm5, %v4608_v42, 128.0  ;;  %v3148_v57 = vsel %vm609_vm13, 1.0, %v4244_v1  ;;  %vm6351_vm5 = vcmp.eq.f32.partialorder %v4608_v42, %v4773_v48 }
 0x322   :  { %775 = vmin.xlane.f32.xlu0 %v745_v39  ;;  %v3155_v47 = vsel %vm6351_vm5, 1.0, %v4244_v1 }
 0x392   :  { %v750_v58 = vpop.xlane.xlu1 %749 }
 0x393   :  { %vm780_vm1 = vcmp.eq.f32.partialorder %v4608_v42, %v750_v58  ;;  %v748_v60 = vpop.xlane.xlu0 %747 }
 0x394   :  { %v3159_v62 = vsel %vm780_vm1, 1.0, %v4244_v1  ;;  %vm779_vm4 = vcmp.eq.f32.partialorder %v4608_v42, %v748_v60  ;;  %v4858_v63 = vsel %vm780_vm1, -3.4028235e+38, %v4654_v29 }
 0x395   :  { %v4864_v8 = vadd.f32 %v3159_v62, %v3143_v61  ;;  %v3158_v5 = vsel %vm779_vm4, 1.0, %v4244_v1  ;;  %861 = vmax.xlane.f32.xlu1 %v4858_v63  ;;  %v4869_v25 = vsel %vm779_vm4, -3.4028235e+38, %v4661_v30  ;;  %vm6352_vm4 = vcmp.eq.f32.partialorder %v4608_v42, %v4778_v6 }
 0x396   :  { %v4871_v9 = vadd.f32 %v3158_v5, %v3142_v7  ;;  %v754_v12 = vpop.xlane.xlu1 %753  ;;  %859 = vmax.xlane.f32.xlu0 %v4869_v25  ;;  %v3150_v7 = vsel %vm611_vm15, 1.0, %v4244_v1 }
 0x397   :  { %vm782_vm6 = vcmp.eq.f32.partialorder %v4608_v42, %v754_v12  ;;  %v752_v29 = vpop.xlane.xlu0 %751 }
 0x398   :  { %v3161_v14 = vsel %vm782_vm6, 1.0, %v4244_v1  ;;  %vm781_vm7 = vcmp.eq.f32.partialorder %v4608_v42, %v752_v29  ;;  %v4882_v30 = vsel %vm782_vm6, -3.4028235e+38, %v4676_v27 }
 0x399   :  { %v4888_v16 = vadd.f32 %v3161_v14, %v3145_v26  ;;  %v3160_v18 = vsel %vm781_vm7, 1.0, %v4244_v1  ;;  %865 = vmax.xlane.f32.xlu1 %v4882_v30  ;;  %v4893_v31 = vsel %vm781_vm7, -3.4028235e+38, %v4683_v32  ;;  %vm6353_vm7 = vcmp.eq.f32.partialorder %v4608_v42, %v4795_v50 }
 0x39a   :  { %v4895_v19 = vadd.f32 %v3160_v18, %v3144_v15  ;;  %v758_v22 = vpop.xlane.xlu1 %757  ;;  %863 = vmax.xlane.f32.xlu0 %v4893_v31  ;;  %v3152_v15 = vsel %vm6350_vm0, 1.0, %v4244_v1  ;;  %v3157_v6 = vsel %vm6353_vm7, 1.0, %v4244_v1 }
 0x39b   :  { %vm784_vm8 = vcmp.eq.f32.partialorder %v4608_v42, %v758_v22  ;;  %v756_v27 = vpop.xlane.xlu0 %755 }
 0x39c   :  { %v3163_v23 = vsel %vm784_vm8, 1.0, %v4244_v1  ;;  %vm783_vm9 = vcmp.eq.f32.partialorder %v4608_v42, %v756_v27  ;;  %v4906_v32 = vsel %vm784_vm8, -3.4028235e+38, %v4698_v36 }
 0x39d   :  { %v4912_v52 = vadd.f32 %v3163_v23, %v3147_v34  ;;  %v3162_v53 = vsel %vm783_vm9, 1.0, %v4244_v1  ;;  %869 = vmax.xlane.f32.xlu1 %v4906_v32  ;;  %v4917_v35 = vsel %vm783_vm9, -3.4028235e+38, %v4705_v40  ;;  %vm6354_vm9 = vcmp.eq.f32.partialorder %v4608_v42, %v4800_v51 }
 0x39e   :  { %v4919_v54 = vadd.f32 %v3162_v53, %v3146_v24  ;;  %v762_v38 = vpop.xlane.xlu1 %761  ;;  %867 = vmax.xlane.f32.xlu0 %v4917_v35  ;;  %v3154_v24 = vsel %vm6352_vm4, 1.0, %v4244_v1 }
 0x39f   :  { %vm786_vm10 = vcmp.eq.f32.partialorder %v4608_v42, %v762_v38  ;;  %v760_v36 = vpop.xlane.xlu0 %759 }
 0x3a0   :  { %v3165_v56 = vsel %vm786_vm10, 1.0, %v4244_v1  ;;  %vm785_vm11 = vcmp.eq.f32.partialorder %v4608_v42, %v760_v36  ;;  %v4930_v40 = vsel %vm786_vm10, -3.4028235e+38, %v4720_v46 }
 0x3a1   :  { %v4936_v39 = vadd.f32 %v3165_v56, %v3149_v37  ;;  %v3164_v58 = vsel %vm785_vm11, 1.0, %v4244_v1  ;;  %873 = vmax.xlane.f32.xlu1 %v4930_v40  ;;  %v4941_v41 = vsel %vm785_vm11, -3.4028235e+38, %v4727_v49 }
 0x3a2   :  { %v4943_v60 = vadd.f32 %v3164_v58, %v3148_v57  ;;  %v766_v61 = vpop.xlane.xlu1 %765  ;;  %871 = vmax.xlane.f32.xlu0 %v4941_v41  ;;  %v3156_v57 = vsel %vm6354_vm9, 1.0, %v4244_v1 }
 0x3a3   :  { %vm788_vm12 = vcmp.eq.f32.partialorder %v4608_v42, %v766_v61  ;;  %v764_v46 = vpop.xlane.xlu0 %763 }
 0x3a4   :  { %v3167_v62 = vsel %vm788_vm12, 1.0, %v4244_v1  ;;  %vm787_vm13 = vcmp.eq.f32.partialorder %v4608_v42, %v764_v46  ;;  %v4954_v49 = vsel %vm788_vm12, -3.4028235e+38, %v4742_v55 }
 0x3a5   :  { %v4960_v5 = vadd.f32 %v3167_v62, %v3151_v43  ;;  %v3166_v12 = vsel %vm787_vm13, 1.0, %v4244_v1  ;;  %877 = vmax.xlane.f32.xlu1 %v4954_v49  ;;  %v4965_v44 = vsel %vm787_vm13, -3.4028235e+38, %v4749_v59 }
 0x3a6   :  { %v4967_v29 = vadd.f32 %v3166_v12, %v3150_v7  ;;  %v770_v26 = vpop.xlane.xlu1 %769  ;;  %875 = vmax.xlane.f32.xlu0 %v4965_v44 }
 0x3a7   :  { %vm790_vm14 = vcmp.eq.f32.partialorder %v4608_v42, %v770_v26  ;;  %v768_v55 = vpop.xlane.xlu0 %767 }
 0x3a8   :  { %v3169_v14 = vsel %vm790_vm14, 1.0, %v4244_v1  ;;  %vm789_vm15 = vcmp.eq.f32.partialorder %v4608_v42, %v768_v55  ;;  %v4978_v59 = vsel %vm790_vm14, -3.4028235e+38, %v4764_v3 }
 0x3a9   :  { %v4984_v18 = vadd.f32 %v3169_v14, %v3153_v45  ;;  %v3168_v22 = vsel %vm789_vm15, 1.0, %v4244_v1  ;;  %881 = vmax.xlane.f32.xlu1 %v4978_v59  ;;  %v4989_v21 = vsel %vm789_vm15, -3.4028235e+38, %v4771_v4 }
 0x3aa   :  { %v4991_v27 = vadd.f32 %v3168_v22, %v3152_v15  ;;  %v774_v34 = vpop.xlane.xlu1 %773  ;;  %879 = vmax.xlane.f32.xlu0 %v4989_v21 }
 0x3ab   :  { %vm792_vm3 = vcmp.eq.f32.partialorder %v4608_v42, %v774_v34  ;;  %v772_v3 = vpop.xlane.xlu0 %771 }
 0x3ac   :  { %v3171_v23 = vsel %vm792_vm3, 1.0, %v4244_v1  ;;  %vm791_vm1 = vcmp.eq.f32.partialorder %v4608_v42, %v772_v3  ;;  %v5002_v4 = vsel %vm792_vm3, -3.4028235e+38, %v4786_v17 }
 0x3ad   :  { %v5008_v53 = vadd.f32 %v3171_v23, %v3155_v47  ;;  %v3170_v38 = vsel %vm791_vm1, 1.0, %v4244_v1  ;;  %885 = vmax.xlane.f32.xlu1 %v5002_v4  ;;  %v5013_v48 = vsel %vm791_vm1, -3.4028235e+38, %v4793_v20 }
 0x3ae   :  { %v5015_v36 = vadd.f32 %v3170_v38, %v3154_v24  ;;  %v778_v37 = vpop.xlane.xlu1 %777  ;;  %883 = vmax.xlane.f32.xlu0 %v5013_v48 }
 0x3af   :  { %vm794_vm6 = vcmp.eq.f32.partialorder %v4608_v42, %v778_v37  ;;  %v776_v17 = vpop.xlane.xlu0 %775 }
 0x3b0   :  { %v3173_v56 = vsel %vm794_vm6, 1.0, %v4244_v1  ;;  %vm793_vm8 = vcmp.eq.f32.partialorder %v4608_v42, %v776_v17  ;;  %v5026_v20 = vsel %vm794_vm6, -3.4028235e+38, %v4808_v28 }
 0x3b1   :  { %v5032_v58 = vadd.f32 %v3173_v56, %v3157_v6  ;;  %v3172_v61 = vsel %vm793_vm8, 1.0, %v4244_v1  ;;  %889 = vmax.xlane.f32.xlu1 %v5026_v20  ;;  %v5037_v50 = vsel %vm793_vm8, -3.4028235e+38, %v4815_v33 }
 0x3b2   :  { %v5039_v46 = vadd.f32 %v3172_v61, %v3156_v57  ;;  %887 = vmax.xlane.f32.xlu0 %v5037_v50 }
 0x422   :  { %v862_v28 = vpop.xlane.xlu1 %861 }
 0x423   :  { %v860_v43 = vpop.xlane.xlu0 %859  ;;  %vm892_vm10 = vcmp.eq.f32.partialorder %v4858_v63, %v862_v28 }
 0x424   :  { %v908_v51 = vsel %vm892_vm10, %v4608_v42, 128.0  ;;  %vm891_vm11 = vcmp.eq.f32.partialorder %v4869_v25, %v860_v43 }
 0x425   :  { %925 = vmin.xlane.f32.xlu1 %v908_v51  ;;  %v907_v62 = vsel %vm891_vm11, %v4608_v42, 128.0 }
 0x426   :  { %v866_v7 = vpop.xlane.xlu1 %865  ;;  %923 = vmin.xlane.f32.xlu0 %v907_v62 }
 0x427   :  { %vm894_vm12 = vcmp.eq.f32.partialorder %v4882_v30, %v866_v7  ;;  %v864_v33 = vpop.xlane.xlu0 %863 }
 0x428   :  { %vm893_vm13 = vcmp.eq.f32.partialorder %v4893_v31, %v864_v33  ;;  %v910_v12 = vsel %vm894_vm12, %v4608_v42, 128.0 }
 0x429   :  { %929 = vmin.xlane.f32.xlu1 %v910_v12  ;;  %v909_v26 = vsel %vm893_vm13, %v4608_v42, 128.0 }
 0x42a   :  { %v870_v55 = vpop.xlane.xlu1 %869  ;;  %927 = vmin.xlane.f32.xlu0 %v909_v26 }
 0x42b   :  { %vm896_vm14 = vcmp.eq.f32.partialorder %v4906_v32, %v870_v55  ;;  %v868_v45 = vpop.xlane.xlu0 %867 }
 0x42c   :  { %vm895_vm15 = vcmp.eq.f32.partialorder %v4917_v35, %v868_v45  ;;  %v912_v14 = vsel %vm896_vm14, %v4608_v42, 128.0 }
 0x42d   :  { %933 = vmin.xlane.f32.xlu1 %v912_v14  ;;  %v911_v15 = vsel %vm895_vm15, %v4608_v42, 128.0 }
 0x42e   :  { %v874_v22 = vpop.xlane.xlu1 %873  ;;  %931 = vmin.xlane.f32.xlu0 %v911_v15 }
 0x42f   :  { %vm898_vm0 = vcmp.eq.f32.partialorder %v4930_v40, %v874_v22  ;;  %v872_v34 = vpop.xlane.xlu0 %871 }
 0x430   :  { %vm897_vm3 = vcmp.eq.f32.partialorder %v4941_v41, %v872_v34  ;;  %v914_v3 = vsel %vm898_vm0, %v4608_v42, 128.0 }
 0x431   :  { %937 = vmin.xlane.f32.xlu1 %v914_v3  ;;  %v913_v47 = vsel %vm897_vm3, %v4608_v42, 128.0 }
 0x432   :  { %v878_v23 = vpop.xlane.xlu1 %877  ;;  %935 = vmin.xlane.f32.xlu0 %v913_v47 }
 0x433   :  { %vm900_vm5 = vcmp.eq.f32.partialorder %v4954_v49, %v878_v23  ;;  %v876_v24 = vpop.xlane.xlu0 %875 }
 0x434   :  { %vm899_vm1 = vcmp.eq.f32.partialorder %v4965_v44, %v876_v24  ;;  %v916_v38 = vsel %vm900_vm5, %v4608_v42, 128.0 }
 0x435   :  { %941 = vmin.xlane.f32.xlu1 %v916_v38  ;;  %v915_v37 = vsel %vm899_vm1, %v4608_v42, 128.0 }
 0x436   :  { %v882_v17 = vpop.xlane.xlu1 %881  ;;  %939 = vmin.xlane.f32.xlu0 %v915_v37 }
 0x437   :  { %vm902_vm4 = vcmp.eq.f32.partialorder %v4978_v59, %v882_v17  ;;  %v880_v6 = vpop.xlane.xlu0 %879 }
 0x438   :  { %vm901_vm6 = vcmp.eq.f32.partialorder %v4989_v21, %v880_v6  ;;  %v918_v56 = vsel %vm902_vm4, %v4608_v42, 128.0 }
 0x439   :  { %945 = vmin.xlane.f32.xlu1 %v918_v56  ;;  %v917_v57 = vsel %vm901_vm6, %v4608_v42, 128.0 }
 0x43a   :  { %v886_v61 = vpop.xlane.xlu1 %885  ;;  %943 = vmin.xlane.f32.xlu0 %v917_v57 }
 0x43b   :  { %vm904_vm7 = vcmp.eq.f32.partialorder %v5002_v4, %v886_v61  ;;  %v884_v28 = vpop.xlane.xlu0 %883 }
 0x43c   :  { %vm903_vm8 = vcmp.eq.f32.partialorder %v5013_v48, %v884_v28  ;;  %v920_v43 = vsel %vm904_vm7, %v4608_v42, 128.0 }
 0x43d   :  { %949 = vmin.xlane.f32.xlu1 %v920_v43  ;;  %v919_v51 = vsel %vm903_vm8, %v4608_v42, 128.0 }
 0x43e   :  { %v890_v62 = vpop.xlane.xlu1 %889  ;;  %947 = vmin.xlane.f32.xlu0 %v919_v51 }
 0x43f   :  { %vm906_vm9 = vcmp.eq.f32.partialorder %v5026_v20, %v890_v62  ;;  %v888_v7 = vpop.xlane.xlu0 %887 }
 0x440   :  { %vm905_vm10 = vcmp.eq.f32.partialorder %v5037_v50, %v888_v7  ;;  %v922_v33 = vsel %vm906_vm9, %v4608_v42, 128.0 }
 0x441   :  { %953 = vmin.xlane.f32.xlu1 %v922_v33  ;;  %v921_v12 = vsel %vm905_vm10, %v4608_v42, 128.0 }
 0x442   :  { %951 = vmin.xlane.f32.xlu0 %v921_v12 }
 0x4b2   :  { %v926_v26 = vpop.xlane.xlu1 %925 }
 0x4b3   :  { %vm956_vm11 = vcmp.eq.f32.partialorder %v4608_v42, %v926_v26  ;;  %v924_v55 = vpop.xlane.xlu0 %923 }
 0x4b4   :  { %v3175_v45 = vsel %vm956_vm11, 1.0, %v4244_v1  ;;  %vm955_vm12 = vcmp.eq.f32.partialorder %v4608_v42, %v924_v55  ;;  %v5078_v14 = vsel %vm956_vm11, -3.4028235e+38, %v4858_v63 }
 0x4b5   :  { %v5081_v15 = vadd.f32 %v3175_v45, %v4864_v8  ;;  %v3174_v22 = vsel %vm955_vm12, 1.0, %v4244_v1  ;;  %1037 = vmax.xlane.f32.xlu1 %v5078_v14  ;;  %v5086_v34 = vsel %vm955_vm12, -3.4028235e+38, %v4869_v25 }
 0x4b6   :  { %v5089_v3 = vadd.f32 %v3174_v22, %v4871_v9  ;;  %v930_v47 = vpop.xlane.xlu1 %929  ;;  %1035 = vmax.xlane.f32.xlu0 %v5086_v34 }
 0x4b7   :  { %vm958_vm13 = vcmp.eq.f32.partialorder %v4608_v42, %v930_v47  ;;  %v928_v63 = vpop.xlane.xlu0 %927 }
 0x4b8   :  { %v3177_v23 = vsel %vm958_vm13, 1.0, %v4244_v1  ;;  %vm957_vm14 = vcmp.eq.f32.partialorder %v4608_v42, %v928_v63  ;;  %v5096_v8 = vsel %vm958_vm13, -3.4028235e+38, %v4882_v30 }
 0x4b9   :  { %v5099_v24 = vadd.f32 %v3177_v23, %v4888_v16  ;;  %v3176_v25 = vsel %vm957_vm14, 1.0, %v4244_v1  ;;  %1041 = vmax.xlane.f32.xlu1 %v5096_v8  ;;  %v5104_v9 = vsel %vm957_vm14, -3.4028235e+38, %v4893_v31 }
 0x4ba   :  { %v5107_v38 = vadd.f32 %v3176_v25, %v4895_v19  ;;  %v934_v37 = vpop.xlane.xlu1 %933  ;;  %1039 = vmax.xlane.f32.xlu0 %v5104_v9 }
 0x4bb   :  { %vm960_vm15 = vcmp.eq.f32.partialorder %v4608_v42, %v934_v37  ;;  %v932_v30 = vpop.xlane.xlu0 %931 }
 0x4bc   :  { %v3179_v17 = vsel %vm960_vm15, 1.0, %v4244_v1  ;;  %vm959_vm0 = vcmp.eq.f32.partialorder %v4608_v42, %v932_v30  ;;  %v5114_v16 = vsel %vm960_vm15, -3.4028235e+38, %v4906_v32 }
 0x4bd   :  { %v5117_v6 = vadd.f32 %v3179_v17, %v4912_v52  ;;  %v3178_v31 = vsel %vm959_vm0, 1.0, %v4244_v1  ;;  %1045 = vmax.xlane.f32.xlu1 %v5114_v16  ;;  %v5122_v19 = vsel %vm959_vm0, -3.4028235e+38, %v4917_v35 }
 0x4be   :  { %v5125_v56 = vadd.f32 %v3178_v31, %v4919_v54  ;;  %v938_v57 = vpop.xlane.xlu1 %937  ;;  %1043 = vmax.xlane.f32.xlu0 %v5122_v19 }
 0x4bf   :  { %vm962_vm3 = vcmp.eq.f32.partialorder %v4608_v42, %v938_v57  ;;  %v936_v32 = vpop.xlane.xlu0 %935 }
 0x4c0   :  { %v3181_v61 = vsel %vm962_vm3, 1.0, %v4244_v1  ;;  %vm961_vm5 = vcmp.eq.f32.partialorder %v4608_v42, %v936_v32  ;;  %v5132_v52 = vsel %vm962_vm3, -3.4028235e+38, %v4930_v40 }
 0x4c1   :  { %v5135_v28 = vadd.f32 %v3181_v61, %v4936_v39  ;;  %v3180_v35 = vsel %vm961_vm5, 1.0, %v4244_v1  ;;  %1049 = vmax.xlane.f32.xlu1 %v5132_v52  ;;  %v5140_v54 = vsel %vm961_vm5, -3.4028235e+38, %v4941_v41 }
 0x4c2   :  { %v5143_v43 = vadd.f32 %v3180_v35, %v4943_v60  ;;  %v942_v51 = vpop.xlane.xlu1 %941  ;;  %1047 = vmax.xlane.f32.xlu0 %v5140_v54 }
 0x4c3   :  { %vm964_vm1 = vcmp.eq.f32.partialorder %v4608_v42, %v942_v51  ;;  %v940_v40 = vpop.xlane.xlu0 %939 }
 0x4c4   :  { %v3183_v62 = vsel %vm964_vm1, 1.0, %v4244_v1  ;;  %vm963_vm4 = vcmp.eq.f32.partialorder %v4608_v42, %v940_v40  ;;  %v5150_v39 = vsel %vm964_vm1, -3.4028235e+38, %v4954_v49 }
 0x4c5   :  { %v5153_v7 = vadd.f32 %v3183_v62, %v4960_v5  ;;  %v3182_v41 = vsel %vm963_vm4, 1.0, %v4244_v1  ;;  %1053 = vmax.xlane.f32.xlu1 %v5150_v39  ;;  %v5158_v60 = vsel %vm963_vm4, -3.4028235e+38, %v4965_v44 }
 0x4c6   :  { %v5161_v33 = vadd.f32 %v3182_v41, %v4967_v29  ;;  %v946_v12 = vpop.xlane.xlu1 %945  ;;  %1051 = vmax.xlane.f32.xlu0 %v5158_v60 }
 0x4c7   :  { %vm966_vm6 = vcmp.eq.f32.partialorder %v4608_v42, %v946_v12  ;;  %v944_v49 = vpop.xlane.xlu0 %943 }
 0x4c8   :  { %v3185_v26 = vsel %vm966_vm6, 1.0, %v4244_v1  ;;  %vm965_vm7 = vcmp.eq.f32.partialorder %v4608_v42, %v944_v49  ;;  %v5168_v5 = vsel %vm966_vm6, -3.4028235e+38, %v4978_v59 }
 0x4c9   :  { %v5171_v55 = vadd.f32 %v3185_v26, %v4984_v18  ;;  %v3184_v44 = vsel %vm965_vm7, 1.0, %v4244_v1  ;;  %1057 = vmax.xlane.f32.xlu1 %v5168_v5  ;;  %v5176_v29 = vsel %vm965_vm7, -3.4028235e+38, %v4989_v21 }
 0x4ca   :  { %v5179_v45 = vadd.f32 %v3184_v44, %v4991_v27  ;;  %v950_v22 = vpop.xlane.xlu1 %949  ;;  %1055 = vmax.xlane.f32.xlu0 %v5176_v29 }
 0x4cb   :  { %vm968_vm8 = vcmp.eq.f32.partialorder %v4608_v42, %v950_v22  ;;  %v948_v59 = vpop.xlane.xlu0 %947 }
 0x4cc   :  { %v3187_v47 = vsel %vm968_vm8, 1.0, %v4244_v1  ;;  %vm967_vm9 = vcmp.eq.f32.partialorder %v4608_v42, %v948_v59  ;;  %v5186_v18 = vsel %vm968_vm8, -3.4028235e+38, %v5002_v4 }
 0x4cd   :  { %v5189_v63 = vadd.f32 %v3187_v47, %v5008_v53  ;;  %v3186_v21 = vsel %vm967_vm9, 1.0, %v4244_v1  ;;  %1061 = vmax.xlane.f32.xlu1 %v5186_v18  ;;  %v5194_v27 = vsel %vm967_vm9, -3.4028235e+38, %v5013_v48 }
 0x4ce   :  { %v5197_v23 = vadd.f32 %v3186_v21, %v5015_v36  ;;  %v954_v25 = vpop.xlane.xlu1 %953  ;;  %1059 = vmax.xlane.f32.xlu0 %v5194_v27  ;;  %v55_v21 = vld [vmem:[#allocation5 + $0x8] sm:$0xff] }
 0x4cf   :  { %vm970_vm10 = vcmp.eq.f32.partialorder %v4608_v42, %v954_v25  ;;  %v952_v4 = vpop.xlane.xlu0 %951 }
 0x4d0   :  { %v3189_v37 = vsel %vm970_vm10, 1.0, %v4244_v1  ;;  %vm969_vm11 = vcmp.eq.f32.partialorder %v4608_v42, %v952_v4  ;;  %v5204_v53 = vsel %vm970_vm10, -3.4028235e+38, %v5026_v20 }
 0x4d1   :  { %v5207_v30 = vadd.f32 %v3189_v37, %v5032_v58  ;;  %v3188_v48 = vsel %vm969_vm11, 1.0, %v4244_v1  ;;  %1065 = vmax.xlane.f32.xlu1 %v5204_v53  ;;  %v5212_v36 = vsel %vm969_vm11, -3.4028235e+38, %v5037_v50 }
 0x4d2   :  { %v5215_v17 = vadd.f32 %v3188_v48, %v5039_v46  ;;  %1063 = vmax.xlane.f32.xlu0 %v5212_v36 }
 0x542   :  { %v1038_v31 = vpop.xlane.xlu1 %1037 }
 0x543   :  { %vm1068_vm12 = vcmp.eq.f32.partialorder %v5078_v14, %v1038_v31  ;;  %v1036_v20 = vpop.xlane.xlu0 %1035 }
 0x544   :  { %vm1067_vm13 = vcmp.eq.f32.partialorder %v5086_v34, %v1036_v20  ;;  %v1084_v58 = vsel %vm1068_vm12, %v4608_v42, 128.0 }
 0x545   :  { %1101 = vmin.xlane.f32.xlu1 %v1084_v58  ;;  %v1083_v57 = vsel %vm1067_vm13, %v4608_v42, 128.0 }
 0x546   :  { %v1042_v32 = vpop.xlane.xlu1 %1041  ;;  %1099 = vmin.xlane.f32.xlu0 %v1083_v57 }
 0x547   :  { %vm1070_vm14 = vcmp.eq.f32.partialorder %v5096_v8, %v1042_v32  ;;  %v1040_v50 = vpop.xlane.xlu0 %1039 }
 0x548   :  { %vm1069_vm15 = vcmp.eq.f32.partialorder %v5104_v9, %v1040_v50  ;;  %v1086_v46 = vsel %vm1070_vm14, %v4608_v42, 128.0 }
 0x549   :  { %1105 = vmin.xlane.f32.xlu1 %v1086_v46  ;;  %v1085_v14 = vsel %vm1069_vm15, %v4608_v42, 128.0 }
 0x54a   :  { %v1046_v61 = vpop.xlane.xlu1 %1045  ;;  %1103 = vmin.xlane.f32.xlu0 %v1085_v14 }
 0x54b   :  { %vm1072_vm0 = vcmp.eq.f32.partialorder %v5114_v16, %v1046_v61  ;;  %v1044_v34 = vpop.xlane.xlu0 %1043 }
 0x54c   :  { %vm1071_vm3 = vcmp.eq.f32.partialorder %v5122_v19, %v1044_v34  ;;  %v1088_v35 = vsel %vm1072_vm0, %v4608_v42, 128.0 }
 0x54d   :  { %1109 = vmin.xlane.f32.xlu1 %v1088_v35  ;;  %v1087_v8 = vsel %vm1071_vm3, %v4608_v42, 128.0 }
 0x54e   :  { %v1050_v51 = vpop.xlane.xlu1 %1049  ;;  %1107 = vmin.xlane.f32.xlu0 %v1087_v8 }
 0x54f   :  { %vm1074_vm5 = vcmp.eq.f32.partialorder %v5132_v52, %v1050_v51  ;;  %v1048_v9 = vpop.xlane.xlu0 %1047 }
 0x550   :  { %vm1073_vm1 = vcmp.eq.f32.partialorder %v5140_v54, %v1048_v9  ;;  %v1090_v40 = vsel %vm1074_vm5, %v4608_v42, 128.0 }
 0x551   :  { %1113 = vmin.xlane.f32.xlu1 %v1090_v40  ;;  %v1089_v16 = vsel %vm1073_vm1, %v4608_v42, 128.0 }
 0x552   :  { %v1054_v62 = vpop.xlane.xlu1 %1053  ;;  %1111 = vmin.xlane.f32.xlu0 %v1089_v16 }
 0x553   :  { %vm1076_vm4 = vcmp.eq.f32.partialorder %v5150_v39, %v1054_v62  ;;  %v1052_v19 = vpop.xlane.xlu0 %1051 }
 0x554   :  { %vm1075_vm6 = vcmp.eq.f32.partialorder %v5158_v60, %v1052_v19  ;;  %v1092_v41 = vsel %vm1076_vm4, %v4608_v42, 128.0 }
 0x555   :  { %1117 = vmin.xlane.f32.xlu1 %v1092_v41  ;;  %v1091_v52 = vsel %vm1075_vm6, %v4608_v42, 128.0 }
 0x556   :  { %v1058_v12 = vpop.xlane.xlu1 %1057  ;;  %1115 = vmin.xlane.f32.xlu0 %v1091_v52 }
 0x557   :  { %vm1078_vm7 = vcmp.eq.f32.partialorder %v5168_v5, %v1058_v12  ;;  %v1056_v54 = vpop.xlane.xlu0 %1055 }
 0x558   :  { %vm1077_vm8 = vcmp.eq.f32.partialorder %v5176_v29, %v1056_v54  ;;  %v1094_v49 = vsel %vm1078_vm7, %v4608_v42, 128.0 }
 0x559   :  { %1121 = vmin.xlane.f32.xlu1 %v1094_v49  ;;  %v1093_v39 = vsel %vm1077_vm8, %v4608_v42, 128.0 }
 0x55a   :  { %v1062_v26 = vpop.xlane.xlu1 %1061  ;;  %1119 = vmin.xlane.f32.xlu0 %v1093_v39 }
 0x55b   :  { %vm1080_vm9 = vcmp.eq.f32.partialorder %v5186_v18, %v1062_v26  ;;  %v1060_v60 = vpop.xlane.xlu0 %1059  ;;  %v54_v18 = vld [vmem:[#allocation5] sm:$0xff] }
 0x55c   :  { %vm1079_vm10 = vcmp.eq.f32.partialorder %v5194_v27, %v1060_v60  ;;  %v1096_v44 = vsel %vm1080_vm9, %v4608_v42, 128.0  ;;  %v5250_v27 = vpack.c.bf16 %v55_v21, %v54_v18 }
 0x55d   :  { %1125 = vmin.xlane.f32.xlu1 %v1096_v44  ;;  %v1095_v5 = vsel %vm1079_vm10, %v4608_v42, 128.0 }
 0x55e   :  { %v1066_v22 = vpop.xlane.xlu1 %1065  ;;  %1123 = vmin.xlane.f32.xlu0 %v1095_v5  ;;  %4013 = vmatprep.subr.bf16.mxu1 %v5250_v27 }
 0x55f   :  { %vm1082_vm11 = vcmp.eq.f32.partialorder %v5204_v53, %v1066_v22  ;;  %v1064_v29 = vpop.xlane.xlu0 %1063  ;;  %4015 = vmatpush3.bf16.msra.mxu1 %v5250_v27 }
 0x560   :  { %vm1081_vm12 = vcmp.eq.f32.partialorder %v5212_v36, %v1064_v29  ;;  %v1098_v59 = vsel %vm1082_vm11, %v4608_v42, 128.0 }
 0x561   :  { %1129 = vmin.xlane.f32.xlu1 %v1098_v59  ;;  %v1097_v47 = vsel %vm1081_vm12, %v4608_v42, 128.0 }
 0x562   :  { %1127 = vmin.xlane.f32.xlu0 %v1097_v47 }
 0x5d2   :  { %v1102_v25 = vpop.xlane.xlu1 %1101 }
 0x5d3   :  { %vm1132_vm13 = vcmp.eq.f32.partialorder %v4608_v42, %v1102_v25  ;;  %v1100_v4 = vpop.xlane.xlu0 %1099 }
 0x5d4   :  { %v3191_v37 = vsel %vm1132_vm13, 1.0, %v4244_v1  ;;  %vm1131_vm14 = vcmp.eq.f32.partialorder %v4608_v42, %v1100_v4 }
 0x5d5   :  { %v1180_v53 = vadd.f32 %v3191_v37, %v5081_v15  ;;  %v3190_v48 = vsel %vm1131_vm14, 1.0, %v4244_v1  ;;  %vm6355_vm14 = vmmov 0  }
 0x5d6   :  { %v1179_v36 = vadd.f32 %v3190_v48, %v5089_v3  ;;  %v1106_v31 = vpop.xlane.xlu1 %1105 }
 0x5d7   :  { %vm1134_vm15 = vcmp.eq.f32.partialorder %v4608_v42, %v1106_v31  ;;  %v1104_v20 = vpop.xlane.xlu0 %1103  ;;  %v1196_v32 = vmul.f32 0.25, %v1180_v53 }
 0x5d8   :  { %v3193_v58 = vsel %vm1134_vm15, 1.0, %v4244_v1  ;;  %vm1133_vm0 = vcmp.eq.f32.partialorder %v4608_v42, %v1104_v20  ;;  %v1195_v57 = vmul.f32 0.25, %v1179_v36  ;;  %vm6356_vm15 = vcmask 130048  }
 0x5d9   :  { %v1182_v50 = vadd.f32 %v3193_v58, %v5099_v24  ;;  %v3192_v46 = vsel %vm1133_vm0, 1.0, %v4244_v1  ;;  %vm6357_vm0 = vmmov %vm6356_vm15 }
 0x5da   :  { %v1181_v15 = vadd.f32 %v3192_v46, %v5107_v38  ;;  %v1110_v14 = vpop.xlane.xlu1 %1109  ;;  %3673 = vmatprep.mubr.f32.mxu0 %v1195_v57 }
 0x5db   :  { %vm1136_vm3 = vcmp.eq.f32.partialorder %v4608_v42, %v1110_v14  ;;  %3674 = vmatmul.mubr.f32.vlgmr.msra.gmra.mrb[16].mxu0 %v1196_v32  ;;  %v1108_v3 = vpop.xlane.xlu0 %1107  ;;  %v1198_v24 = vmul.f32 0.25, %v1182_v50  ;;  %v5304_v32 = vld [vmem:[#allocation2 + $0x80] sm:$0xff]  ;;  %v5306_v50 = vld [vmem:[#allocation2 + $0x88] sm:$0xff]  ;;  %v5322_v14 = vld [vmem:[#allocation2 + $0x90] sm:$0xff] }
 0x5dc   :  { %v3195_v61 = vsel %vm1136_vm3, 1.0, %v4244_v1  ;;  %vm1135_vm5 = vcmp.eq.f32.partialorder %v4608_v42, %v1108_v3  ;;  %v1197_v34 = vmul.f32 0.25, %v1181_v15  ;;  %v1590_v46 = vmul.f32 %v5306_v50, %v5306_v50  ;;  %v5324_v3 = vld [vmem:[#allocation2 + $0x98] sm:$0xff]  ;;  %vm6358_vm3 = vmmov %vm6357_vm0 }
 0x5dd   :  { %v1184_v35 = vadd.f32 %v3195_v61, %v5117_v6  ;;  %v3194_v8 = vsel %vm1135_vm5, 1.0, %v4244_v1  ;;  %v1591_v61 = vmul.f32 %v5322_v14, %v5322_v14  ;;  %vm6359_vm5 = vmmov %vm6357_vm0 }
 0x5de   :  { %v1183_v51 = vadd.f32 %v3194_v8, %v5125_v56  ;;  %v1114_v9 = vpop.xlane.xlu1 %1113  ;;  %3676 = vmatprep.mubr.f32.mxu0 %v1197_v34  ;;  %v1592_v34 = vmul.f32 %v5324_v3, %v5324_v3  ;;  %v5333_v8 = vld [vmem:[#allocation2 + $0xa0] sm:$0xff] }
 0x5df   :  { %vm1138_vm1 = vcmp.eq.f32.partialorder %v4608_v42, %v1114_v9  ;;  %3677 = vmatmul.mubr.f32.gmra.mrb[18].mxu0 %v1198_v24  ;;  %v1112_v38 = vpop.xlane.xlu0 %1111  ;;  %v1200_v19 = vmul.f32 0.25, %v1184_v35  ;;  %v5335_v24 = vld [vmem:[#allocation2 + $0xa8] sm:$0xff] }
 0x5e0   :  { %v3197_v40 = vsel %vm1138_vm1, 1.0, %v4244_v1  ;;  %vm1137_vm4 = vcmp.eq.f32.partialorder %v4608_v42, %v1112_v38  ;;  %v1199_v16 = vmul.f32 0.25, %v1183_v51  ;;  %v4069_v35 = vpack.c.bf16 %v1592_v34, %v1591_v61  ;;  %vm6360_vm1 = vmmov %vm6357_vm0 }
 0x5e1   :  { %v1186_v62 = vadd.f32 %v3197_v40, %v5135_v28  ;;  %v3196_v6 = vsel %vm1137_vm4, 1.0, %v4244_v1  ;;  %v1593_v51 = vmul.f32 %v5333_v8, %v5333_v8  ;;  %v1594_v9 = vmul.f32 %v5335_v24, %v5335_v24  ;;  %v5344_v40 = vld [vmem:[#allocation2 + $0xb0] sm:$0xff]  ;;  %vm6361_vm4 = vmmov %vm6357_vm0 }
 0x5e2   :  { %v1185_v41 = vadd.f32 %v3196_v6, %v5143_v43  ;;  %v1118_v52 = vpop.xlane.xlu1 %1117  ;;  %3679 = vmatprep.mubr.f32.mxu0 %v1199_v16  ;;  %v5346_v16 = vld [vmem:[#allocation2 + $0xb8] sm:$0xff] }
 0x5e3   :  { %vm1140_vm6 = vcmp.eq.f32.partialorder %v4608_v42, %v1118_v52  ;;  %3680 = vmatmul.mubr.f32.gmra.mrb[20].mxu0 %v1200_v19  ;;  %v1116_v56 = vpop.xlane.xlu0 %1115  ;;  %v1202_v39 = vmul.f32 0.25, %v1186_v62  ;;  %v4073_v38 = vpack.c.bf16 %v1594_v9, %v1593_v51  ;;  %v1595_v62 = vmul.f32 %v5344_v40, %v5344_v40  ;;  %v5356_v52 = vld [vmem:[#allocation2 + $0xc8] sm:$0xff] }
 0x5e4   :  { %v3199_v12 = vsel %vm1140_vm6, 1.0, %v4244_v1  ;;  %vm1139_vm7 = vcmp.eq.f32.partialorder %v4608_v42, %v1116_v56  ;;  %v1201_v54 = vmul.f32 0.25, %v1185_v41  ;;  %v1596_v6 = vmul.f32 %v5346_v16, %v5346_v16  ;;  %v5354_v41 = vld [vmem:[#allocation2 + $0xc0] sm:$0xff]  ;;  %vm6362_vm6 = vmmov %vm6357_vm0 }
 0x5e5   :  { %v1188_v49 = vadd.f32 %v3199_v12, %v5153_v7  ;;  %v3198_v28 = vsel %vm1139_vm7, 1.0, %v4244_v1  ;;  %v1597_v56 = vmul.f32 %v5354_v41, %v5354_v41  ;;  %v1598_v12 = vmul.f32 %v5356_v52, %v5356_v52  ;;  %vm6363_vm7 = vmmov %vm6357_vm0 }
 0x5e6   :  { %v1187_v26 = vadd.f32 %v3198_v28, %v5161_v33  ;;  %v1122_v60 = vpop.xlane.xlu1 %1121  ;;  %3682 = vmatprep.mubr.f32.mxu0 %v1201_v54  ;;  %v4077_v19 = vpack.c.bf16 %v1596_v6, %v1595_v62  ;;  %v5365_v28 = vld [vmem:[#allocation2 + $0xd8] sm:$0xff] }
 0x5e7   :  { %vm1142_vm8 = vcmp.eq.f32.partialorder %v4608_v42, %v1122_v60  ;;  %3683 = vmatmul.mubr.f32.gmra.mrb[22].mxu0 %v1202_v39  ;;  %v1120_v43 = vpop.xlane.xlu0 %1119  ;;  %v1204_v29 = vmul.f32 0.25, %v1188_v49  ;;  %v4081_v54 = vpack.c.bf16 %v1598_v12, %v1597_v56  ;;  %v5363_v49 = vld [vmem:[#allocation2 + $0xd0] sm:$0xff] }
 0x5e8   :  { %v3201_v44 = vsel %vm1142_vm8, 1.0, %v4244_v1  ;;  %vm1141_vm9 = vcmp.eq.f32.partialorder %v4608_v42, %v1120_v43  ;;  %v1203_v5 = vmul.f32 0.25, %v1187_v26  ;;  %v1599_v39 = vmul.f32 %v5363_v49, %v5363_v49  ;;  %v5374_v43 = vld [vmem:[#allocation2 + $0xe0] sm:$0xff]  ;;  %vm6364_vm8 = vmmov %vm6357_vm0 }
 0x5e9   :  { %v1190_v22 = vadd.f32 %v3201_v44, %v5171_v55  ;;  %v3200_v7 = vsel %vm1141_vm9, 1.0, %v4244_v1  ;;  %v1600_v26 = vmul.f32 %v5365_v28, %v5365_v28  ;;  %v5376_v44 = vld [vmem:[#allocation2 + $0xe8] sm:$0xff]  ;;  %vm6365_vm9 = vmmov %vm6357_vm0 }
 0x5ea   :  { %v1189_v59 = vadd.f32 %v3200_v7, %v5179_v45  ;;  %v1126_v47 = vpop.xlane.xlu1 %1125  ;;  %3685 = vmatprep.mubr.f32.mxu0 %v1203_v5  ;;  %v1601_v5 = vmul.f32 %v5374_v43, %v5374_v43 }
 0x5eb   :  { %vm1144_vm10 = vcmp.eq.f32.partialorder %v4608_v42, %v1126_v47  ;;  %3686 = vmatmul.mubr.f32.gmra.mrb[24].mxu0 %v1204_v29  ;;  %v1124_v33 = vpop.xlane.xlu0 %1123  ;;  %v1206_v4 = vmul.f32 0.25, %v1190_v22  ;;  %v4085_v60 = vpack.c.bf16 %v1600_v26, %v1599_v39  ;;  %v1602_v22 = vmul.f32 %v5376_v44, %v5376_v44  ;;  %v5385_v29 = vld [vmem:[#allocation2 + $0xf0] sm:$0xff] }
 0x5ec   :  { %v3203_v18 = vsel %vm1144_vm10, 1.0, %v4244_v1  ;;  %vm1143_vm11 = vcmp.eq.f32.partialorder %v4608_v42, %v1124_v33  ;;  %v1205_v21 = vmul.f32 0.25, %v1189_v59  ;;  %v5387_v59 = vld [vmem:[#allocation2 + $0xf8] sm:$0xff]  ;;  %v1603_v47 = vmul.f32 %v5385_v29, %v5385_v29  ;;  %vm6366_vm10 = vmmov %vm6357_vm0 }
 0x5ed   :  { %v1192_v25 = vadd.f32 %v3203_v18, %v5189_v63  ;;  %v3202_v55 = vsel %vm1143_vm11, 1.0, %v4244_v1  ;;  %v4089_v7 = vpack.c.bf16 %v1602_v22, %v1601_v5  ;;  %v1604_v33 = vmul.f32 %v5387_v59, %v5387_v59  ;;  %vm6367_vm11 = vmmov %vm6357_vm0 }
 0x5ee   :  { %v1191_v37 = vadd.f32 %v3202_v55, %v5197_v23  ;;  %v1130_v53 = vpop.xlane.xlu1 %1129  ;;  %3688 = vmatprep.mubr.f32.mxu0 %v1205_v21  ;;  %v1801_v21 = vsel %vm6357_vm0, %v1590_v46, 0.0  ;;  %v1804_v55 = vsel %vm6360_vm1, %v1591_v61, 0.0  ;;  %vm6374_vm1 = vmmov %vm6357_vm0 }
 0x5ef   :  { %vm1146_vm12 = vcmp.eq.f32.partialorder %v4608_v42, %v1130_v53  ;;  %3689 = vmatmul.mubr.f32.gmra.mrb[26].mxu0 %v1206_v4  ;;  %v1128_v45 = vpop.xlane.xlu0 %1127  ;;  %v1208_v20 = vmul.f32 0.25, %v1192_v25  ;;  %v4093_v18 = vpack.c.bf16 %v1604_v33, %v1603_v47  ;;  %1802 = vadd.xlane.f32.xlu1 %v1801_v21  ;;  %v1807_v25 = vsel %vm6359_vm5, %v1592_v34, 0.0  ;;  %vm6373_vm5 = vmmov %vm6357_vm0 }
 0x5f0   :  { %v3205_v48 = vsel %vm1146_vm12, 1.0, %v4244_v1  ;;  %vm1145_vm13 = vcmp.eq.f32.partialorder %v4608_v42, %v1128_v45  ;;  %v1207_v36 = vmul.f32 0.25, %v1191_v37  ;;  %v1813_v4 = vsel %vm6361_vm4, %v1594_v9, 0.0  ;;  %vm6368_vm12 = vmmov %vm6357_vm0 }
 0x5f1   :  { %v1194_v31 = vadd.f32 %v3205_v48, %v5207_v30  ;;  %v3204_v63 = vsel %vm1145_vm13, 1.0, %v4244_v1  ;;  %v5310_v30 = vpack.c.bf16 %v5306_v50, %v5304_v32  ;;  %v1810_v37 = vsel %vm6362_vm6, %v1593_v51, 0.0  ;;  %vm6369_vm13 = vmmov %vm6357_vm0 }
 0x5f2   :  { %v1193_v58 = vadd.f32 %v3204_v63, %v5215_v17  ;;  %3691 = vmatprep.mubr.f32.mxu0 %v1207_v36  ;;  %v1589_v17 = vmul.f32 %v5304_v32, %v5304_v32  ;;  %v1825_v53 = vsel %vm6365_vm9, %v1598_v12, 0.0  ;;  %v1822_v45 = vsel %vm6366_vm10, %v1597_v56, 0.0  ;;  %vm6375_vm4 = vmmov %vm6357_vm0 }
 0x5f3   :  { %3692 = vmatmul.mubr.f32.gmra.mrb[28].mxu0 %v1208_v20  ;;  %v1210_v57 = vmul.f32 0.25, %v1194_v31  ;;  %4018 = vmatprep.subr.msk.bf16.mxu1 %vm4321_vm2, %v5310_v30  ;;  %v1831_v48 = vsel %vm6367_vm11, %v1600_v26, 0.0  ;;  %v1828_v36 = vsel %vm6368_vm12, %v1599_v39, 0.0  ;;  %v1837_v31 = vsel %vm6369_vm13, %v1602_v22, 0.0  ;;  %vm6376_vm6 = vmmov %vm6357_vm0 }
 0x5f4   :  { %v1209_v23 = vmul.f32 0.25, %v1193_v58  ;;  %v4065_v15 = vpack.c.bf16 %v1590_v46, %v1589_v17  ;;  %1808 = vadd.xlane.f32.xlu1 %v1807_v25  ;;  %v1840_v58 = vsel %vm6357_vm0, %v1603_v47, 0.0  ;;  %vm6379_vm9 = vmmov %vm6357_vm0  ;;  %v4040_v39 = vpack.c.bf16 %v5356_v52, %v5354_v41 }
 0x5f5   :  { %vm6380_vm10 = vmmov %vm6357_vm0  ;;  %v4052_v22 = vpack.c.bf16 %v5376_v44, %v5374_v43 }
 0x5f6   :  { %3694 = vmatprep.mubr.f32.mxu0 %v1209_v23  ;;  %4067 = vmatpush3.bf16.xpose.msk.msra.mxu0 %vm4321_vm2, %v4065_v15  ;;  %vm6381_vm11 = vmmov %vm6357_vm0 }
 0x5f7   :  { %3695 = vmatmul.mubr.f32.gmra.mrb[30].mxu0 %v1210_v57  ;;  %4068 = vmatprep.subr.bf16.mxu0 %v4242_v0  ;;  %vm6382_vm12 = vmmov %vm6357_vm0 }
 0x5f8   :  { %3813 = vmatprep.mubr.msk.f32.mxu0 %vm6355_vm14, %v4244_v1  ;;  %1814 = vadd.xlane.f32.xlu1 %v1813_v4  ;;  %vm6370_vm14 = vmmov %vm6357_vm0 }
 0x5f9   :  { %v1834_v63 = vsel %vm6370_vm14, %v1601_v5, 0.0  ;;  %vm6383_vm13 = vmmov %vm6357_vm0  ;;  %v4046_v5 = vpack.c.bf16 %v5365_v28, %v5363_v49 }
 0x5fa   :  { %vm6384_vm14 = vmmov %vm6357_vm0 }
 0x5fe   :  { %4071 = vmatpush3.bf16.xpose.msk.msra.mxu0 %vm4321_vm2, %v4069_v35  ;;  %v4028_v35 = vpack.c.bf16 %v5335_v24, %v5333_v8 }
 0x5ff   :  { %4072 = vmatprep.subr.bf16.mxu0 %v4242_v0 }
 0x606   :  { %4075 = vmatpush3.bf16.xpose.msk.msra.mxu0 %vm4321_vm2, %v4073_v38 }
 0x607   :  { %4076 = vmatprep.subr.bf16.mxu0 %v4242_v0 }
 0x60e   :  { %4079 = vmatpush3.bf16.xpose.msk.msra.mxu0 %vm4321_vm2, %v4077_v19 }
 0x60f   :  { %4080 = vmatprep.subr.bf16.mxu0 %v4242_v0 }
 0x616   :  { %4083 = vmatpush3.bf16.xpose.msk.msra.mxu0 %vm4321_vm2, %v4081_v54 }
 0x617   :  { %4084 = vmatprep.subr.bf16.mxu0 %v4242_v0 }
 0x61e   :  { %4087 = vmatpush3.bf16.xpose.msk.msra.mxu0 %vm4321_vm2, %v4085_v60 }
 0x61f   :  { %4088 = vmatprep.subr.bf16.mxu0 %v4242_v0 }
 0x626   :  { %4091 = vmatpush3.bf16.xpose.msk.msra.mxu0 %vm4321_vm2, %v4089_v7 }
 0x627   :  { %4092 = vmatprep.subr.bf16.mxu0 %v4242_v0  ;;  %v1798_v0 = vsel %vm6358_vm3, %v1589_v17, 0.0  ;;  %v4022_v17 = vpack.c.bf16 %v5324_v3, %v5322_v14  ;;  %vm6372_vm3 = vmmov %vm6357_vm0 }
 0x628   :  { %1799 = vadd.xlane.f32.xlu0 %v1798_v0 }
 0x62c   :  { %1805 = vadd.xlane.f32.xlu0 %v1804_v55 }
 0x62e   :  { %4095 = vmatpush3.bf16.xpose.msk.msra.mxu0 %vm4321_vm2, %v4093_v18 }
 0x62f   :  { %4129 = vmatprep.subr.bf16.mxu0 %v5250_v27 }
 0x630   :  { %1811 = vadd.xlane.f32.xlu0 %v1810_v37 }
 0x635   :  { %3814 = vmatmul.mubr.msk.f32.vlgmr.msra.gmra.mrb[32].mxu0 %vm6356_vm15, %v4245_v11  ;;  %v1819_v11 = vsel %vm6363_vm7, %v1596_v6, 0.0  ;;  %vm6371_vm15 = vmmov %vm6357_vm0  ;;  %v4034_v6 = vpack.c.bf16 %v5346_v16, %v5344_v40 }
 0x636   :  { %4131 = vmatpush3.bf16.msra.mxu0 %v5250_v27  ;;  %v1816_v27 = vsel %vm6364_vm8, %v1595_v62, 0.0  ;;  %1820 = vadd.xlane.f32.xlu1 %v1819_v11  ;;  %v1843_v20 = vsel %vm6371_vm15, %v1604_v33, 0.0  ;;  %vm6377_vm7 = vmmov %vm6357_vm0 }
 0x637   :  { %1817 = vadd.xlane.f32.xlu0 %v1816_v27  ;;  %vm6378_vm8 = vmmov %vm6357_vm0 }
 0x638   :  { %vm6385_vm15 = vmmov %vm6357_vm0 }
 0x63a   :  { %1826 = vadd.xlane.f32.xlu1 %v1825_v53 }
 0x63b   :  { %1823 = vadd.xlane.f32.xlu0 %v1822_v45 }
 0x63e   :  { %1832 = vadd.xlane.f32.xlu1 %v1831_v48 }
 0x63f   :  { %1829 = vadd.xlane.f32.xlu0 %v1828_v36 }
 0x642   :  { %1838 = vadd.xlane.f32.xlu1 %v1837_v31 }
 0x643   :  { %1835 = vadd.xlane.f32.xlu0 %v1834_v63 }
 0x646   :  { %1844 = vadd.xlane.f32.xlu1 %v1843_v20 }
 0x647   :  { %1841 = vadd.xlane.f32.xlu0 %v1840_v58 }
 0x67c   :  { %v1803_v20 = vpop.xlane.xlu1 %1802 }
 0x6ae   :  { %v3675_v23 = vpop.f32.mrb[16].mxu0 }
 0x6af   :  { %v1277_v57 = vpop.f32.mrb[17].mxu0 }
 0x6b0   :  { %3701 = vmatprep.mubr.msk.f32.mxu1 %vm6372_vm3, %v1277_v57  ;;  %vm6386_vm3 = vmmov %vm6357_vm0 }
 0x6b1   :  { %3702 = vmatmul.mubr.msk.f32.vlgmr.msra.gmra.mrb[2].mxu1 %vm6373_vm5, %v3675_v23  ;;  %vm6387_vm5 = vmmov %vm6357_vm0  ;;  %v1809_v23 = vpop.xlane.xlu1 %1808 }
 0x6b2   :  { %4021 = vmatpush3.bf16.xpose.msk.msra.mxu1 %vm4321_vm2, %v5310_v30  ;;  %v3678_v46 = vpop.f32.mrb[18].mxu0 }
 0x6b3   :  { %v1287_v15 = vpop.f32.mrb[19].mxu0  ;;  %4024 = vmatprep.subr.msk.bf16.mxu1 %vm4321_vm2, %v4022_v17 }
 0x6b4   :  { %3704 = vmatprep.mubr.msk.f32.mxu1 %vm6374_vm1, %v1287_v15  ;;  %vm6388_vm1 = vmmov %vm6357_vm0 }
 0x6b5   :  { %3705 = vmatmul.mubr.msk.f32.gmra.mrb[4].mxu1 %vm6375_vm4, %v3678_v46  ;;  %vm6389_vm4 = vmmov %vm6357_vm0  ;;  %v1800_v58 = vpop.xlane.xlu0 %1799 }
 0x6b6   :  { %v3681_v61 = vpop.f32.mrb[20].mxu0 }
 0x6b7   :  { %v1297_v34 = vpop.f32.mrb[21].mxu0 }
 0x6b8   :  { %3707 = vmatprep.mubr.msk.f32.mxu1 %vm6376_vm6, %v1297_v34  ;;  %vm6390_vm6 = vmmov %vm6357_vm0 }
 0x6b9   :  { %3708 = vmatmul.mubr.msk.f32.gmra.mrb[6].mxu1 %vm6377_vm7, %v3681_v61  ;;  %vm6391_vm7 = vmmov %vm6357_vm0  ;;  %v1806_v57 = vpop.xlane.xlu0 %1805 }
 0x6ba   :  { %4027 = vmatpush3.bf16.xpose.msk.msra.mxu1 %vm4321_vm2, %v4022_v17  ;;  %v3684_v51 = vpop.f32.mrb[22].mxu0 }
 0x6bb   :  { %v1307_v9 = vpop.f32.mrb[23].mxu0  ;;  %4030 = vmatprep.subr.msk.bf16.mxu1 %vm4321_vm2, %v4028_v35 }
 0x6bc   :  { %3710 = vmatprep.mubr.msk.f32.mxu1 %vm6378_vm8, %v1307_v9  ;;  %vm6393_vm8 = vmmov %vm6357_vm0 }
 0x6bd   :  { %3711 = vmatmul.mubr.msk.f32.gmra.mrb[8].mxu1 %vm6379_vm9, %v3684_v51  ;;  %vm6394_vm9 = vmmov %vm6357_vm0  ;;  %v1812_v46 = vpop.xlane.xlu0 %1811 }
 0x6be   :  { %v3687_v38 = vpop.f32.mrb[24].mxu0 }
 0x6bf   :  { %v1317_v62 = vpop.f32.mrb[25].mxu0 }
 0x6c0   :  { %3713 = vmatprep.mubr.msk.f32.mxu1 %vm6380_vm10, %v1317_v62  ;;  %vm6395_vm10 = vmmov %vm6357_vm0 }
 0x6c1   :  { %3714 = vmatmul.mubr.msk.f32.gmra.mrb[10].mxu1 %vm6381_vm11, %v3687_v38  ;;  %vm6396_vm11 = vmmov %vm6357_vm0 }
 0x6c2   :  { %4033 = vmatpush3.bf16.xpose.msk.msra.mxu1 %vm4321_vm2, %v4028_v35  ;;  %v3690_v19 = vpop.f32.mrb[26].mxu0 }
 0x6c3   :  { %v1327_v56 = vpop.f32.mrb[27].mxu0  ;;  %4036 = vmatprep.subr.msk.bf16.mxu1 %vm4321_vm2, %v4034_v6 }
 0x6c4   :  { %3716 = vmatprep.mubr.msk.f32.mxu1 %vm6382_vm12, %v1327_v56  ;;  %vm6397_vm12 = vmmov %vm6357_vm0 }
 0x6c5   :  { %3717 = vmatmul.mubr.msk.f32.gmra.mrb[12].mxu1 %vm6383_vm13, %v3690_v19  ;;  %vm6398_vm13 = vmmov %vm6357_vm0 }
 0x6c6   :  { %v3693_v12 = vpop.f32.mrb[28].mxu0 }
 0x6c7   :  { %v1337_v54 = vpop.f32.mrb[29].mxu0 }
 0x6c8   :  { %3719 = vmatprep.mubr.msk.f32.mxu1 %vm6384_vm14, %v1337_v54  ;;  %vm6399_vm14 = vmmov %vm6357_vm0  ;;  %v1818_v54 = vpop.xlane.xlu0 %1817 }
 0x6c9   :  { %3720 = vmatmul.mubr.msk.f32.gmra.mrb[14].mxu1 %vm6385_vm15, %v3693_v12  ;;  %vm6400_vm15 = vmmov %vm6357_vm0 }
 0x6ca   :  { %4039 = vmatpush3.bf16.xpose.msk.msra.mxu1 %vm4321_vm2, %v4034_v6  ;;  %v3696_v26 = vpop.f32.mrb[30].mxu0 }
 0x6cb   :  { %v1347_v60 = vpop.f32.mrb[31].mxu0  ;;  %4042 = vmatprep.subr.msk.bf16.mxu1 %vm4321_vm2, %v4040_v39 }
 0x6cc   :  { %3722 = vmatprep.mubr.msk.f32.mxu1 %vm6357_vm0, %v1347_v60 }
 0x6cd   :  { %3723 = vmatmul.mubr.msk.f32.gmra.mrb[16].mxu1 %vm6386_vm3, %v3696_v26  ;;  %vm6401_vm3 = vmmov %vm6357_vm0 }
 0x6ce   :  { %3757 = vmatprep.mubr.msk.f32.mxu1 %vm6387_vm5, %v5304_v32  ;;  %v4058_v32 = vpack.c.bf16 %v5387_v59, %v5385_v29  ;;  %vm6343_vm5 = vcmask 261120  }
 0x6d2   :  { %4045 = vmatpush3.bf16.xpose.msk.msra.mxu1 %vm4321_vm2, %v4040_v39 }
 0x6d3   :  { %4048 = vmatprep.subr.msk.bf16.mxu1 %vm4321_vm2, %v4046_v5 }
 0x6da   :  { %4051 = vmatpush3.bf16.xpose.msk.msra.mxu1 %vm4321_vm2, %v4046_v5 }
 0x6db   :  { %4054 = vmatprep.subr.msk.bf16.mxu1 %vm4321_vm2, %v4052_v22 }
 0x6e2   :  { %4057 = vmatpush3.bf16.xpose.msk.msra.mxu1 %vm4321_vm2, %v4052_v22 }
 0x6e3   :  { %4060 = vmatprep.subr.msk.bf16.mxu1 %vm4321_vm2, %v4058_v32 }
 0x6ea   :  { %4063 = vmatpush3.bf16.xpose.msk.msra.mxu1 %vm4321_vm2, %v4058_v32  ;;  %vm6392_vm2 = vmmov %vm6357_vm0 }
 0x6eb   :  { %4097 = vmatprep.subr.bf16.mxu1 %v5310_v30 }
 0x6f1   :  { %3758 = vmatmul.mubr.msk.f32.vlgmr.msra.gmra.mrb[18].mxu1 %vm6388_vm1, %v5306_v50 }
 0x6f2   :  { %3760 = vmatprep.mubr.msk.f32.mxu1 %vm6389_vm4, %v5322_v14  ;;  %4099 = vmatpush3.bf16.msra.mxu1 %v5310_v30  ;;  %v3206_v30 = vld [vmem:[#allocation7] ss:$0 sm:$0xff] }
 0x6f3   :  { %4101 = vmatprep.subr.bf16.mxu1 %v4022_v17 }
 0x6f5   :  { %3761 = vmatmul.mubr.msk.f32.gmra.mrb[20].mxu1 %vm6390_vm6, %v5324_v3 }
 0x6f6   :  { %3763 = vmatprep.mubr.msk.f32.mxu1 %vm6391_vm7, %v5333_v8  ;;  %4103 = vmatpush3.bf16.msra.mxu1 %v4022_v17  ;;  %v1815_v17 = vpop.xlane.xlu1 %1814 }
 0x6f7   :  { %4105 = vmatprep.subr.bf16.mxu1 %v4028_v35 }
 0x6f9   :  { %3764 = vmatmul.mubr.msk.f32.gmra.mrb[22].mxu1 %vm6392_vm2, %v5335_v24 }
 0x6fa   :  { %3766 = vmatprep.mubr.msk.f32.mxu1 %vm6393_vm8, %v5344_v40  ;;  %4107 = vmatpush3.bf16.msra.mxu1 %v4028_v35 }
 0x6fb   :  { %4109 = vmatprep.subr.bf16.mxu1 %v4034_v6 }
 0x6fd   :  { %3767 = vmatmul.mubr.msk.f32.gmra.mrb[24].mxu1 %vm6394_vm9, %v5346_v16 }
 0x6fe   :  { %3769 = vmatprep.mubr.msk.f32.mxu1 %vm6395_vm10, %v5354_v41  ;;  %4111 = vmatpush3.bf16.msra.mxu1 %v4034_v6  ;;  %v1821_v6 = vpop.xlane.xlu1 %1820 }
 0x6ff   :  { %4113 = vmatprep.subr.bf16.mxu1 %v4040_v39 }
 0x701   :  { %3770 = vmatmul.mubr.msk.f32.gmra.mrb[26].mxu1 %vm6396_vm11, %v5356_v52 }
 0x702   :  { %3772 = vmatprep.mubr.msk.f32.mxu1 %vm6397_vm12, %v5363_v49  ;;  %4115 = vmatpush3.bf16.msra.mxu1 %v4040_v39 }
 0x703   :  { %4117 = vmatprep.subr.bf16.mxu1 %v4046_v5 }
 0x705   :  { %3773 = vmatmul.mubr.msk.f32.gmra.mrb[28].mxu1 %vm6398_vm13, %v5365_v28 }
 0x706   :  { %3775 = vmatprep.mubr.msk.f32.mxu1 %vm6399_vm14, %v5374_v43  ;;  %4119 = vmatpush3.bf16.msra.mxu1 %v4046_v5 }
 0x707   :  { %4121 = vmatprep.subr.bf16.mxu1 %v4052_v22 }
 0x708   :  { %v1960_v2 = vpop.f32.mrb[32].mxu0 }
 0x709   :  { %3776 = vmatmul.mubr.msk.f32.gmra.mrb[30].mxu1 %vm6400_vm15, %v5376_v44  ;;  %v3815_v50 = vpop.f32.mrb[33].mxu0  ;;  %v5531_v35 = vrot.slane %v1960_v2, %v489_v13 }
 0x70a   :  { %3778 = vmatprep.mubr.msk.f32.mxu1 %vm6357_vm0, %v5385_v29  ;;  %4123 = vmatpush3.bf16.msra.mxu1 %v4052_v22 }
 0x70b   :  { %4125 = vmatprep.subr.bf16.mxu1 %v4058_v32 }
 0x70d   :  { %3779 = vmatmul.mubr.msk.f32.gmra.mrb[32].mxu1 %vm6401_vm3, %v5387_v59 }
 0x70e   :  { %4127 = vmatpush3.bf16.msra.mxu1 %v4058_v32 }
 0x784   :  { %v3703_v14 = vpop.f32.mrb[2].mxu1 }
 0x785   :  { %v1482_v3 = vadd.f32 %v3703_v14, %v3206_v30  ;;  %v1476_v8 = vpop.f32.mrb[3].mxu1 }
 0x786   :  { %v1477_v24 = vadd.f32 %v3206_v30, %v1476_v8 }
 0x787   :  { %1557 = vst.msk [vmem:[#allocation8 + $0x8] sm:$0xff] %vm6343_vm5, %v1482_v3  ;;  %v1824_v3 = vpop.xlane.xlu0 %1823 }
 0x788   :  { %1556 = vst.msk [vmem:[#allocation8] sm:$0xff] %vm6343_vm5, %v1477_v24  ;;  %v3706_v40 = vpop.f32.mrb[4].mxu1 }
 0x789   :  { %v1492_v16 = vadd.f32 %v3706_v40, %v3206_v30  ;;  %v1486_v41 = vpop.f32.mrb[5].mxu1 }
 0x78a   :  { %v1487_v52 = vadd.f32 %v3206_v30, %v1486_v41 }
 0x78b   :  { %1559 = vst.msk [vmem:[#allocation8 + $0x18] sm:$0xff] %vm6343_vm5, %v1492_v16 }
 0x78c   :  { %1558 = vst.msk [vmem:[#allocation8 + $0x10] sm:$0xff] %vm6343_vm5, %v1487_v52  ;;  %v3709_v49 = vpop.f32.mrb[6].mxu1 }
 0x78d   :  { %v1502_v28 = vadd.f32 %v3709_v49, %v3206_v30  ;;  %v1496_v43 = vpop.f32.mrb[7].mxu1 }
 0x78e   :  { %v1497_v44 = vadd.f32 %v3206_v30, %v1496_v43 }
 0x78f   :  { %1561 = vst.msk [vmem:[#allocation8 + $0x28] sm:$0xff] %vm6343_vm5, %v1502_v28 }
 0x790   :  { %1560 = vst.msk [vmem:[#allocation8 + $0x20] sm:$0xff] %vm6343_vm5, %v1497_v44  ;;  %v3712_v7 = vpop.f32.mrb[8].mxu1 }
 0x791   :  { %v1512_v29 = vadd.f32 %v3712_v7, %v3206_v30  ;;  %v1506_v59 = vpop.f32.mrb[9].mxu1 }
 0x792   :  { %v1507_v47 = vadd.f32 %v3206_v30, %v1506_v59 }
 0x793   :  { %1563 = vst.msk [vmem:[#allocation8 + $0x38] sm:$0xff] %vm6343_vm5, %v1512_v29 }
 0x794   :  { %1562 = vst.msk [vmem:[#allocation8 + $0x30] sm:$0xff] %vm6343_vm5, %v1507_v47  ;;  %v3715_v33 = vpop.f32.mrb[10].mxu1 }
 0x795   :  { %v1522_v18 = vadd.f32 %v3715_v33, %v3206_v30  ;;  %v1516_v21 = vpop.f32.mrb[11].mxu1  ;;  %v1830_v33 = vpop.xlane.xlu0 %1829 }
 0x796   :  { %v1517_v0 = vadd.f32 %v3206_v30, %v1516_v21 }
 0x797   :  { %1565 = vst.msk [vmem:[#allocation8 + $0x48] sm:$0xff] %vm6343_vm5, %v1522_v18 }
 0x798   :  { %1564 = vst.msk [vmem:[#allocation8 + $0x40] sm:$0xff] %vm6343_vm5, %v1517_v0  ;;  %v3718_v25 = vpop.f32.mrb[12].mxu1 }
 0x799   :  { %v1532_v55 = vadd.f32 %v3718_v25, %v3206_v30  ;;  %v1526_v4 = vpop.f32.mrb[13].mxu1 }
 0x79a   :  { %v1527_v37 = vadd.f32 %v3206_v30, %v1526_v4 }
 0x79b   :  { %1567 = vst.msk [vmem:[#allocation8 + $0x58] sm:$0xff] %vm6343_vm5, %v1532_v55 }
 0x79c   :  { %1566 = vst.msk [vmem:[#allocation8 + $0x50] sm:$0xff] %vm6343_vm5, %v1527_v37  ;;  %v3721_v11 = vpop.f32.mrb[14].mxu1 }
 0x79d   :  { %v1542_v27 = vadd.f32 %v3721_v11, %v3206_v30  ;;  %v1536_v53 = vpop.f32.mrb[15].mxu1 }
 0x79e   :  { %v1537_v45 = vadd.f32 %v3206_v30, %v1536_v53 }
 0x79f   :  { %1569 = vst.msk [vmem:[#allocation8 + $0x68] sm:$0xff] %vm6343_vm5, %v1542_v27 }
 0x7a0   :  { %1568 = vst.msk [vmem:[#allocation8 + $0x60] sm:$0xff] %vm6343_vm5, %v1537_v45  ;;  %v3724_v48 = vpop.f32.mrb[16].mxu1 }
 0x7a1   :  { %v1552_v36 = vadd.f32 %v3724_v48, %v3206_v30  ;;  %v1546_v31 = vpop.f32.mrb[17].mxu1 }
 0x7a2   :  { %v1547_v63 = vadd.f32 %v3206_v30, %v1546_v31  ;;  %v1827_v30 = vpop.xlane.xlu1 %1826 }
 0x7a3   :  { %1571 = vst.msk [vmem:[#allocation8 + $0x78] sm:$0xff] %vm6343_vm5, %v1552_v36  ;;  %v1836_v36 = vpop.xlane.xlu0 %1835 }
 0x7a4   :  { %1570 = vst.msk [vmem:[#allocation8 + $0x70] sm:$0xff] %vm6343_vm5, %v1547_v63 }
 0x7a6   :  { %v1833_v7 = vpop.xlane.xlu1 %1832 }
 0x7aa   :  { %v1839_v45 = vpop.xlane.xlu1 %1838 }
 0x7c4   :  { %v3759_v15 = vpop.f32.mrb[18].mxu1 }
 0x7c5   :  { %v1965_v61 = vmul.f32 2.0, %v3759_v15  ;;  %v1719_v34 = vpop.f32.mrb[19].mxu1 }
 0x7c6   :  { %v1964_v51 = vmul.f32 2.0, %v1719_v34  ;;  %v1845_v34 = vpop.xlane.xlu1 %1844 }
 0x7c7   :  { %v1981_v9 = vsub.f32 %v1965_v61, %v1803_v20 }
 0x7c8   :  { %v1980_v38 = vsub.f32 %v1964_v51, %v1800_v58  ;;  %v3762_v62 = vpop.f32.mrb[20].mxu1 }
 0x7c9   :  { %v1967_v19 = vmul.f32 2.0, %v3762_v62  ;;  %v1729_v56 = vpop.f32.mrb[21].mxu1  ;;  %v5534_v12 = vsub.f32 %v1981_v9, %v5531_v35  ;;  %v1842_v62 = vpop.xlane.xlu0 %1841 }
 0x7ca   :  { %v5537_v39 = vsub.f32 %v1980_v38, %v5531_v35  ;;  %v1966_v26 = vmul.f32 2.0, %v1729_v56 }
 0x7cb   :  { %v1983_v60 = vsub.f32 %v1967_v19, %v1809_v23  ;;  %2018 = vmax.xlane.f32.xlu1 %v5534_v12 }
 0x7cc   :  { %v1982_v10 = vsub.f32 %v1966_v26, %v1806_v57  ;;  %2016 = vmax.xlane.f32.xlu0 %v5537_v39  ;;  %v3765_v13 = vpop.f32.mrb[22].mxu1 }
 0x7cd   :  { %v5542_v5 = vsub.f32 %v1983_v60, %v5531_v35  ;;  %v1969_v22 = vmul.f32 2.0, %v3765_v13  ;;  %v1739_v32 = vpop.f32.mrb[23].mxu1 }
 0x7ce   :  { %v5545_v2 = vsub.f32 %v1982_v10, %v5531_v35  ;;  %v1968_v50 = vmul.f32 2.0, %v1739_v32 }
 0x7cf   :  { %v1985_v14 = vsub.f32 %v1969_v22, %v1815_v17  ;;  %2022 = vmax.xlane.f32.xlu1 %v5542_v5 }
 0x7d0   :  { %v1984_v8 = vsub.f32 %v1968_v50, %v1812_v46  ;;  %2020 = vmax.xlane.f32.xlu0 %v5545_v2  ;;  %v3768_v24 = vpop.f32.mrb[24].mxu1 }
 0x7d1   :  { %v5550_v40 = vsub.f32 %v1985_v14, %v5531_v35  ;;  %v1971_v16 = vmul.f32 2.0, %v3768_v24  ;;  %v1749_v41 = vpop.f32.mrb[25].mxu1 }
 0x7d2   :  { %v5553_v52 = vsub.f32 %v1984_v8, %v5531_v35  ;;  %v1970_v49 = vmul.f32 2.0, %v1749_v41 }
 0x7d3   :  { %v1987_v28 = vsub.f32 %v1971_v16, %v1821_v6  ;;  %2026 = vmax.xlane.f32.xlu1 %v5550_v40 }
 0x7d4   :  { %v1986_v43 = vsub.f32 %v1970_v49, %v1818_v54  ;;  %2024 = vmax.xlane.f32.xlu0 %v5553_v52  ;;  %v3771_v44 = vpop.f32.mrb[26].mxu1 }
 0x7d5   :  { %v5558_v29 = vsub.f32 %v1987_v28, %v5531_v35  ;;  %v1973_v59 = vmul.f32 2.0, %v3771_v44  ;;  %v1759_v47 = vpop.f32.mrb[27].mxu1 }
 0x7d6   :  { %v5561_v18 = vsub.f32 %v1986_v43, %v5531_v35  ;;  %v1972_v21 = vmul.f32 2.0, %v1759_v47 }
 0x7d7   :  { %v1989_v0 = vsub.f32 %v1973_v59, %v1827_v30  ;;  %2030 = vmax.xlane.f32.xlu1 %v5558_v29 }
 0x7d8   :  { %v1988_v25 = vsub.f32 %v1972_v21, %v1824_v3  ;;  %2028 = vmax.xlane.f32.xlu0 %v5561_v18  ;;  %v3774_v55 = vpop.f32.mrb[28].mxu1 }
 0x7d9   :  { %v5566_v4 = vsub.f32 %v1989_v0, %v5531_v35  ;;  %v1975_v37 = vmul.f32 2.0, %v3774_v55  ;;  %v1769_v11 = vpop.f32.mrb[29].mxu1 }
 0x7da   :  { %v5569_v27 = vsub.f32 %v1988_v25, %v5531_v35  ;;  %v1974_v53 = vmul.f32 2.0, %v1769_v11 }
 0x7db   :  { %v1991_v48 = vsub.f32 %v1975_v37, %v1833_v7  ;;  %2034 = vmax.xlane.f32.xlu1 %v5566_v4 }
 0x7dc   :  { %v1990_v31 = vsub.f32 %v1974_v53, %v1830_v33  ;;  %2032 = vmax.xlane.f32.xlu0 %v5569_v27  ;;  %v3777_v63 = vpop.f32.mrb[30].mxu1 }
 0x7dd   :  { %v5574_v20 = vsub.f32 %v1991_v48, %v5531_v35  ;;  %v1977_v58 = vmul.f32 2.0, %v3777_v63  ;;  %v1779_v23 = vpop.f32.mrb[31].mxu1 }
 0x7de   :  { %v5577_v57 = vsub.f32 %v1990_v31, %v5531_v35  ;;  %v1976_v17 = vmul.f32 2.0, %v1779_v23 }
 0x7df   :  { %v1993_v46 = vsub.f32 %v1977_v58, %v1839_v45  ;;  %2038 = vmax.xlane.f32.xlu1 %v5574_v20 }
 0x7e0   :  { %v1992_v15 = vsub.f32 %v1976_v17, %v1836_v36  ;;  %2036 = vmax.xlane.f32.xlu0 %v5577_v57  ;;  %v3780_v61 = vpop.f32.mrb[32].mxu1 }
 0x7e1   :  { %v5582_v51 = vsub.f32 %v1993_v46, %v5531_v35  ;;  %v1979_v9 = vmul.f32 2.0, %v3780_v61  ;;  %v1789_v38 = vpop.f32.mrb[33].mxu1 }
 0x7e2   :  { %v5585_v6 = vsub.f32 %v1992_v15, %v5531_v35  ;;  %v1978_v19 = vmul.f32 2.0, %v1789_v38 }
 0x7e3   :  { %v1995_v56 = vsub.f32 %v1979_v9, %v1845_v34  ;;  %2042 = vmax.xlane.f32.xlu1 %v5582_v51 }
 0x7e4   :  { %v1994_v54 = vsub.f32 %v1978_v19, %v1842_v62  ;;  %2040 = vmax.xlane.f32.xlu0 %v5585_v6 }
 0x7e5   :  { %v5590_v26 = vsub.f32 %v1995_v56, %v5531_v35 }
 0x7e6   :  { %v5593_v60 = vsub.f32 %v1994_v54, %v5531_v35 }
 0x7e7   :  { %2046 = vmax.xlane.f32.xlu1 %v5590_v26 }
 0x7e8   :  { %2044 = vmax.xlane.f32.xlu0 %v5593_v60 }
 0x858   :  { %v2019_v10 = vpop.xlane.xlu1 %2018 }
 0x859   :  { %vm2049_vm1 = vcmp.eq.f32.partialorder %v5534_v12, %v2019_v10  ;;  %v2017_v13 = vpop.xlane.xlu0 %2016 }
 0x85a   :  { %vm2048_vm4 = vcmp.eq.f32.partialorder %v5537_v39, %v2017_v13  ;;  %v2065_v22 = vsel %vm2049_vm1, %v4608_v42, 128.0 }
 0x85b   :  { %2082 = vmin.xlane.f32.xlu1 %v2065_v22  ;;  %v2064_v32 = vsel %vm2048_vm4, %v4608_v42, 128.0 }
 0x85c   :  { %v2023_v50 = vpop.xlane.xlu1 %2022  ;;  %2080 = vmin.xlane.f32.xlu0 %v2064_v32 }
 0x85d   :  { %vm2051_vm6 = vcmp.eq.f32.partialorder %v5542_v5, %v2023_v50  ;;  %v2021_v35 = vpop.xlane.xlu0 %2020 }
 0x85e   :  { %vm2050_vm7 = vcmp.eq.f32.partialorder %v5545_v2, %v2021_v35  ;;  %v2067_v30 = vsel %vm2051_vm6, %v4608_v42, 128.0 }
 0x85f   :  { %2086 = vmin.xlane.f32.xlu1 %v2067_v30  ;;  %v2066_v14 = vsel %vm2050_vm7, %v4608_v42, 128.0 }
 0x860   :  { %v2027_v3 = vpop.xlane.xlu1 %2026  ;;  %2084 = vmin.xlane.f32.xlu0 %v2066_v14 }
 0x861   :  { %vm2053_vm2 = vcmp.eq.f32.partialorder %v5550_v40, %v2027_v3  ;;  %v2025_v8 = vpop.xlane.xlu0 %2024 }
 0x862   :  { %vm2052_vm8 = vcmp.eq.f32.partialorder %v5553_v52, %v2025_v8  ;;  %v2069_v24 = vsel %vm2053_vm2, %v4608_v42, 128.0 }
 0x863   :  { %2090 = vmin.xlane.f32.xlu1 %v2069_v24  ;;  %v2068_v16 = vsel %vm2052_vm8, %v4608_v42, 128.0 }
 0x864   :  { %v2031_v41 = vpop.xlane.xlu1 %2030  ;;  %2088 = vmin.xlane.f32.xlu0 %v2068_v16 }
 0x865   :  { %vm2055_vm9 = vcmp.eq.f32.partialorder %v5558_v29, %v2031_v41  ;;  %v2029_v49 = vpop.xlane.xlu0 %2028 }
 0x866   :  { %vm2054_vm10 = vcmp.eq.f32.partialorder %v5561_v18, %v2029_v49  ;;  %v2071_v28 = vsel %vm2055_vm9, %v4608_v42, 128.0 }
 0x867   :  { %2094 = vmin.xlane.f32.xlu1 %v2071_v28  ;;  %v2070_v43 = vsel %vm2054_vm10, %v4608_v42, 128.0 }
 0x868   :  { %v2035_v44 = vpop.xlane.xlu1 %2034  ;;  %2092 = vmin.xlane.f32.xlu0 %v2070_v43 }
 0x869   :  { %vm2057_vm11 = vcmp.eq.f32.partialorder %v5566_v4, %v2035_v44  ;;  %v2033_v7 = vpop.xlane.xlu0 %2032 }
 0x86a   :  { %vm2056_vm12 = vcmp.eq.f32.partialorder %v5569_v27, %v2033_v7  ;;  %v2073_v59 = vsel %vm2057_vm11, %v4608_v42, 128.0 }
 0x86b   :  { %2098 = vmin.xlane.f32.xlu1 %v2073_v59  ;;  %v2072_v47 = vsel %vm2056_vm12, %v4608_v42, 128.0 }
 0x86c   :  { %v2039_v33 = vpop.xlane.xlu1 %2038  ;;  %2096 = vmin.xlane.f32.xlu0 %v2072_v47 }
 0x86d   :  { %vm2059_vm13 = vcmp.eq.f32.partialorder %v5574_v20, %v2039_v33  ;;  %v2037_v21 = vpop.xlane.xlu0 %2036 }
 0x86e   :  { %vm2058_vm14 = vcmp.eq.f32.partialorder %v5577_v57, %v2037_v21  ;;  %v2075_v0 = vsel %vm2059_vm13, %v4608_v42, 128.0 }
 0x86f   :  { %2102 = vmin.xlane.f32.xlu1 %v2075_v0  ;;  %v2074_v25 = vsel %vm2058_vm14, %v4608_v42, 128.0 }
 0x870   :  { %v2043_v55 = vpop.xlane.xlu1 %2042  ;;  %2100 = vmin.xlane.f32.xlu0 %v2074_v25 }
 0x871   :  { %vm2061_vm15 = vcmp.eq.f32.partialorder %v5582_v51, %v2043_v55  ;;  %v2041_v37 = vpop.xlane.xlu0 %2040 }
 0x872   :  { %vm2060_vm0 = vcmp.eq.f32.partialorder %v5585_v6, %v2041_v37  ;;  %v2077_v11 = vsel %vm2061_vm15, %v4608_v42, 128.0 }
 0x873   :  { %2106 = vmin.xlane.f32.xlu1 %v2077_v11  ;;  %v2076_v53 = vsel %vm2060_vm0, %v4608_v42, 128.0 }
 0x874   :  { %v2047_v45 = vpop.xlane.xlu1 %2046  ;;  %2104 = vmin.xlane.f32.xlu0 %v2076_v53 }
 0x875   :  { %vm2063_vm3 = vcmp.eq.f32.partialorder %v5590_v26, %v2047_v45  ;;  %v2045_v48 = vpop.xlane.xlu0 %2044 }
 0x876   :  { %vm2062_vm1 = vcmp.eq.f32.partialorder %v5593_v60, %v2045_v48  ;;  %v2079_v36 = vsel %vm2063_vm3, %v4608_v42, 128.0 }
 0x877   :  { %2110 = vmin.xlane.f32.xlu1 %v2079_v36  ;;  %v2078_v31 = vsel %vm2062_vm1, %v4608_v42, 128.0 }
 0x878   :  { %2108 = vmin.xlane.f32.xlu0 %v2078_v31 }
 0x8e8   :  { %v5629_v63 = vpop.xlane.xlu1 %2082 }
 0x8e9   :  { %vm2113_vm4 = vcmp.eq.f32.partialorder %v4608_v42, %v5629_v63  ;;  %v5633_v58 = vpop.xlane.xlu0 %2080 }
 0x8ea   :  { %vm2112_vm6 = vcmp.eq.f32.partialorder %v4608_v42, %v5633_v58  ;;  %v5641_v23 = vsel %vm2113_vm4, -3.4028235e+38, %v5534_v12 }
 0x8eb   :  { %2194 = vmax.xlane.f32.xlu1 %v5641_v23  ;;  %v5648_v17 = vsel %vm2112_vm6, -3.4028235e+38, %v5537_v39 }
 0x8ec   :  { %v5650_v46 = vpop.xlane.xlu1 %2086  ;;  %2192 = vmax.xlane.f32.xlu0 %v5648_v17 }
 0x8ed   :  { %vm2115_vm7 = vcmp.eq.f32.partialorder %v4608_v42, %v5650_v46  ;;  %v5655_v15 = vpop.xlane.xlu0 %2084 }
 0x8ee   :  { %vm2114_vm2 = vcmp.eq.f32.partialorder %v4608_v42, %v5655_v15  ;;  %v5663_v12 = vsel %vm2115_vm7, -3.4028235e+38, %v5542_v5  ;;  %v3275_v58 = vsel %vm2115_vm7, 1.0, %v4244_v1 }
 0x8ef   :  { %2198 = vmax.xlane.f32.xlu1 %v5663_v12  ;;  %v5670_v39 = vsel %vm2114_vm2, -3.4028235e+38, %v5545_v2 }
 0x8f0   :  { %v5672_v61 = vpop.xlane.xlu1 %2090  ;;  %2196 = vmax.xlane.f32.xlu0 %v5670_v39 }
 0x8f1   :  { %vm2117_vm8 = vcmp.eq.f32.partialorder %v4608_v42, %v5672_v61  ;;  %v5677_v34 = vpop.xlane.xlu0 %2088 }
 0x8f2   :  { %vm2116_vm9 = vcmp.eq.f32.partialorder %v4608_v42, %v5677_v34  ;;  %v5685_v5 = vsel %vm2117_vm8, -3.4028235e+38, %v5550_v40  ;;  %v3277_v15 = vsel %vm2117_vm8, 1.0, %v4244_v1 }
 0x8f3   :  { %2202 = vmax.xlane.f32.xlu1 %v5685_v5  ;;  %v5692_v2 = vsel %vm2116_vm9, -3.4028235e+38, %v5553_v52 }
 0x8f4   :  { %v5694_v9 = vpop.xlane.xlu1 %2094  ;;  %2200 = vmax.xlane.f32.xlu0 %v5692_v2 }
 0x8f5   :  { %vm2119_vm10 = vcmp.eq.f32.partialorder %v4608_v42, %v5694_v9  ;;  %v5699_v38 = vpop.xlane.xlu0 %2092 }
 0x8f6   :  { %vm2118_vm11 = vcmp.eq.f32.partialorder %v4608_v42, %v5699_v38  ;;  %v5707_v40 = vsel %vm2119_vm10, -3.4028235e+38, %v5558_v29  ;;  %v3279_v34 = vsel %vm2119_vm10, 1.0, %v4244_v1 }
 0x8f7   :  { %2206 = vmax.xlane.f32.xlu1 %v5707_v40  ;;  %v5714_v52 = vsel %vm2118_vm11, -3.4028235e+38, %v5561_v18 }
 0x8f8   :  { %v5716_v62 = vpop.xlane.xlu1 %2098  ;;  %2204 = vmax.xlane.f32.xlu0 %v5714_v52 }
 0x8f9   :  { %vm2121_vm12 = vcmp.eq.f32.partialorder %v4608_v42, %v5716_v62  ;;  %v5721_v19 = vpop.xlane.xlu0 %2096 }
 0x8fa   :  { %vm2120_vm13 = vcmp.eq.f32.partialorder %v4608_v42, %v5721_v19  ;;  %v5729_v29 = vsel %vm2121_vm12, -3.4028235e+38, %v5566_v4  ;;  %v3281_v38 = vsel %vm2121_vm12, 1.0, %v4244_v1 }
 0x8fb   :  { %2210 = vmax.xlane.f32.xlu1 %v5729_v29  ;;  %v5736_v18 = vsel %vm2120_vm13, -3.4028235e+38, %v5569_v27 }
 0x8fc   :  { %v5738_v56 = vpop.xlane.xlu1 %2102  ;;  %2208 = vmax.xlane.f32.xlu0 %v5736_v18 }
 0x8fd   :  { %vm2123_vm14 = vcmp.eq.f32.partialorder %v4608_v42, %v5738_v56  ;;  %v5743_v54 = vpop.xlane.xlu0 %2100 }
 0x8fe   :  { %vm2122_vm15 = vcmp.eq.f32.partialorder %v4608_v42, %v5743_v54  ;;  %v5751_v4 = vsel %vm2123_vm14, -3.4028235e+38, %v5574_v20  ;;  %v3283_v19 = vsel %vm2123_vm14, 1.0, %v4244_v1 }
 0x8ff   :  { %2214 = vmax.xlane.f32.xlu1 %v5751_v4  ;;  %v5758_v27 = vsel %vm2122_vm15, -3.4028235e+38, %v5577_v57 }
 0x900   :  { %v5760_v10 = vpop.xlane.xlu1 %2106  ;;  %2212 = vmax.xlane.f32.xlu0 %v5758_v27 }
 0x901   :  { %vm6347_vm0 = vcmp.eq.f32.partialorder %v4608_v42, %v5760_v10  ;;  %v5765_v13 = vpop.xlane.xlu0 %2104 }
 0x902   :  { %vm6344_vm3 = vcmp.eq.f32.partialorder %v4608_v42, %v5765_v13  ;;  %v5773_v20 = vsel %vm6347_vm0, -3.4028235e+38, %v5582_v51 }
 0x903   :  { %2218 = vmax.xlane.f32.xlu1 %v5773_v20  ;;  %v5780_v57 = vsel %vm6344_vm3, -3.4028235e+38, %v5585_v6 }
 0x904   :  { %v5782_v22 = vpop.xlane.xlu1 %2110  ;;  %2216 = vmax.xlane.f32.xlu0 %v5780_v57 }
 0x905   :  { %vm6345_vm1 = vcmp.eq.f32.partialorder %v4608_v42, %v5782_v22  ;;  %v5787_v32 = vpop.xlane.xlu0 %2108 }
 0x906   :  { %v5793_v51 = vsel %vm6345_vm1, -3.4028235e+38, %v5590_v26  ;;  %vm6346_vm5 = vcmp.eq.f32.partialorder %v4608_v42, %v5787_v32 }
 0x907   :  { %v5801_v6 = vsel %vm6346_vm5, -3.4028235e+38, %v5593_v60  ;;  %2222 = vmax.xlane.f32.xlu1 %v5793_v51 }
 0x908   :  { %2220 = vmax.xlane.f32.xlu0 %v5801_v6 }
 0x978   :  { %v2195_v50 = vpop.xlane.xlu1 %2194 }
 0x979   :  { %vm2225_vm3 = vcmp.eq.f32.partialorder %v5641_v23, %v2195_v50  ;;  %v2193_v35 = vpop.xlane.xlu0 %2192 }
 0x97a   :  { %v2241_v26 = vsel %vm2225_vm3, %v4608_v42, 128.0  ;;  %vm2224_vm1 = vcmp.eq.f32.partialorder %v5648_v17, %v2193_v35 }
 0x97b   :  { %v2240_v30 = vsel %vm2224_vm1, %v4608_v42, 128.0  ;;  %2258 = vmin.xlane.f32.xlu1 %v2241_v26 }
 0x97c   :  { %v2199_v14 = vpop.xlane.xlu1 %2198  ;;  %2256 = vmin.xlane.f32.xlu0 %v2240_v30 }
 0x97d   :  { %vm2227_vm5 = vcmp.eq.f32.partialorder %v5663_v12, %v2199_v14  ;;  %v2197_v60 = vpop.xlane.xlu0 %2196  ;;  %v3273_v14 = vsel %vm2113_vm4, 1.0, %v4244_v1 }
 0x97e   :  { %v2243_v3 = vsel %vm2227_vm5, %v4608_v42, 128.0  ;;  %vm2226_vm0 = vcmp.eq.f32.partialorder %v5670_v39, %v2197_v60 }
 0x97f   :  { %v2242_v8 = vsel %vm2226_vm0, %v4608_v42, 128.0  ;;  %2262 = vmin.xlane.f32.xlu1 %v2243_v3 }
 0x980   :  { %v2203_v24 = vpop.xlane.xlu1 %2202  ;;  %2260 = vmin.xlane.f32.xlu0 %v2242_v8  ;;  %v3272_v8 = vsel %vm2112_vm6, 1.0, %v4244_v1 }
 0x981   :  { %vm2229_vm3 = vcmp.eq.f32.partialorder %v5685_v5, %v2203_v24  ;;  %v2201_v16 = vpop.xlane.xlu0 %2200 }
 0x982   :  { %v2245_v41 = vsel %vm2229_vm3, %v4608_v42, 128.0  ;;  %vm2228_vm1 = vcmp.eq.f32.partialorder %v5692_v2, %v2201_v16 }
 0x983   :  { %v2244_v49 = vsel %vm2228_vm1, %v4608_v42, 128.0  ;;  %2266 = vmin.xlane.f32.xlu1 %v2245_v41 }
 0x984   :  { %v2207_v28 = vpop.xlane.xlu1 %2206  ;;  %2264 = vmin.xlane.f32.xlu0 %v2244_v49 }
 0x985   :  { %vm2231_vm5 = vcmp.eq.f32.partialorder %v5707_v40, %v2207_v28  ;;  %v2205_v43 = vpop.xlane.xlu0 %2204 }
 0x986   :  { %v2247_v44 = vsel %vm2231_vm5, %v4608_v42, 128.0  ;;  %vm2230_vm0 = vcmp.eq.f32.partialorder %v5714_v52, %v2205_v43  ;;  %v3274_v43 = vsel %vm2114_vm2, 1.0, %v4244_v1 }
 0x987   :  { %v2246_v7 = vsel %vm2230_vm0, %v4608_v42, 128.0  ;;  %2270 = vmin.xlane.f32.xlu1 %v2247_v44 }
 0x988   :  { %v2211_v59 = vpop.xlane.xlu1 %2210  ;;  %2268 = vmin.xlane.f32.xlu0 %v2246_v7 }
 0x989   :  { %vm2233_vm3 = vcmp.eq.f32.partialorder %v5729_v29, %v2211_v59  ;;  %v2209_v47 = vpop.xlane.xlu0 %2208 }
 0x98a   :  { %v2249_v33 = vsel %vm2233_vm3, %v4608_v42, 128.0  ;;  %vm2232_vm1 = vcmp.eq.f32.partialorder %v5736_v18, %v2209_v47 }
 0x98b   :  { %v2248_v21 = vsel %vm2232_vm1, %v4608_v42, 128.0  ;;  %2274 = vmin.xlane.f32.xlu1 %v2249_v33 }
 0x98c   :  { %v2215_v0 = vpop.xlane.xlu1 %2214  ;;  %2272 = vmin.xlane.f32.xlu0 %v2248_v21  ;;  %v3276_v21 = vsel %vm2116_vm9, 1.0, %v4244_v1 }
 0x98d   :  { %vm2235_vm5 = vcmp.eq.f32.partialorder %v5751_v4, %v2215_v0  ;;  %v2213_v25 = vpop.xlane.xlu0 %2212 }
 0x98e   :  { %v2251_v55 = vsel %vm2235_vm5, %v4608_v42, 128.0  ;;  %vm2234_vm0 = vcmp.eq.f32.partialorder %v5758_v27, %v2213_v25 }
 0x98f   :  { %v2250_v37 = vsel %vm2234_vm0, %v4608_v42, 128.0  ;;  %2278 = vmin.xlane.f32.xlu1 %v2251_v55 }
 0x990   :  { %v2219_v11 = vpop.xlane.xlu1 %2218  ;;  %2276 = vmin.xlane.f32.xlu0 %v2250_v37 }
 0x991   :  { %vm2237_vm3 = vcmp.eq.f32.partialorder %v5773_v20, %v2219_v11  ;;  %v2217_v53 = vpop.xlane.xlu0 %2216 }
 0x992   :  { %v2253_v45 = vsel %vm2237_vm3, %v4608_v42, 128.0  ;;  %vm2236_vm1 = vcmp.eq.f32.partialorder %v5780_v57, %v2217_v53  ;;  %v3278_v53 = vsel %vm2118_vm11, 1.0, %v4244_v1 }
 0x993   :  { %v2252_v48 = vsel %vm2236_vm1, %v4608_v42, 128.0  ;;  %2282 = vmin.xlane.f32.xlu1 %v2253_v45 }
 0x994   :  { %v2223_v36 = vpop.xlane.xlu1 %2222  ;;  %2280 = vmin.xlane.f32.xlu0 %v2252_v48 }
 0x995   :  { %vm2239_vm5 = vcmp.eq.f32.partialorder %v5793_v51, %v2223_v36  ;;  %v2221_v31 = vpop.xlane.xlu0 %2220 }
 0x996   :  { %v2255_v50 = vsel %vm2239_vm5, %v4608_v42, 128.0  ;;  %vm2238_vm0 = vcmp.eq.f32.partialorder %v5801_v6, %v2221_v31 }
 0x997   :  { %v2254_v35 = vsel %vm2238_vm0, %v4608_v42, 128.0  ;;  %2286 = vmin.xlane.f32.xlu1 %v2255_v50  ;;  %vm6403_vm0 = vcmp.eq.f32.partialorder %v4608_v42, %v5765_v13 }
 0x998   :  { %2284 = vmin.xlane.f32.xlu0 %v2254_v35  ;;  %v3280_v35 = vsel %vm2120_vm13, 1.0, %v4244_v1 }
 0xa08   :  { %v2259_v26 = vpop.xlane.xlu1 %2258 }
 0xa09   :  { %vm2289_vm3 = vcmp.eq.f32.partialorder %v4608_v42, %v2259_v26  ;;  %v2257_v30 = vpop.xlane.xlu0 %2256 }
 0xa0a   :  { %v3289_v60 = vsel %vm2289_vm3, 1.0, %v4244_v1  ;;  %v5844_v3 = vsel %vm2289_vm3, -3.4028235e+38, %v5641_v23  ;;  %vm2288_vm1 = vcmp.eq.f32.partialorder %v4608_v42, %v2257_v30 }
 0xa0b   :  { %v5851_v24 = vadd.f32 %v3289_v60, %v3273_v14  ;;  %v3288_v16 = vsel %vm2288_vm1, 1.0, %v4244_v1  ;;  %v5855_v41 = vsel %vm2288_vm1, -3.4028235e+38, %v5648_v17  ;;  %2370 = vmax.xlane.f32.xlu1 %v5844_v3  ;;  %vm6404_vm1 = vcmp.eq.f32.partialorder %v4608_v42, %v5782_v22 }
 0xa0c   :  { %v5858_v63 = vadd.f32 %v3288_v16, %v3272_v8  ;;  %v2263_v23 = vpop.xlane.xlu1 %2262  ;;  %2368 = vmax.xlane.f32.xlu0 %v5855_v41  ;;  %v3282_v16 = vsel %vm2122_vm15, 1.0, %v4244_v1  ;;  %vm6402_vm15 = vcmp.eq.f32.partialorder %v4608_v42, %v5760_v10  ;;  %v3287_v13 = vsel %vm6404_vm1, 1.0, %v4244_v1 }
 0xa0d   :  { %vm2291_vm4 = vcmp.eq.f32.partialorder %v4608_v42, %v2263_v23  ;;  %v2261_v49 = vpop.xlane.xlu0 %2260  ;;  %v3285_v54 = vsel %vm6402_vm15, 1.0, %v4244_v1 }
 0xa0e   :  { %v3291_v28 = vsel %vm2291_vm4, 1.0, %v4244_v1  ;;  %v5868_v17 = vsel %vm2291_vm4, -3.4028235e+38, %v5663_v12  ;;  %vm2290_vm6 = vcmp.eq.f32.partialorder %v4608_v42, %v2261_v49 }
 0xa0f   :  { %v5875_v44 = vadd.f32 %v3291_v28, %v3275_v58  ;;  %v3290_v7 = vsel %vm2290_vm6, 1.0, %v4244_v1  ;;  %v5879_v59 = vsel %vm2290_vm6, -3.4028235e+38, %v5670_v39  ;;  %2374 = vmax.xlane.f32.xlu1 %v5868_v17  ;;  %vm6405_vm6 = vcmp.eq.f32.partialorder %v4608_v42, %v5787_v32 }
 0xa10   :  { %v5882_v46 = vadd.f32 %v3290_v7, %v3274_v43  ;;  %v2267_v12 = vpop.xlane.xlu1 %2266  ;;  %2372 = vmax.xlane.f32.xlu0 %v5879_v59  ;;  %v3284_v7 = vsel %vm6403_vm0, 1.0, %v4244_v1 }
 0xa11   :  { %vm2293_vm7 = vcmp.eq.f32.partialorder %v4608_v42, %v2267_v12  ;;  %v2265_v47 = vpop.xlane.xlu0 %2264 }
 0xa12   :  { %v3293_v33 = vsel %vm2293_vm7, 1.0, %v4244_v1  ;;  %v5892_v39 = vsel %vm2293_vm7, -3.4028235e+38, %v5685_v5  ;;  %vm2292_vm2 = vcmp.eq.f32.partialorder %v4608_v42, %v2265_v47 }
 0xa13   :  { %v5899_v0 = vadd.f32 %v3293_v33, %v3277_v15  ;;  %v3292_v25 = vsel %vm2292_vm2, 1.0, %v4244_v1  ;;  %v5903_v55 = vsel %vm2292_vm2, -3.4028235e+38, %v5692_v2  ;;  %2378 = vmax.xlane.f32.xlu1 %v5892_v39 }
 0xa14   :  { %v5906_v61 = vadd.f32 %v3292_v25, %v3276_v21  ;;  %v2271_v5 = vpop.xlane.xlu1 %2270  ;;  %2376 = vmax.xlane.f32.xlu0 %v5903_v55  ;;  %v3286_v25 = vsel %vm6405_vm6, 1.0, %v4244_v1 }
 0xa15   :  { %vm2295_vm8 = vcmp.eq.f32.partialorder %v4608_v42, %v2271_v5  ;;  %v2269_v37 = vpop.xlane.xlu0 %2268 }
 0xa16   :  { %v3295_v11 = vsel %vm2295_vm8, 1.0, %v4244_v1  ;;  %v5916_v2 = vsel %vm2295_vm8, -3.4028235e+38, %v5707_v40  ;;  %vm2294_vm9 = vcmp.eq.f32.partialorder %v4608_v42, %v2269_v37 }
 0xa17   :  { %v5923_v45 = vadd.f32 %v3295_v11, %v3279_v34  ;;  %v3294_v48 = vsel %vm2294_vm9, 1.0, %v4244_v1  ;;  %v5927_v36 = vsel %vm2294_vm9, -3.4028235e+38, %v5714_v52  ;;  %2382 = vmax.xlane.f32.xlu1 %v5916_v2 }
 0xa18   :  { %v5930_v9 = vadd.f32 %v3294_v48, %v3278_v53  ;;  %v2275_v40 = vpop.xlane.xlu1 %2274  ;;  %2380 = vmax.xlane.f32.xlu0 %v5927_v36 }
 0xa19   :  { %vm2297_vm10 = vcmp.eq.f32.partialorder %v4608_v42, %v2275_v40  ;;  %v2273_v31 = vpop.xlane.xlu0 %2272 }
 0xa1a   :  { %v3297_v50 = vsel %vm2297_vm10, 1.0, %v4244_v1  ;;  %v5940_v52 = vsel %vm2297_vm10, -3.4028235e+38, %v5729_v29  ;;  %vm2296_vm11 = vcmp.eq.f32.partialorder %v4608_v42, %v2273_v31 }
 0xa1b   :  { %v5947_v26 = vadd.f32 %v3297_v50, %v3281_v38  ;;  %v3296_v30 = vsel %vm2296_vm11, 1.0, %v4244_v1  ;;  %v5951_v14 = vsel %vm2296_vm11, -3.4028235e+38, %v5736_v18  ;;  %2386 = vmax.xlane.f32.xlu1 %v5940_v52 }
 0xa1c   :  { %v5954_v62 = vadd.f32 %v3296_v30, %v3280_v35  ;;  %v2279_v29 = vpop.xlane.xlu1 %2278  ;;  %2384 = vmax.xlane.f32.xlu0 %v5951_v14 }
 0xa1d   :  { %vm2299_vm12 = vcmp.eq.f32.partialorder %v4608_v42, %v2279_v29  ;;  %v2277_v60 = vpop.xlane.xlu0 %2276 }
 0xa1e   :  { %v3299_v8 = vsel %vm2299_vm12, 1.0, %v4244_v1  ;;  %v5964_v18 = vsel %vm2299_vm12, -3.4028235e+38, %v5751_v4  ;;  %vm2298_vm13 = vcmp.eq.f32.partialorder %v4608_v42, %v2277_v60 }
 0xa1f   :  { %v5971_v23 = vadd.f32 %v3299_v8, %v3283_v19  ;;  %v3298_v49 = vsel %vm2298_vm13, 1.0, %v4244_v1  ;;  %v5975_v58 = vsel %vm2298_vm13, -3.4028235e+38, %v5758_v27  ;;  %2390 = vmax.xlane.f32.xlu1 %v5964_v18 }
 0xa20   :  { %v5978_v56 = vadd.f32 %v3298_v49, %v3282_v16  ;;  %v2283_v4 = vpop.xlane.xlu1 %2282  ;;  %2388 = vmax.xlane.f32.xlu0 %v5975_v58 }
 0xa21   :  { %vm2301_vm14 = vcmp.eq.f32.partialorder %v4608_v42, %v2283_v4  ;;  %v2281_v28 = vpop.xlane.xlu0 %2280 }
 0xa22   :  { %v3301_v43 = vsel %vm2301_vm14, 1.0, %v4244_v1  ;;  %v5988_v27 = vsel %vm2301_vm14, -3.4028235e+38, %v5773_v20  ;;  %vm2300_vm5 = vcmp.eq.f32.partialorder %v4608_v42, %v2281_v28 }
 0xa23   :  { %v5995_v12 = vadd.f32 %v3301_v43, %v3285_v54  ;;  %v3300_v47 = vsel %vm2300_vm5, 1.0, %v4244_v1  ;;  %v5999_v15 = vsel %vm2300_vm5, -3.4028235e+38, %v5780_v57  ;;  %2394 = vmax.xlane.f32.xlu1 %v5988_v27 }
 0xa24   :  { %v6002_v10 = vadd.f32 %v3300_v47, %v3284_v7  ;;  %v2287_v20 = vpop.xlane.xlu1 %2286  ;;  %2392 = vmax.xlane.f32.xlu0 %v5999_v15 }
 0xa25   :  { %vm2303_vm3 = vcmp.eq.f32.partialorder %v4608_v42, %v2287_v20  ;;  %v2285_v33 = vpop.xlane.xlu0 %2284 }
 0xa26   :  { %v3303_v21 = vsel %vm2303_vm3, 1.0, %v4244_v1  ;;  %v6012_v57 = vsel %vm2303_vm3, -3.4028235e+38, %v5793_v51  ;;  %vm2302_vm4 = vcmp.eq.f32.partialorder %v4608_v42, %v2285_v33 }
 0xa27   :  { %v6019_v5 = vadd.f32 %v3303_v21, %v3287_v13  ;;  %v3302_v37 = vsel %vm2302_vm4, 1.0, %v4244_v1  ;;  %v6023_v34 = vsel %vm2302_vm4, -3.4028235e+38, %v5801_v6  ;;  %2398 = vmax.xlane.f32.xlu1 %v6012_v57 }
 0xa28   :  { %v6026_v22 = vadd.f32 %v3302_v37, %v3286_v25  ;;  %2396 = vmax.xlane.f32.xlu0 %v6023_v34 }
 0xa98   :  { %v2371_v51 = vpop.xlane.xlu1 %2370 }
 0xa99   :  { %vm2401_vm7 = vcmp.eq.f32.partialorder %v5844_v3, %v2371_v51  ;;  %v2369_v11 = vpop.xlane.xlu0 %2368 }
 0xa9a   :  { %v2417_v32 = vsel %vm2401_vm7, %v4608_v42, 128.0  ;;  %vm2400_vm2 = vcmp.eq.f32.partialorder %v5855_v41, %v2369_v11 }
 0xa9b   :  { %v2416_v53 = vsel %vm2400_vm2, %v4608_v42, 128.0  ;;  %2434 = vmin.xlane.f32.xlu1 %v2417_v32 }
 0xa9c   :  { %v2375_v48 = vpop.xlane.xlu1 %2374  ;;  %2432 = vmin.xlane.f32.xlu0 %v2416_v53 }
 0xa9d   :  { %vm2403_vm8 = vcmp.eq.f32.partialorder %v5868_v17, %v2375_v48  ;;  %v2373_v6 = vpop.xlane.xlu0 %2372 }
 0xa9e   :  { %v2419_v40 = vsel %vm2403_vm8, %v4608_v42, 128.0  ;;  %vm2402_vm9 = vcmp.eq.f32.partialorder %v5879_v59, %v2373_v6 }
 0xa9f   :  { %v2418_v31 = vsel %vm2402_vm9, %v4608_v42, 128.0  ;;  %2438 = vmin.xlane.f32.xlu1 %v2419_v40 }
 0xaa0   :  { %v2379_v38 = vpop.xlane.xlu1 %2378  ;;  %2436 = vmin.xlane.f32.xlu0 %v2418_v31 }
 0xaa1   :  { %vm2405_vm10 = vcmp.eq.f32.partialorder %v5892_v39, %v2379_v38  ;;  %v2377_v50 = vpop.xlane.xlu0 %2376 }
 0xaa2   :  { %v2421_v35 = vsel %vm2405_vm10, %v4608_v42, 128.0  ;;  %vm2404_vm11 = vcmp.eq.f32.partialorder %v5903_v55, %v2377_v50 }
 0xaa3   :  { %v2420_v30 = vsel %vm2404_vm11, %v4608_v42, 128.0  ;;  %2442 = vmin.xlane.f32.xlu1 %v2421_v35 }
 0xaa4   :  { %v2383_v29 = vpop.xlane.xlu1 %2382  ;;  %2440 = vmin.xlane.f32.xlu0 %v2420_v30 }
 0xaa5   :  { %vm2407_vm12 = vcmp.eq.f32.partialorder %v5916_v2, %v2383_v29  ;;  %v2381_v60 = vpop.xlane.xlu0 %2380 }
 0xaa6   :  { %v2423_v19 = vsel %vm2407_vm12, %v4608_v42, 128.0  ;;  %vm2406_vm13 = vcmp.eq.f32.partialorder %v5927_v36, %v2381_v60 }
 0xaa7   :  { %v2422_v8 = vsel %vm2406_vm13, %v4608_v42, 128.0  ;;  %2446 = vmin.xlane.f32.xlu1 %v2423_v19 }
 0xaa8   :  { %v2387_v16 = vpop.xlane.xlu1 %2386  ;;  %2444 = vmin.xlane.f32.xlu0 %v2422_v8 }
 0xaa9   :  { %vm2409_vm14 = vcmp.eq.f32.partialorder %v5940_v52, %v2387_v16  ;;  %v2385_v49 = vpop.xlane.xlu0 %2384 }
 0xaaa   :  { %v2425_v4 = vsel %vm2409_vm14, %v4608_v42, 128.0  ;;  %vm2408_vm15 = vcmp.eq.f32.partialorder %v5951_v14, %v2385_v49 }
 0xaab   :  { %v2424_v28 = vsel %vm2408_vm15, %v4608_v42, 128.0  ;;  %2450 = vmin.xlane.f32.xlu1 %v2425_v4 }
 0xaac   :  { %v2391_v54 = vpop.xlane.xlu1 %2390  ;;  %2448 = vmin.xlane.f32.xlu0 %v2424_v28 }
 0xaad   :  { %vm2411_vm5 = vcmp.eq.f32.partialorder %v5964_v18, %v2391_v54  ;;  %v2389_v43 = vpop.xlane.xlu0 %2388 }
 0xaae   :  { %v2427_v7 = vsel %vm2411_vm5, %v4608_v42, 128.0  ;;  %vm2410_vm0 = vcmp.eq.f32.partialorder %v5975_v58, %v2389_v43 }
 0xaaf   :  { %v2426_v47 = vsel %vm2410_vm0, %v4608_v42, 128.0  ;;  %2454 = vmin.xlane.f32.xlu1 %v2427_v7 }
 0xab0   :  { %v2395_v20 = vpop.xlane.xlu1 %2394  ;;  %2452 = vmin.xlane.f32.xlu0 %v2426_v47 }
 0xab1   :  { %vm2413_vm3 = vcmp.eq.f32.partialorder %v5988_v27, %v2395_v20  ;;  %v2393_v33 = vpop.xlane.xlu0 %2392 }
 0xab2   :  { %v2429_v13 = vsel %vm2413_vm3, %v4608_v42, 128.0  ;;  %vm2412_vm1 = vcmp.eq.f32.partialorder %v5999_v15, %v2393_v33 }
 0xab3   :  { %v2428_v21 = vsel %vm2412_vm1, %v4608_v42, 128.0  ;;  %2458 = vmin.xlane.f32.xlu1 %v2429_v13 }
 0xab4   :  { %v2399_v25 = vpop.xlane.xlu1 %2398  ;;  %2456 = vmin.xlane.f32.xlu0 %v2428_v21 }
 0xab5   :  { %vm2415_vm4 = vcmp.eq.f32.partialorder %v6012_v57, %v2399_v25  ;;  %v2397_v37 = vpop.xlane.xlu0 %2396 }
 0xab6   :  { %v2431_v51 = vsel %vm2415_vm4, %v4608_v42, 128.0  ;;  %vm2414_vm6 = vcmp.eq.f32.partialorder %v6023_v34, %v2397_v37 }
 0xab7   :  { %v2430_v11 = vsel %vm2414_vm6, %v4608_v42, 128.0  ;;  %2462 = vmin.xlane.f32.xlu1 %v2431_v51 }
 0xab8   :  { %2460 = vmin.xlane.f32.xlu0 %v2430_v11 }
 0xb28   :  { %v2435_v32 = vpop.xlane.xlu1 %2434 }
 0xb29   :  { %vm2465_vm7 = vcmp.eq.f32.partialorder %v4608_v42, %v2435_v32  ;;  %v2433_v53 = vpop.xlane.xlu0 %2432 }
 0xb2a   :  { %v3305_v48 = vsel %vm2465_vm7, 1.0, %v4244_v1  ;;  %v6064_v6 = vsel %vm2465_vm7, -3.4028235e+38, %v5844_v3  ;;  %vm2464_vm2 = vcmp.eq.f32.partialorder %v4608_v42, %v2433_v53 }
 0xb2b   :  { %v6068_v40 = vadd.f32 %v3305_v48, %v5851_v24  ;;  %v3304_v31 = vsel %vm2464_vm2, 1.0, %v4244_v1  ;;  %v6072_v38 = vsel %vm2464_vm2, -3.4028235e+38, %v5855_v41  ;;  %2546 = vmax.xlane.f32.xlu1 %v6064_v6 }
 0xb2c   :  { %v6076_v50 = vadd.f32 %v3304_v31, %v5858_v63  ;;  %v2439_v35 = vpop.xlane.xlu1 %2438  ;;  %2544 = vmax.xlane.f32.xlu0 %v6072_v38 }
 0xb2d   :  { %vm2467_vm8 = vcmp.eq.f32.partialorder %v4608_v42, %v2439_v35  ;;  %v2437_v3 = vpop.xlane.xlu0 %2436 }
 0xb2e   :  { %v3307_v30 = vsel %vm2467_vm8, 1.0, %v4244_v1  ;;  %v6082_v24 = vsel %vm2467_vm8, -3.4028235e+38, %v5868_v17  ;;  %vm2466_vm9 = vcmp.eq.f32.partialorder %v4608_v42, %v2437_v3 }
 0xb2f   :  { %v6086_v41 = vadd.f32 %v3307_v30, %v5875_v44  ;;  %v3306_v29 = vsel %vm2466_vm9, 1.0, %v4244_v1  ;;  %v6090_v63 = vsel %vm2466_vm9, -3.4028235e+38, %v5879_v59  ;;  %2550 = vmax.xlane.f32.xlu1 %v6082_v24 }
 0xb30   :  { %v6094_v60 = vadd.f32 %v3306_v29, %v5882_v46  ;;  %v2443_v19 = vpop.xlane.xlu1 %2442  ;;  %2548 = vmax.xlane.f32.xlu0 %v6090_v63 }
 0xb31   :  { %vm2469_vm10 = vcmp.eq.f32.partialorder %v4608_v42, %v2443_v19  ;;  %v2441_v17 = vpop.xlane.xlu0 %2440 }
 0xb32   :  { %v3309_v8 = vsel %vm2469_vm10, 1.0, %v4244_v1  ;;  %v6100_v44 = vsel %vm2469_vm10, -3.4028235e+38, %v5892_v39  ;;  %vm2468_vm11 = vcmp.eq.f32.partialorder %v4608_v42, %v2441_v17 }
 0xb33   :  { %v6104_v59 = vadd.f32 %v3309_v8, %v5899_v0  ;;  %v3308_v16 = vsel %vm2468_vm11, 1.0, %v4244_v1  ;;  %v6108_v46 = vsel %vm2468_vm11, -3.4028235e+38, %v5903_v55  ;;  %2554 = vmax.xlane.f32.xlu1 %v6100_v44 }
 0xb34   :  { %v6112_v49 = vadd.f32 %v3308_v16, %v5906_v61  ;;  %v2447_v4 = vpop.xlane.xlu1 %2446  ;;  %2552 = vmax.xlane.f32.xlu0 %v6108_v46 }
 0xb35   :  { %vm2471_vm12 = vcmp.eq.f32.partialorder %v4608_v42, %v2447_v4  ;;  %v2445_v39 = vpop.xlane.xlu0 %2444 }
 0xb36   :  { %v3311_v28 = vsel %vm2471_vm12, 1.0, %v4244_v1  ;;  %v6118_v0 = vsel %vm2471_vm12, -3.4028235e+38, %v5916_v2  ;;  %vm2470_vm13 = vcmp.eq.f32.partialorder %v4608_v42, %v2445_v39 }
 0xb37   :  { %v6122_v55 = vadd.f32 %v3311_v28, %v5923_v45  ;;  %v3310_v54 = vsel %vm2470_vm13, 1.0, %v4244_v1  ;;  %v6126_v61 = vsel %vm2470_vm13, -3.4028235e+38, %v5927_v36  ;;  %2558 = vmax.xlane.f32.xlu1 %v6118_v0 }
 0xb38   :  { %v6130_v43 = vadd.f32 %v3310_v54, %v5930_v9  ;;  %v2451_v7 = vpop.xlane.xlu1 %2450  ;;  %2556 = vmax.xlane.f32.xlu0 %v6126_v61 }
 0xb39   :  { %vm2473_vm14 = vcmp.eq.f32.partialorder %v4608_v42, %v2451_v7  ;;  %v2449_v2 = vpop.xlane.xlu0 %2448 }
 0xb3a   :  { %v3313_v47 = vsel %vm2473_vm14, 1.0, %v4244_v1  ;;  %v6136_v45 = vsel %vm2473_vm14, -3.4028235e+38, %v5940_v52  ;;  %vm2472_vm15 = vcmp.eq.f32.partialorder %v4608_v42, %v2449_v2 }
 0xb3b   :  { %v6140_v36 = vadd.f32 %v3313_v47, %v5947_v26  ;;  %v3312_v20 = vsel %vm2472_vm15, 1.0, %v4244_v1  ;;  %v6144_v9 = vsel %vm2472_vm15, -3.4028235e+38, %v5951_v14  ;;  %2562 = vmax.xlane.f32.xlu1 %v6136_v45 }
 0xb3c   :  { %v6148_v33 = vadd.f32 %v3312_v20, %v5954_v62  ;;  %v2455_v13 = vpop.xlane.xlu1 %2454  ;;  %2560 = vmax.xlane.f32.xlu0 %v6144_v9 }
 0xb3d   :  { %vm2475_vm5 = vcmp.eq.f32.partialorder %v4608_v42, %v2455_v13  ;;  %v2453_v52 = vpop.xlane.xlu0 %2452 }
 0xb3e   :  { %v3315_v21 = vsel %vm2475_vm5, 1.0, %v4244_v1  ;;  %v6154_v26 = vsel %vm2475_vm5, -3.4028235e+38, %v5964_v18  ;;  %vm2474_vm0 = vcmp.eq.f32.partialorder %v4608_v42, %v2453_v52 }
 0xb3f   :  { %v6158_v14 = vadd.f32 %v3315_v21, %v5971_v23  ;;  %v3314_v25 = vsel %vm2474_vm0, 1.0, %v4244_v1  ;;  %v6162_v62 = vsel %vm2474_vm0, -3.4028235e+38, %v5975_v58  ;;  %2566 = vmax.xlane.f32.xlu1 %v6154_v26 }
 0xb40   :  { %v6166_v37 = vadd.f32 %v3314_v25, %v5978_v56  ;;  %v2459_v51 = vpop.xlane.xlu1 %2458  ;;  %2564 = vmax.xlane.f32.xlu0 %v6162_v62 }
 0xb41   :  { %vm2477_vm3 = vcmp.eq.f32.partialorder %v4608_v42, %v2459_v51  ;;  %v2457_v18 = vpop.xlane.xlu0 %2456 }
 0xb42   :  { %v3317_v11 = vsel %vm2477_vm3, 1.0, %v4244_v1  ;;  %v6172_v23 = vsel %vm2477_vm3, -3.4028235e+38, %v5988_v27  ;;  %vm2476_vm1 = vcmp.eq.f32.partialorder %v4608_v42, %v2457_v18 }
 0xb43   :  { %v6176_v58 = vadd.f32 %v3317_v11, %v5995_v12  ;;  %v3316_v32 = vsel %vm2476_vm1, 1.0, %v4244_v1  ;;  %v6180_v56 = vsel %vm2476_vm1, -3.4028235e+38, %v5999_v15  ;;  %2570 = vmax.xlane.f32.xlu1 %v6172_v23 }
 0xb44   :  { %v6184_v53 = vadd.f32 %v3316_v32, %v6002_v10  ;;  %v2463_v48 = vpop.xlane.xlu1 %2462  ;;  %2568 = vmax.xlane.f32.xlu0 %v6180_v56 }
 0xb45   :  { %vm2479_vm4 = vcmp.eq.f32.partialorder %v4608_v42, %v2463_v48  ;;  %v2461_v27 = vpop.xlane.xlu0 %2460 }
 0xb46   :  { %v3319_v31 = vsel %vm2479_vm4, 1.0, %v4244_v1  ;;  %v6190_v12 = vsel %vm2479_vm4, -3.4028235e+38, %v6012_v57  ;;  %vm2478_vm6 = vcmp.eq.f32.partialorder %v4608_v42, %v2461_v27 }
 0xb47   :  { %v6194_v15 = vadd.f32 %v3319_v31, %v6019_v5  ;;  %v3318_v35 = vsel %vm2478_vm6, 1.0, %v4244_v1  ;;  %v6198_v10 = vsel %vm2478_vm6, -3.4028235e+38, %v6023_v34  ;;  %2574 = vmax.xlane.f32.xlu1 %v6190_v12 }
 0xb48   :  { %v6202_v3 = vadd.f32 %v3318_v35, %v6026_v22  ;;  %2572 = vmax.xlane.f32.xlu0 %v6198_v10 }
 0xbb8   :  { %v2547_v30 = vpop.xlane.xlu1 %2546 }
 0xbb9   :  { %vm2577_vm7 = vcmp.eq.f32.partialorder %v6064_v6, %v2547_v30  ;;  %v2545_v57 = vpop.xlane.xlu0 %2544 }
 0xbba   :  { %v2593_v29 = vsel %vm2577_vm7, %v4608_v42, 128.0  ;;  %vm2576_vm2 = vcmp.eq.f32.partialorder %v6072_v38, %v2545_v57 }
 0xbbb   :  { %v2592_v5 = vsel %vm2576_vm2, %v4608_v42, 128.0  ;;  %2610 = vmin.xlane.f32.xlu1 %v2593_v29 }
 0xbbc   :  { %v2551_v34 = vpop.xlane.xlu1 %2550  ;;  %2608 = vmin.xlane.f32.xlu0 %v2592_v5 }
 0xbbd   :  { %vm2579_vm8 = vcmp.eq.f32.partialorder %v6082_v24, %v2551_v34  ;;  %v2549_v19 = vpop.xlane.xlu0 %2548 }
 0xbbe   :  { %v2595_v22 = vsel %vm2579_vm8, %v4608_v42, 128.0  ;;  %vm2578_vm9 = vcmp.eq.f32.partialorder %v6090_v63, %v2549_v19 }
 0xbbf   :  { %v2594_v17 = vsel %vm2578_vm9, %v4608_v42, 128.0  ;;  %2614 = vmin.xlane.f32.xlu1 %v2595_v22 }
 0xbc0   :  { %v2555_v6 = vpop.xlane.xlu1 %2554  ;;  %2612 = vmin.xlane.f32.xlu0 %v2594_v17 }
 0xbc1   :  { %vm2581_vm10 = vcmp.eq.f32.partialorder %v6100_v44, %v2555_v6  ;;  %v2553_v38 = vpop.xlane.xlu0 %2552 }
 0xbc2   :  { %v2597_v8 = vsel %vm2581_vm10, %v4608_v42, 128.0  ;;  %vm2580_vm11 = vcmp.eq.f32.partialorder %v6108_v46, %v2553_v38 }
 0xbc3   :  { %v2596_v16 = vsel %vm2580_vm11, %v4608_v42, 128.0  ;;  %2618 = vmin.xlane.f32.xlu1 %v2597_v8 }
 0xbc4   :  { %v2559_v24 = vpop.xlane.xlu1 %2558  ;;  %2616 = vmin.xlane.f32.xlu0 %v2596_v16 }
 0xbc5   :  { %vm2583_vm12 = vcmp.eq.f32.partialorder %v6118_v0, %v2559_v24  ;;  %v2557_v63 = vpop.xlane.xlu0 %2556 }
 0xbc6   :  { %v2599_v4 = vsel %vm2583_vm12, %v4608_v42, 128.0  ;;  %vm2582_vm13 = vcmp.eq.f32.partialorder %v6126_v61, %v2557_v63 }
 0xbc7   :  { %v2598_v39 = vsel %vm2582_vm13, %v4608_v42, 128.0  ;;  %2622 = vmin.xlane.f32.xlu1 %v2599_v4 }
 0xbc8   :  { %v2563_v44 = vpop.xlane.xlu1 %2562  ;;  %2620 = vmin.xlane.f32.xlu0 %v2598_v39 }
 0xbc9   :  { %vm2585_vm14 = vcmp.eq.f32.partialorder %v6136_v45, %v2563_v44  ;;  %v2561_v46 = vpop.xlane.xlu0 %2560 }
 0xbca   :  { %v2601_v28 = vsel %vm2585_vm14, %v4608_v42, 128.0  ;;  %vm2584_vm15 = vcmp.eq.f32.partialorder %v6144_v9, %v2561_v46 }
 0xbcb   :  { %v2600_v54 = vsel %vm2584_vm15, %v4608_v42, 128.0  ;;  %2626 = vmin.xlane.f32.xlu1 %v2601_v28 }
 0xbcc   :  { %v2567_v0 = vpop.xlane.xlu1 %2566  ;;  %2624 = vmin.xlane.f32.xlu0 %v2600_v54 }
 0xbcd   :  { %vm2587_vm5 = vcmp.eq.f32.partialorder %v6154_v26, %v2567_v0  ;;  %v2565_v61 = vpop.xlane.xlu0 %2564 }
 0xbce   :  { %v2603_v7 = vsel %vm2587_vm5, %v4608_v42, 128.0  ;;  %vm2586_vm0 = vcmp.eq.f32.partialorder %v6162_v62, %v2565_v61 }
 0xbcf   :  { %v2602_v2 = vsel %vm2586_vm0, %v4608_v42, 128.0  ;;  %2630 = vmin.xlane.f32.xlu1 %v2603_v7 }
 0xbd0   :  { %v2571_v47 = vpop.xlane.xlu1 %2570  ;;  %2628 = vmin.xlane.f32.xlu0 %v2602_v2 }
 0xbd1   :  { %vm2589_vm3 = vcmp.eq.f32.partialorder %v6172_v23, %v2571_v47  ;;  %v2569_v45 = vpop.xlane.xlu0 %2568 }
 0xbd2   :  { %v2605_v20 = vsel %vm2589_vm3, %v4608_v42, 128.0  ;;  %vm2588_vm1 = vcmp.eq.f32.partialorder %v6180_v56, %v2569_v45 }
 0xbd3   :  { %v2604_v9 = vsel %vm2588_vm1, %v4608_v42, 128.0  ;;  %2634 = vmin.xlane.f32.xlu1 %v2605_v20 }
 0xbd4   :  { %v2575_v13 = vpop.xlane.xlu1 %2574  ;;  %2632 = vmin.xlane.f32.xlu0 %v2604_v9 }
 0xbd5   :  { %vm2591_vm4 = vcmp.eq.f32.partialorder %v6190_v12, %v2575_v13  ;;  %v2573_v52 = vpop.xlane.xlu0 %2572 }
 0xbd6   :  { %v2607_v21 = vsel %vm2591_vm4, %v4608_v42, 128.0  ;;  %vm2590_vm6 = vcmp.eq.f32.partialorder %v6198_v10, %v2573_v52 }
 0xbd7   :  { %v2606_v26 = vsel %vm2590_vm6, %v4608_v42, 128.0  ;;  %2638 = vmin.xlane.f32.xlu1 %v2607_v21 }
 0xbd8   :  { %2636 = vmin.xlane.f32.xlu0 %v2606_v26 }
 0xc48   :  { %v2611_v25 = vpop.xlane.xlu1 %2610 }
 0xc49   :  { %vm2641_vm7 = vcmp.eq.f32.partialorder %v4608_v42, %v2611_v25  ;;  %v2609_v62 = vpop.xlane.xlu0 %2608 }
 0xc4a   :  { %v3321_v51 = vsel %vm2641_vm7, 1.0, %v4244_v1  ;;  %vm2640_vm2 = vcmp.eq.f32.partialorder %v4608_v42, %v2609_v62  ;;  %vm6406_vm7 = vcmask 130048  }
 0xc4b   :  { %v2689_v18 = vadd.f32 %v3321_v51, %v6068_v40  ;;  %v3320_v11 = vsel %vm2640_vm2, 1.0, %v4244_v1  ;;  %vm6407_vm2 = vmmov %vm6406_vm7 }
 0xc4c   :  { %v2688_v23 = vadd.f32 %v3320_v11, %v6076_v50  ;;  %v2615_v32 = vpop.xlane.xlu1 %2614 }
 0xc4d   :  { %vm2643_vm8 = vcmp.eq.f32.partialorder %v4608_v42, %v2615_v32  ;;  %v2613_v56 = vpop.xlane.xlu0 %2612  ;;  %v2705_v31 = vmul.f32 0.25, %v2689_v18 }
 0xc4e   :  { %v2704_v48 = vmul.f32 0.25, %v2688_v23  ;;  %v3323_v27 = vsel %vm2643_vm8, 1.0, %v4244_v1  ;;  %vm2642_vm9 = vcmp.eq.f32.partialorder %v4608_v42, %v2613_v56  ;;  %vm6408_vm8 = vmmov %vm6407_vm2 }
 0xc4f   :  { %v2691_v12 = vadd.f32 %v3323_v27, %v6086_v41  ;;  %v3322_v35 = vsel %vm2642_vm9, 1.0, %v4244_v1  ;;  %vm6409_vm9 = vmmov %vm6407_vm2 }
 0xc50   :  { %v2690_v40 = vadd.f32 %v3322_v35, %v6094_v60  ;;  %v2619_v10 = vpop.xlane.xlu1 %2618  ;;  %3848 = vmatprep.mubr.f32.mxu1 %v2704_v48 }
 0xc51   :  { %vm2645_vm10 = vcmp.eq.f32.partialorder %v4608_v42, %v2619_v10  ;;  %3849 = vmatmul.mubr.f32.vlgmr.msra.gmra.mrb[34].mxu1 %v2705_v31  ;;  %v2617_v50 = vpop.xlane.xlu0 %2616  ;;  %v2707_v29 = vmul.f32 0.25, %v2691_v12 }
 0xc52   :  { %v2706_v30 = vmul.f32 0.25, %v2690_v40  ;;  %v3325_v57 = vsel %vm2645_vm10, 1.0, %v4244_v1  ;;  %vm2644_vm11 = vcmp.eq.f32.partialorder %v4608_v42, %v2617_v50  ;;  %vm6410_vm10 = vmmov %vm6407_vm2 }
 0xc53   :  { %v2693_v5 = vadd.f32 %v3325_v57, %v6104_v59  ;;  %v3324_v41 = vsel %vm2644_vm11, 1.0, %v4244_v1  ;;  %vm6411_vm11 = vmmov %vm6407_vm2  ;;  %v4142_v57 = vld [vmem:[#allocation7] ss:$0 sm:$0xff] }
 0xc54   :  { %v2692_v34 = vadd.f32 %v3324_v41, %v6112_v49  ;;  %v2623_v19 = vpop.xlane.xlu1 %2622  ;;  %3851 = vmatprep.mubr.f32.mxu1 %v2706_v30 }
 0xc55   :  { %vm2647_vm12 = vcmp.eq.f32.partialorder %v4608_v42, %v2623_v19  ;;  %3852 = vmatmul.mubr.f32.gmra.mrb[36].mxu1 %v2707_v29  ;;  %v2621_v60 = vpop.xlane.xlu0 %2620  ;;  %v2709_v6 = vmul.f32 0.25, %v2693_v5 }
 0xc56   :  { %v2708_v22 = vmul.f32 0.25, %v2692_v34  ;;  %v3327_v17 = vsel %vm2647_vm12, 1.0, %v4244_v1  ;;  %vm2646_vm13 = vcmp.eq.f32.partialorder %v4608_v42, %v2621_v60  ;;  %vm6412_vm12 = vmmov %vm6407_vm2 }
 0xc57   :  { %v2695_v38 = vadd.f32 %v3327_v17, %v6122_v55  ;;  %v3326_v59 = vsel %vm2646_vm13, 1.0, %v4244_v1  ;;  %vm6413_vm13 = vmmov %vm6407_vm2 }
 0xc58   :  { %v2694_v8 = vadd.f32 %v3326_v59, %v6130_v43  ;;  %v2627_v16 = vpop.xlane.xlu1 %2626  ;;  %3854 = vmatprep.mubr.f32.mxu1 %v2708_v22 }
 0xc59   :  { %vm2649_vm14 = vcmp.eq.f32.partialorder %v4608_v42, %v2627_v16  ;;  %3855 = vmatmul.mubr.f32.gmra.mrb[38].mxu1 %v2709_v6  ;;  %v2625_v49 = vpop.xlane.xlu0 %2624  ;;  %v2711_v4 = vmul.f32 0.25, %v2695_v38 }
 0xc5a   :  { %v2710_v24 = vmul.f32 0.25, %v2694_v8  ;;  %v3329_v63 = vsel %vm2649_vm14, 1.0, %v4244_v1  ;;  %vm2648_vm15 = vcmp.eq.f32.partialorder %v4608_v42, %v2625_v49  ;;  %vm6414_vm14 = vmmov %vm6407_vm2 }
 0xc5b   :  { %v2697_v39 = vadd.f32 %v3329_v63, %v6140_v36  ;;  %v3328_v55 = vsel %vm2648_vm15, 1.0, %v4244_v1  ;;  %vm6415_vm15 = vmmov %vm6407_vm2 }
 0xc5c   :  { %v2696_v44 = vadd.f32 %v3328_v55, %v6148_v33  ;;  %v2631_v46 = vpop.xlane.xlu1 %2630  ;;  %3857 = vmatprep.mubr.f32.mxu1 %v2710_v24 }
 0xc5d   :  { %vm2651_vm5 = vcmp.eq.f32.partialorder %v4608_v42, %v2631_v46  ;;  %3858 = vmatmul.mubr.f32.gmra.mrb[40].mxu1 %v2711_v4  ;;  %v2629_v43 = vpop.xlane.xlu0 %2628  ;;  %v2713_v0 = vmul.f32 0.25, %v2697_v39 }
 0xc5e   :  { %v2712_v28 = vmul.f32 0.25, %v2696_v44  ;;  %v3331_v54 = vsel %vm2651_vm5, 1.0, %v4244_v1  ;;  %vm2650_vm0 = vcmp.eq.f32.partialorder %v4608_v42, %v2629_v43  ;;  %vm6416_vm5 = vmmov %vm6407_vm2 }
 0xc5f   :  { %v2699_v61 = vadd.f32 %v3331_v54, %v6158_v14  ;;  %v3330_v36 = vsel %vm2650_vm0, 1.0, %v4244_v1  ;;  %vm6417_vm0 = vmmov %vm6407_vm2 }
 0xc60   :  { %v2698_v7 = vadd.f32 %v3330_v36, %v6166_v37  ;;  %v2635_v2 = vpop.xlane.xlu1 %2634  ;;  %3860 = vmatprep.mubr.f32.mxu1 %v2712_v28 }
 0xc61   :  { %vm2653_vm3 = vcmp.eq.f32.partialorder %v4608_v42, %v2635_v2  ;;  %3861 = vmatmul.mubr.f32.gmra.mrb[42].mxu1 %v2713_v0  ;;  %v2633_v33 = vpop.xlane.xlu0 %2632  ;;  %v2715_v20 = vmul.f32 0.25, %v2699_v61 }
 0xc62   :  { %v2714_v47 = vmul.f32 0.25, %v2698_v7  ;;  %v3333_v45 = vsel %vm2653_vm3, 1.0, %v4244_v1  ;;  %vm2652_vm1 = vcmp.eq.f32.partialorder %v4608_v42, %v2633_v33  ;;  %vm6418_vm3 = vmmov %vm6417_vm0 }
 0xc63   :  { %v2701_v9 = vadd.f32 %v3333_v45, %v6176_v58  ;;  %v3332_v14 = vsel %vm2652_vm1, 1.0, %v4244_v1  ;;  %vm6419_vm1 = vmmov %vm6417_vm0 }
 0xc64   :  { %v2700_v13 = vadd.f32 %v3332_v14, %v6184_v53  ;;  %v2639_v52 = vpop.xlane.xlu1 %2638  ;;  %3863 = vmatprep.mubr.f32.mxu1 %v2714_v47 }
 0xc65   :  { %vm2655_vm4 = vcmp.eq.f32.partialorder %v4608_v42, %v2639_v52  ;;  %3864 = vmatmul.mubr.f32.gmra.mrb[44].mxu1 %v2715_v20  ;;  %v2637_v37 = vpop.xlane.xlu0 %2636  ;;  %v2717_v25 = vmul.f32 0.25, %v2701_v9 }
 0xc66   :  { %v2716_v21 = vmul.f32 0.25, %v2700_v13  ;;  %v3335_v26 = vsel %vm2655_vm4, 1.0, %v4244_v1  ;;  %vm2654_vm6 = vcmp.eq.f32.partialorder %v4608_v42, %v2637_v37  ;;  %vm6420_vm4 = vmmov %vm6417_vm0 }
 0xc67   :  { %v2703_v62 = vadd.f32 %v3335_v26, %v6194_v15  ;;  %v3334_v58 = vsel %vm2654_vm6, 1.0, %v4244_v1  ;;  %vm6421_vm6 = vmmov %vm6417_vm0 }
 0xc68   :  { %v2702_v51 = vadd.f32 %v3334_v58, %v6202_v3  ;;  %3866 = vmatprep.mubr.f32.mxu1 %v2716_v21 }
 0xc69   :  { %3867 = vmatmul.mubr.f32.gmra.mrb[46].mxu1 %v2717_v25  ;;  %v2719_v18 = vmul.f32 0.25, %v2703_v62 }
 0xc6a   :  { %v2718_v53 = vmul.f32 0.25, %v2702_v51 }
 0xc6c   :  { %3869 = vmatprep.mubr.f32.mxu1 %v2718_v53 }
 0xc6d   :  { %3870 = vmatmul.mubr.f32.gmra.mrb[48].mxu1 %v2719_v18 }
 0xd24   :  { %v3850_v11 = vpop.f32.mrb[34].mxu1 }
 0xd25   :  { %v2786_v23 = vpop.f32.mrb[35].mxu1 }
 0xd26   :  { %3876 = vmatprep.mubr.msk.f32.mxu0 %vm6406_vm7, %v2786_v23  ;;  %vm6422_vm7 = vcmask 261120  }
 0xd27   :  { %3877 = vmatmul.mubr.msk.f32.vlgmr.msra.gmra.mrb[34].mxu0 %vm6407_vm2, %v3850_v11  ;;  %vm6423_vm2 = vmmov %vm6422_vm7 }
 0xd28   :  { %v3853_v42 = vpop.f32.mrb[36].mxu1 }
 0xd29   :  { %v2796_v32 = vpop.f32.mrb[37].mxu1 }
 0xd2a   :  { %3879 = vmatprep.mubr.msk.f32.mxu0 %vm6408_vm8, %v2796_v32  ;;  %vm6424_vm8 = vmmov %vm6423_vm2 }
 0xd2b   :  { %3880 = vmatmul.mubr.msk.f32.gmra.mrb[36].mxu0 %vm6409_vm9, %v3853_v42  ;;  %vm6425_vm9 = vmmov %vm6423_vm2 }
 0xd2c   :  { %v3856_v1 = vpop.f32.mrb[38].mxu1 }
 0xd2d   :  { %v2806_v15 = vpop.f32.mrb[39].mxu1 }
 0xd2e   :  { %3882 = vmatprep.mubr.msk.f32.mxu0 %vm6410_vm10, %v2806_v15  ;;  %vm6426_vm10 = vmmov %vm6423_vm2 }
 0xd2f   :  { %3883 = vmatmul.mubr.msk.f32.gmra.mrb[38].mxu0 %vm6411_vm11, %v3856_v1  ;;  %vm6427_vm11 = vmmov %vm6423_vm2 }
 0xd30   :  { %v3859_v3 = vpop.f32.mrb[40].mxu1 }
 0xd31   :  { %v2816_v56 = vpop.f32.mrb[41].mxu1 }
 0xd32   :  { %3885 = vmatprep.mubr.msk.f32.mxu0 %vm6412_vm12, %v2816_v56  ;;  %vm6428_vm12 = vmmov %vm6423_vm2 }
 0xd33   :  { %3886 = vmatmul.mubr.msk.f32.gmra.mrb[40].mxu0 %vm6413_vm13, %v3859_v3  ;;  %vm6429_vm13 = vmmov %vm6423_vm2 }
 0xd34   :  { %v3862_v48 = vpop.f32.mrb[42].mxu1 }
 0xd35   :  { %v2826_v27 = vpop.f32.mrb[43].mxu1 }
 0xd36   :  { %3888 = vmatprep.mubr.msk.f32.mxu0 %vm6414_vm14, %v2826_v27  ;;  %vm6430_vm14 = vmmov %vm6423_vm2 }
 0xd37   :  { %3889 = vmatmul.mubr.msk.f32.gmra.mrb[42].mxu0 %vm6415_vm15, %v3862_v48  ;;  %vm6431_vm15 = vmmov %vm6423_vm2 }
 0xd38   :  { %v3865_v31 = vpop.f32.mrb[44].mxu1 }
 0xd39   :  { %v2836_v12 = vpop.f32.mrb[45].mxu1 }
 0xd3a   :  { %3891 = vmatprep.mubr.msk.f32.mxu0 %vm6416_vm5, %v2836_v12  ;;  %vm6432_vm5 = vmmov %vm6423_vm2 }
 0xd3b   :  { %3892 = vmatmul.mubr.msk.f32.gmra.mrb[44].mxu0 %vm6417_vm0, %v3865_v31  ;;  %vm6433_vm0 = vmmov %vm6423_vm2 }
 0xd3c   :  { %v3868_v35 = vpop.f32.mrb[46].mxu1 }
 0xd3d   :  { %v2846_v40 = vpop.f32.mrb[47].mxu1 }
 0xd3e   :  { %3894 = vmatprep.mubr.msk.f32.mxu0 %vm6418_vm3, %v2846_v40  ;;  %vm6434_vm3 = vmmov %vm6433_vm0 }
 0xd3f   :  { %3895 = vmatmul.mubr.msk.f32.gmra.mrb[46].mxu0 %vm6419_vm1, %v3868_v35  ;;  %vm6435_vm1 = vmmov %vm6433_vm0 }
 0xd40   :  { %v3871_v10 = vpop.f32.mrb[48].mxu1 }
 0xd41   :  { %v2856_v50 = vpop.f32.mrb[49].mxu1 }
 0xd42   :  { %3897 = vmatprep.mubr.msk.f32.mxu0 %vm6420_vm4, %v2856_v50  ;;  %vm6436_vm4 = vmmov %vm6433_vm0 }
 0xd43   :  { %3898 = vmatmul.mubr.msk.f32.gmra.mrb[48].mxu0 %vm6421_vm6, %v3871_v10  ;;  %vm6437_vm6 = vmmov %vm6433_vm0 }
 0xdfa   :  { %v3878_v30 = vpop.f32.mrb[34].mxu0 }
 0xdfb   :  { %v2985_v29 = vadd.f32 %v4142_v57, %v3878_v30  ;;  %v2979_v5 = vpop.f32.mrb[35].mxu0 }
 0xdfc   :  { %v2980_v41 = vadd.f32 %v4142_v57, %v2979_v5 }
 0xdfd   :  { %3060 = vst.msk [vmem:[#allocation8 + $0x88] sm:$0xff] %vm6422_vm7, %v2985_v29 }
 0xdfe   :  { %3059 = vst.msk [vmem:[#allocation8 + $0x80] sm:$0xff] %vm6423_vm2, %v2980_v41  ;;  %v3881_v34 = vpop.f32.mrb[36].mxu0 }
 0xdff   :  { %v2995_v19 = vadd.f32 %v4142_v57, %v3881_v34  ;;  %v2989_v60 = vpop.f32.mrb[37].mxu0 }
 0xe00   :  { %v2990_v22 = vadd.f32 %v4142_v57, %v2989_v60 }
 0xe01   :  { %3062 = vst.msk [vmem:[#allocation8 + $0x98] sm:$0xff] %vm6424_vm8, %v2995_v19 }
 0xe02   :  { %3061 = vst.msk [vmem:[#allocation8 + $0x90] sm:$0xff] %vm6425_vm9, %v2990_v22  ;;  %v3884_v17 = vpop.f32.mrb[38].mxu0 }
 0xe03   :  { %v3005_v6 = vadd.f32 %v4142_v57, %v3884_v17  ;;  %v2999_v38 = vpop.f32.mrb[39].mxu0 }
 0xe04   :  { %v3000_v59 = vadd.f32 %v4142_v57, %v2999_v38 }
 0xe05   :  { %3064 = vst.msk [vmem:[#allocation8 + $0xa8] sm:$0xff] %vm6426_vm10, %v3005_v6 }
 0xe06   :  { %3063 = vst.msk [vmem:[#allocation8 + $0xa0] sm:$0xff] %vm6427_vm11, %v3000_v59  ;;  %v3887_v8 = vpop.f32.mrb[40].mxu0 }
 0xe07   :  { %v3015_v16 = vadd.f32 %v4142_v57, %v3887_v8  ;;  %v3009_v49 = vpop.f32.mrb[41].mxu0 }
 0xe08   :  { %v3010_v24 = vadd.f32 %v4142_v57, %v3009_v49 }
 0xe09   :  { %3066 = vst.msk [vmem:[#allocation8 + $0xb8] sm:$0xff] %vm6428_vm12, %v3015_v16 }
 0xe0a   :  { %3065 = vst.msk [vmem:[#allocation8 + $0xb0] sm:$0xff] %vm6429_vm13, %v3010_v24  ;;  %v3890_v63 = vpop.f32.mrb[42].mxu0 }
 0xe0b   :  { %v3025_v4 = vadd.f32 %v4142_v57, %v3890_v63  ;;  %v3019_v39 = vpop.f32.mrb[43].mxu0 }
 0xe0c   :  { %v3020_v55 = vadd.f32 %v4142_v57, %v3019_v39 }
 0xe0d   :  { %3068 = vst.msk [vmem:[#allocation8 + $0xc8] sm:$0xff] %vm6430_vm14, %v3025_v4 }
 0xe0e   :  { %3067 = vst.msk [vmem:[#allocation8 + $0xc0] sm:$0xff] %vm6431_vm15, %v3020_v55  ;;  %v3893_v44 = vpop.f32.mrb[44].mxu0 }
 0xe0f   :  { %v3035_v46 = vadd.f32 %v4142_v57, %v3893_v44  ;;  %v3029_v43 = vpop.f32.mrb[45].mxu0 }
 0xe10   :  { %v3030_v28 = vadd.f32 %v4142_v57, %v3029_v43 }
 0xe11   :  { %3070 = vst.msk [vmem:[#allocation8 + $0xd8] sm:$0xff] %vm6432_vm5, %v3035_v46 }
 0xe12   :  { %3069 = vst.msk [vmem:[#allocation8 + $0xd0] sm:$0xff] %vm6433_vm0, %v3030_v28  ;;  %v3896_v54 = vpop.f32.mrb[46].mxu0 }
 0xe13   :  { %v3045_v0 = vadd.f32 %v4142_v57, %v3896_v54  ;;  %v3039_v61 = vpop.f32.mrb[47].mxu0 }
 0xe14   :  { %v3040_v36 = vadd.f32 %v4142_v57, %v3039_v61 }
 0xe15   :  { %3072 = vst.msk [vmem:[#allocation8 + $0xe8] sm:$0xff] %vm6434_vm3, %v3045_v0 }
 0xe16   :  { %3071 = vst.msk [vmem:[#allocation8 + $0xe0] sm:$0xff] %vm6435_vm1, %v3040_v36  ;;  %v3899_v7 = vpop.f32.mrb[48].mxu0 }
 0xe17   :  { %v3055_v2 = vadd.f32 %v4142_v57, %v3899_v7  ;;  %v3049_v33 = vpop.f32.mrb[49].mxu0 }
 0xe18   :  { %v3050_v47 = vadd.f32 %v4142_v57, %v3049_v33 }
 0xe19   :  { %3074 = vst.msk [vmem:[#allocation8 + $0xf8] sm:$0xff] %vm6436_vm4, %v3055_v2 }
 0xe1a   :  { %3073 = vst.msk [vmem:[#allocation8 + $0xf0] sm:$0xff] %vm6437_vm6, %v3050_v47 }
 0xe1b   :  { %4220 = shalt.err (!%p4217_p0)
}
 0xe1c   :  { %s4221_s28 = scalar_lea.hbm %s6335_s3, 4096 }
 0xe1d   :  { %p4222_p1 = scmp.ne.s32.totalorder %s6335_s3, %s4221_s28  ;;  %p4225_p2 = scmp.lt.u32.totalorder %s4221_s28, %s6335_s3 }
 0xe1f   :  { %p4227_p3 = pnand %p4225_p2, %p4222_p1 }
 0xe21   :  { %4230 = shalt.err (!%p4227_p3)
}
 0xe22   :  { %3086 = dma.vmem_to_hbm [thread:$0]  %s3081_s22, 4096, %s6335_s3, [#allocation4], %s4239_s24, %s4239_s24, %s4240_s25  }
 0xe23   :  { %4235 = dma.done.wait [#allocation4], 4096  }
 0xe24   :  { %4236 = vsyncadd [#allocation4], 4294963200 }
 0xe25   :  { %3090 = vsyncpa [#allocation3], 1 }
 0xe26   :  { %3091 = vsyncpa [#allocation6], 1 }
 0xe27   :  { %3092 = vsyncpa [#allocation4], 1 }

</bundles_post_ra>
